<compile_context>
chip_gen: v5e
topology: v5e:2x2
jax: 0.10.0
libtpu: 0.0.40
codegen_flags: <defaults>
</compile_context>

<pallas_src>
import functools

import numpy as np
import jax
import jax.numpy as jnp
from jax import lax
from jax.experimental import pallas as pl
from jax.experimental.pallas import tpu as pltpu

BN_EPS = 1e-5
HIGHEST = lax.Precision.HIGHEST

# ---- block-1 geometry: 28x28 image zero-padded to 30x32, row pitch 32 -------
XW1 = 1024                      # padded-input lane width (>= 960 + max tap 66)
Y1W = 896                       # conv-1 output lanes: n = 32*h + w, h,w in 0..27
LB1 = 64 * 13 + 2 * 13 + 1      # 859 pool-1 base lanes (m = 64*i + 2*j, i,j<=13)
PADF2 = 256                     # block-2 padded plane: 16x16, flat k = 16*hp + wp

# ---- block-2 geometry: 14x14 zero-padded to 16x16, row pitch 16 -------------
Y2W = 222                       # conv-2 output lanes: m = 16*h + w, h,w in 0..13
LB2 = 32 * 6 + 2 * 6 + 1        # 205 pool-2 base lanes (m = 32*i + 2*j, i,j<=6)


def _cnnnet_kernel(xrep_ref, w1e_ref, g1_ref, be1_ref, mask1_ref, pmat_ref,
                   sel1_ref, w2e_ref, g2_ref, be2_ref, mask2_ref,
                   selw_ref, bl_ref, out_ref, *, batch):
    B = batch
    f32 = jnp.float32
    pmat = pmat_ref[...]                                   # [4B,4B] same-channel block sums

    # ---------------- Block 1: conv 3x3 (VPU shift-and-accumulate) ----------
    w1e = w1e_ref[...]                                     # [4B, 9]
    y1 = None
    for kh in range(3):
        for kw in range(3):
            r = 3 * kh + kw
            t = w1e[:, r:r + 1] * xrep_ref[:, pl.ds(32 * kh + kw, Y1W)]
            y1 = t if y1 is None else y1 + t               # [4B, 896]

    # ---------------- BN1 (training-mode batch statistics) + ReLU -----------
    # Only the width-padding columns (w >= 28) are invalid; rows 0..27 are all
    # real conv outputs, so no vertical-pad masking is needed at width 896.
    mask1 = mask1_ref[...]                                 # (1, 896)
    inv_n1 = 1.0 / (B * 28 * 28)
    s1 = jnp.sum(y1 * mask1, axis=1, keepdims=True)        # [4B, 1]
    mean1 = jnp.dot(pmat, s1, precision=HIGHEST,
                    preferred_element_type=f32) * inv_n1
    d1 = y1 - mean1
    v1 = jnp.sum(d1 * d1 * mask1, axis=1, keepdims=True)
    var1 = jnp.dot(pmat, v1, precision=HIGHEST,
                   preferred_element_type=f32) * inv_n1
    ya1 = jnp.maximum(
        d1 * lax.rsqrt(var1 + BN_EPS) * g1_ref[...] + be1_ref[...], 0.0)

    # ------ MaxPool1 2x2/2 + scatter into padded 16x16 planes (one MXU dot) -
    bmax1 = jnp.maximum(jnp.maximum(ya1[:, 0:LB1], ya1[:, 1:1 + LB1]),
                        jnp.maximum(ya1[:, 32:32 + LB1], ya1[:, 33:33 + LB1]))
    xpad2 = jnp.dot(bmax1, sel1_ref[...],
                    preferred_element_type=f32)            # [4B, 256], borders exactly 0

    # ---------------- Block 2: conv 3x3 over 4 input channels ---------------
    w2e = w2e_ref[...]                                     # [4B, 36]
    y2 = None
    for ci in range(4):
        blk = xpad2[ci * B:(ci + 1) * B, :]                # [B, 256]  (channel ci, all b)
        src = jnp.concatenate([blk, blk, blk, blk], axis=0)    # [4B, 256] aligned to co rows
        for kh in range(3):
            for kw in range(3):
                r = ci * 9 + 3 * kh + kw
                off = 16 * kh + kw
                t = w2e[:, r:r + 1] * src[:, off:off + Y2W]
                y2 = t if y2 is None else y2 + t           # [4B, 222]

    # ---------------- BN2 + ReLU ---------------------------------------------
    mask2 = mask2_ref[...]                                 # (1, 222)
    inv_n2 = 1.0 / (B * 14 * 14)
    s2 = jnp.sum(y2 * mask2, axis=1, keepdims=True)
    mean2 = jnp.dot(pmat, s2, precision=HIGHEST,
                    preferred_element_type=f32) * inv_n2
    d2 = y2 - mean2
    v2 = jnp.sum(d2 * d2 * mask2, axis=1, keepdims=True)
    var2 = jnp.dot(pmat, v2, precision=HIGHEST,
                   preferred_element_type=f32) * inv_n2
    ya2 = jnp.maximum(
        d2 * lax.rsqrt(var2 + BN_EPS) * g2_ref[...] + be2_ref[...], 0.0)

    # ---- MaxPool2 + NCHW flatten + Linear, folded into 4 gather-weight dots -
    bmax2 = jnp.maximum(jnp.maximum(ya2[:, 0:LB2], ya2[:, 1:1 + LB2]),
                        jnp.maximum(ya2[:, 16:16 + LB2], ya2[:, 17:17 + LB2]))
    acc = jnp.zeros((B, 31), f32)
    for c in range(4):
        acc = acc + jnp.dot(bmax2[c * B:(c + 1) * B, :], selw_ref[c],
                            preferred_element_type=f32)
    out_ref[...] = acc + bl_ref[...]


@jax.jit
def cnnnet_forward(x, p):
    assert x.shape[1:] == (1, 28, 28)
    B = x.shape[0]
    f32 = jnp.float32

    # --- input: zero-pad to 30x32, flatten rows (pitch 32), pad lanes,
    #     replicate once per output channel -> rows = channel*B + batch.
    xp = jnp.zeros((B, 30, 32), f32).at[:, 1:29, 1:29].set(x[:, 0].astype(f32))
    xflat = jnp.pad(xp.reshape(B, 960), ((0, 0), (0, XW1 - 960)))
    xrep = jnp.tile(xflat, (4, 1))                         # [4B, 1024]

    # --- per-row (channel-replicated) conv / BN parameters
    w1e = jnp.repeat(p["w1"].reshape(4, 9), B, axis=0)     # [4B, 9]
    w2e = jnp.repeat(p["w2"].reshape(4, 36), B, axis=0)    # [4B, 36]
    g1e = jnp.repeat(p["g1"].reshape(4, 1), B, axis=0)
    be1e = jnp.repeat(p["be1"].reshape(4, 1), B, axis=0)
    g2e = jnp.repeat(p["g2"].reshape(4, 1), B, axis=0)
    be2e = jnp.repeat(p["be2"].reshape(4, 1), B, axis=0)
    # NOTE: conv biases b1/b2 are exactly cancelled by the training-mode
    # BatchNorm mean subtraction, so they are not passed into the kernel.

    # --- same-channel block-sum matrix for the BN batch statistics
    pmat = jnp.asarray(np.kron(np.eye(4, dtype=np.float32),
                               np.ones((B, B), np.float32)))   # [4B, 4B]

    # --- BN validity masks (only width-padding columns are invalid)
    mask1 = jnp.asarray(((np.arange(Y1W) % 32) < 28).astype(np.float32)[None])
    mask2 = jnp.asarray(((np.arange(Y2W) % 16) < 14).astype(np.float32)[None])

    # --- pool-1 gather/scatter selector:
    #     base lane 64i+2j -> padded block-2 lane 16(i+1)+(j+1); borders stay 0.
    ii, jj = np.meshgrid(np.arange(14), np.arange(14), indexing="ij")
    sel1_np = np.zeros((LB1, PADF2), np.float32)
    sel1_np[(64 * ii + 2 * jj).reshape(-1),
            (16 * (ii + 1) + jj + 1).reshape(-1)] = 1.0
    sel1 = jnp.asarray(sel1_np)

    # --- pool-2 gather + NCHW flatten folded into the linear layer:
    #     selw[c, 32i+2j, :] = wl[:, c*49 + 7i + j]
    ii7, jj7 = np.meshgrid(np.arange(7), np.arange(7), indexing="ij")
    m_of_k = (32 * ii7 + 2 * jj7).reshape(-1)              # [49]
    wl_t = p["wl"].T.reshape(4, 49, 31)                    # [4, 49, 31]
    selw = jnp.zeros((4, LB2, 31), f32).at[:, m_of_k, :].set(wl_t)
    bl = p["bl"].reshape(1, 31)

    vmem = pl.BlockSpec(memory_space=pltpu.MemorySpace.VMEM)
    return pl.pallas_call(
        functools.partial(_cnnnet_kernel, batch=B),
        out_shape=jax.ShapeDtypeStruct((B, 31), f32),
        in_specs=[vmem] * 13,
        out_specs=vmem,
        compiler_params=pltpu.CompilerParams(
            vmem_limit_bytes=32 * 1024 * 1024),
    )(xrep, w1e, g1e, be1e, mask1, pmat, sel1,
      w2e, g2e, be2e, mask2, selw, bl)


def init_params(key):
    ks = jax.random.split(key, 10)
    return {
        "w1": 0.3 * jax.random.normal(ks[0], (4, 1, 3, 3), jnp.float32),
        "b1": 0.1 * jax.random.normal(ks[1], (4,), jnp.float32),
        "g1": 1.0 + 0.1 * jax.random.normal(ks[2], (4,), jnp.float32),
        "be1": 0.1 * jax.random.normal(ks[3], (4,), jnp.float32),
        "w2": 0.2 * jax.random.normal(ks[4], (4, 4, 3, 3), jnp.float32),
        "b2": 0.1 * jax.random.normal(ks[5], (4,), jnp.float32),
        "g2": 1.0 + 0.1 * jax.random.normal(ks[6], (4,), jnp.float32),
        "be2": 0.1 * jax.random.normal(ks[7], (4,), jnp.float32),
        "wl": 0.1 * jax.random.normal(ks[8], (31, 4 * 7 * 7), jnp.float32),
        "bl": 0.1 * jax.random.normal(ks[9], (31,), jnp.float32),
    }


def ref_forward(x, p):
    """Pure-JAX reference with identical (training-mode BN) semantics.

    Keeps the conv biases to demonstrate they are cancelled by BatchNorm and
    uses HIGHEST-precision matmuls as the ground truth.
    """
    def block(h, w, b, g, be):
        h = lax.conv_general_dilated(
            h, w, (1, 1), ((1, 1), (1, 1)),
            dimension_numbers=("NCHW", "OIHW", "NCHW"), precision=HIGHEST)
        h = h + b[None, :, None, None]
        mu = jnp.mean(h, axis=(0, 2, 3), keepdims=True)
        var = jnp.mean((h - mu) ** 2, axis=(0, 2, 3), keepdims=True)
        h = (h - mu) * lax.rsqrt(var + BN_EPS)
        h = h * g[None, :, None, None] + be[None, :, None, None]
        h = jnp.maximum(h, 0.0)
        h = lax.reduce_window(h, -jnp.inf, lax.max,
                              (1, 1, 2, 2), (1, 1, 2, 2), "VALID")
        return h

    h = block(x, p["w1"], p["b1"], p["g1"], p["be1"])
    h = block(h, p["w2"], p["b2"], p["g2"], p["be2"])
    h = h.reshape(h.shape[0], -1)
    return jnp.dot(h, p["wl"].T, precision=HIGHEST) + p["bl"]


if __name__ == "__main__":
    key = jax.random.PRNGKey(0)
    kx, kp = jax.random.split(key)
    # Spatial size must be 28x28 so the flattened feature size is 4*7*7 = 196.
    x = jax.random.normal(kx, (2, 1, 28, 28), jnp.float32)
    params = init_params(kp)

    out = jax.block_until_ready(cnnnet_forward(x, params))
    assert out.shape == (2, 31), out.shape

    ref = jax.block_until_ready(ref_forward(x, params))
    # Tolerance covers the default (single bf16-pass) precision used for the
    # two gather matmuls; the convolutions themselves are exact f32 VPU math.
    if not jnp.allclose(out, ref, rtol=2e-2, atol=2e-2):
        raise AssertionError(
            f"Pallas output mismatch vs reference; max abs err = "
            f"{float(jnp.max(jnp.abs(out - ref)))}")

    print("KERNEL_OK")
</pallas_src>

<mosaic_0001>
module attributes {stable_mosaic.version = 11 : i64} {
  func.func @_cnnnet_kernel(%arg0: memref<8x1024xf32, #tpu.memory_space<vmem>>, %arg1: memref<8x9xf32, #tpu.memory_space<vmem>>, %arg2: memref<8x1xf32, #tpu.memory_space<vmem>>, %arg3: memref<8x1xf32, #tpu.memory_space<vmem>>, %arg4: memref<1x896xf32, #tpu.memory_space<vmem>>, %arg5: memref<8x8xf32, #tpu.memory_space<vmem>>, %arg6: memref<859x256xf32, #tpu.memory_space<vmem>>, %arg7: memref<8x36xf32, #tpu.memory_space<vmem>>, %arg8: memref<8x1xf32, #tpu.memory_space<vmem>>, %arg9: memref<8x1xf32, #tpu.memory_space<vmem>>, %arg10: memref<1x222xf32, #tpu.memory_space<vmem>>, %arg11: memref<4x205x31xf32, #tpu.memory_space<vmem>>, %arg12: memref<1x31xf32, #tpu.memory_space<vmem>>, %arg13: memref<2x31xf32, #tpu.memory_space<vmem>>) attributes {dimension_semantics = [], scalar_prefetch = 0 : i64, scratch_operands = 0 : i64, tpu.core_type = #tpu.core_type<tc>} {
    %c0 = arith.constant 0 : index
    %c0_0 = arith.constant 0 : index
    %0 = vector.load %arg5[%c0, %c0_0] : memref<8x8xf32, #tpu.memory_space<vmem>>, vector<8x8xf32>
    %c0_1 = arith.constant 0 : index
    %c0_2 = arith.constant 0 : index
    %1 = vector.load %arg1[%c0_1, %c0_2] : memref<8x9xf32, #tpu.memory_space<vmem>>, vector<8x9xf32>
    %2 = vector.extract_strided_slice %1 {offsets = [0, 0], sizes = [8, 1], strides = [1, 1]} : vector<8x9xf32> to vector<8x1xf32>
    %c0_3 = arith.constant 0 : index
    %c0_4 = arith.constant 0 : index
    %3 = vector.load %arg0[%c0_3, %c0_4] : memref<8x1024xf32, #tpu.memory_space<vmem>>, vector<8x896xf32>
    %4 = vector.broadcast %2 : vector<8x1xf32> to vector<8x896xf32>
    %5 = arith.mulf %4, %3 : vector<8x896xf32>
    %6 = vector.extract_strided_slice %1 {offsets = [0, 1], sizes = [8, 1], strides = [1, 1]} : vector<8x9xf32> to vector<8x1xf32>
    %c0_5 = arith.constant 0 : index
    %c1 = arith.constant 1 : index
    %7 = vector.load %arg0[%c0_5, %c1] : memref<8x1024xf32, #tpu.memory_space<vmem>>, vector<8x896xf32>
    %8 = vector.broadcast %6 : vector<8x1xf32> to vector<8x896xf32>
    %9 = arith.mulf %8, %7 : vector<8x896xf32>
    %10 = arith.addf %5, %9 : vector<8x896xf32>
    %11 = vector.extract_strided_slice %1 {offsets = [0, 2], sizes = [8, 1], strides = [1, 1]} : vector<8x9xf32> to vector<8x1xf32>
    %c0_6 = arith.constant 0 : index
    %c2 = arith.constant 2 : index
    %12 = vector.load %arg0[%c0_6, %c2] : memref<8x1024xf32, #tpu.memory_space<vmem>>, vector<8x896xf32>
    %13 = vector.broadcast %11 : vector<8x1xf32> to vector<8x896xf32>
    %14 = arith.mulf %13, %12 : vector<8x896xf32>
    %15 = arith.addf %10, %14 : vector<8x896xf32>
    %16 = vector.extract_strided_slice %1 {offsets = [0, 3], sizes = [8, 1], strides = [1, 1]} : vector<8x9xf32> to vector<8x1xf32>
    %c0_7 = arith.constant 0 : index
    %c32 = arith.constant 32 : index
    %17 = vector.load %arg0[%c0_7, %c32] : memref<8x1024xf32, #tpu.memory_space<vmem>>, vector<8x896xf32>
    %18 = vector.broadcast %16 : vector<8x1xf32> to vector<8x896xf32>
    %19 = arith.mulf %18, %17 : vector<8x896xf32>
    %20 = arith.addf %15, %19 : vector<8x896xf32>
    %21 = vector.extract_strided_slice %1 {offsets = [0, 4], sizes = [8, 1], strides = [1, 1]} : vector<8x9xf32> to vector<8x1xf32>
    %c0_8 = arith.constant 0 : index
    %c33 = arith.constant 33 : index
    %22 = vector.load %arg0[%c0_8, %c33] : memref<8x1024xf32, #tpu.memory_space<vmem>>, vector<8x896xf32>
    %23 = vector.broadcast %21 : vector<8x1xf32> to vector<8x896xf32>
    %24 = arith.mulf %23, %22 : vector<8x896xf32>
    %25 = arith.addf %20, %24 : vector<8x896xf32>
    %26 = vector.extract_strided_slice %1 {offsets = [0, 5], sizes = [8, 1], strides = [1, 1]} : vector<8x9xf32> to vector<8x1xf32>
    %c0_9 = arith.constant 0 : index
    %c34 = arith.constant 34 : index
    %27 = vector.load %arg0[%c0_9, %c34] : memref<8x1024xf32, #tpu.memory_space<vmem>>, vector<8x896xf32>
    %28 = vector.broadcast %26 : vector<8x1xf32> to vector<8x896xf32>
    %29 = arith.mulf %28, %27 : vector<8x896xf32>
    %30 = arith.addf %25, %29 : vector<8x896xf32>
    %31 = vector.extract_strided_slice %1 {offsets = [0, 6], sizes = [8, 1], strides = [1, 1]} : vector<8x9xf32> to vector<8x1xf32>
    %c0_10 = arith.constant 0 : index
    %c64 = arith.constant 64 : index
    %32 = vector.load %arg0[%c0_10, %c64] : memref<8x1024xf32, #tpu.memory_space<vmem>>, vector<8x896xf32>
    %33 = vector.broadcast %31 : vector<8x1xf32> to vector<8x896xf32>
    %34 = arith.mulf %33, %32 : vector<8x896xf32>
    %35 = arith.addf %30, %34 : vector<8x896xf32>
    %36 = vector.extract_strided_slice %1 {offsets = [0, 7], sizes = [8, 1], strides = [1, 1]} : vector<8x9xf32> to vector<8x1xf32>
    %c0_11 = arith.constant 0 : index
    %c65 = arith.constant 65 : index
    %37 = vector.load %arg0[%c0_11, %c65] : memref<8x1024xf32, #tpu.memory_space<vmem>>, vector<8x896xf32>
    %38 = vector.broadcast %36 : vector<8x1xf32> to vector<8x896xf32>
    %39 = arith.mulf %38, %37 : vector<8x896xf32>
    %40 = arith.addf %35, %39 : vector<8x896xf32>
    %41 = vector.extract_strided_slice %1 {offsets = [0, 8], sizes = [8, 1], strides = [1, 1]} : vector<8x9xf32> to vector<8x1xf32>
    %c0_12 = arith.constant 0 : index
    %c66 = arith.constant 66 : index
    %42 = vector.load %arg0[%c0_12, %c66] : memref<8x1024xf32, #tpu.memory_space<vmem>>, vector<8x896xf32>
    %43 = vector.broadcast %41 : vector<8x1xf32> to vector<8x896xf32>
    %44 = arith.mulf %43, %42 : vector<8x896xf32>
    %45 = arith.addf %40, %44 : vector<8x896xf32>
    %c0_13 = arith.constant 0 : index
    %c0_14 = arith.constant 0 : index
    %46 = vector.load %arg4[%c0_13, %c0_14] : memref<1x896xf32, #tpu.memory_space<vmem>>, vector<1x896xf32>
    %47 = vector.broadcast %46 : vector<1x896xf32> to vector<8x896xf32>
    %48 = arith.mulf %45, %47 : vector<8x896xf32>
    %cst = arith.constant dense<0.000000e+00> : vector<8xf32>
    %49 = vector.multi_reduction <add>, %48, %cst [1] : vector<8x896xf32> to vector<8xf32>
    %50 = vector.shape_cast %49 : vector<8xf32> to vector<8x1xf32>
    %cst_15 = arith.constant dense<0.000000e+00> : vector<8x1xf32>
    %51 = tpu.matmul %0, %50, %cst_15 {dimension_numbers = #tpu.dot_dimension_numbers<[1], [0], [0], [1], [0, 0, 1, 1], [], []>, precision = #tpu.contract_precision<fp32>} : vector<8x8xf32>, vector<8x1xf32>, vector<8x1xf32> -> vector<8x1xf32>
    %cst_16 = arith.constant 6.37755089E-4 : f32
    %52 = vector.broadcast %cst_16 : f32 to vector<8x1xf32>
    %53 = arith.mulf %51, %52 : vector<8x1xf32>
    %54 = vector.broadcast %53 : vector<8x1xf32> to vector<8x896xf32>
    %55 = arith.subf %45, %54 : vector<8x896xf32>
    %56 = arith.mulf %55, %55 : vector<8x896xf32>
    %57 = vector.broadcast %46 : vector<1x896xf32> to vector<8x896xf32>
    %58 = arith.mulf %56, %57 : vector<8x896xf32>
    %cst_17 = arith.constant dense<0.000000e+00> : vector<8xf32>
    %59 = vector.multi_reduction <add>, %58, %cst_17 [1] : vector<8x896xf32> to vector<8xf32>
    %60 = vector.shape_cast %59 : vector<8xf32> to vector<8x1xf32>
    %cst_18 = arith.constant dense<0.000000e+00> : vector<8x1xf32>
    %61 = tpu.matmul %0, %60, %cst_18 {dimension_numbers = #tpu.dot_dimension_numbers<[1], [0], [0], [1], [0, 0, 1, 1], [], []>, precision = #tpu.contract_precision<fp32>} : vector<8x8xf32>, vector<8x1xf32>, vector<8x1xf32> -> vector<8x1xf32>
    %cst_19 = arith.constant 6.37755089E-4 : f32
    %62 = vector.broadcast %cst_19 : f32 to vector<8x1xf32>
    %63 = arith.mulf %61, %62 : vector<8x1xf32>
    %cst_20 = arith.constant 9.99999974E-6 : f32
    %64 = vector.broadcast %cst_20 : f32 to vector<8x1xf32>
    %65 = arith.addf %63, %64 : vector<8x1xf32>
    %66 = math.rsqrt %65 : vector<8x1xf32>
    %67 = vector.broadcast %66 : vector<8x1xf32> to vector<8x896xf32>
    %68 = arith.mulf %55, %67 : vector<8x896xf32>
    %c0_21 = arith.constant 0 : index
    %c0_22 = arith.constant 0 : index
    %69 = vector.load %arg2[%c0_21, %c0_22] : memref<8x1xf32, #tpu.memory_space<vmem>>, vector<8x1xf32>
    %70 = vector.broadcast %69 : vector<8x1xf32> to vector<8x896xf32>
    %71 = arith.mulf %68, %70 : vector<8x896xf32>
    %c0_23 = arith.constant 0 : index
    %c0_24 = arith.constant 0 : index
    %72 = vector.load %arg3[%c0_23, %c0_24] : memref<8x1xf32, #tpu.memory_space<vmem>>, vector<8x1xf32>
    %73 = vector.broadcast %72 : vector<8x1xf32> to vector<8x896xf32>
    %74 = arith.addf %71, %73 : vector<8x896xf32>
    %cst_25 = arith.constant 0.000000e+00 : f32
    %75 = vector.broadcast %cst_25 : f32 to vector<8x896xf32>
    %76 = arith.maximumf %74, %75 : vector<8x896xf32>
    %77 = vector.extract_strided_slice %76 {offsets = [0, 0], sizes = [8, 859], strides = [1, 1]} : vector<8x896xf32> to vector<8x859xf32>
    %78 = vector.extract_strided_slice %76 {offsets = [0, 1], sizes = [8, 859], strides = [1, 1]} : vector<8x896xf32> to vector<8x859xf32>
    %79 = arith.maximumf %77, %78 : vector<8x859xf32>
    %80 = vector.extract_strided_slice %76 {offsets = [0, 32], sizes = [8, 859], strides = [1, 1]} : vector<8x896xf32> to vector<8x859xf32>
    %81 = vector.extract_strided_slice %76 {offsets = [0, 33], sizes = [8, 859], strides = [1, 1]} : vector<8x896xf32> to vector<8x859xf32>
    %82 = arith.maximumf %80, %81 : vector<8x859xf32>
    %83 = arith.maximumf %79, %82 : vector<8x859xf32>
    %c0_26 = arith.constant 0 : index
    %c0_27 = arith.constant 0 : index
    %84 = vector.load %arg6[%c0_26, %c0_27] : memref<859x256xf32, #tpu.memory_space<vmem>>, vector<859x256xf32>
    %cst_28 = arith.constant dense<0.000000e+00> : vector<8x256xf32>
    %85 = tpu.matmul %83, %84, %cst_28 {dimension_numbers = #tpu.dot_dimension_numbers<[1], [0], [0], [1], [0, 0, 1, 1], [], []>} : vector<8x859xf32>, vector<859x256xf32>, vector<8x256xf32> -> vector<8x256xf32>
    %c0_29 = arith.constant 0 : index
    %c0_30 = arith.constant 0 : index
    %86 = vector.load %arg7[%c0_29, %c0_30] : memref<8x36xf32, #tpu.memory_space<vmem>>, vector<8x36xf32>
    %87 = vector.extract_strided_slice %85 {offsets = [0, 0], sizes = [2, 256], strides = [1, 1]} : vector<8x256xf32> to vector<2x256xf32>
    %88 = tpu.concatenate %87, %87, %87, %87 in 0 : vector<2x256xf32>, vector<2x256xf32>, vector<2x256xf32>, vector<2x256xf32> -> vector<8x256xf32>
    %89 = vector.extract_strided_slice %86 {offsets = [0, 0], sizes = [8, 1], strides = [1, 1]} : vector<8x36xf32> to vector<8x1xf32>
    %90 = vector.extract_strided_slice %88 {offsets = [0, 0], sizes = [8, 222], strides = [1, 1]} : vector<8x256xf32> to vector<8x222xf32>
    %91 = vector.broadcast %89 : vector<8x1xf32> to vector<8x222xf32>
    %92 = arith.mulf %91, %90 : vector<8x222xf32>
    %93 = vector.extract_strided_slice %86 {offsets = [0, 1], sizes = [8, 1], strides = [1, 1]} : vector<8x36xf32> to vector<8x1xf32>
    %94 = vector.extract_strided_slice %88 {offsets = [0, 1], sizes = [8, 222], strides = [1, 1]} : vector<8x256xf32> to vector<8x222xf32>
    %95 = vector.broadcast %93 : vector<8x1xf32> to vector<8x222xf32>
    %96 = arith.mulf %95, %94 : vector<8x222xf32>
    %97 = arith.addf %92, %96 : vector<8x222xf32>
    %98 = vector.extract_strided_slice %86 {offsets = [0, 2], sizes = [8, 1], strides = [1, 1]} : vector<8x36xf32> to vector<8x1xf32>
    %99 = vector.extract_strided_slice %88 {offsets = [0, 2], sizes = [8, 222], strides = [1, 1]} : vector<8x256xf32> to vector<8x222xf32>
    %100 = vector.broadcast %98 : vector<8x1xf32> to vector<8x222xf32>
    %101 = arith.mulf %100, %99 : vector<8x222xf32>
    %102 = arith.addf %97, %101 : vector<8x222xf32>
    %103 = vector.extract_strided_slice %86 {offsets = [0, 3], sizes = [8, 1], strides = [1, 1]} : vector<8x36xf32> to vector<8x1xf32>
    %104 = vector.extract_strided_slice %88 {offsets = [0, 16], sizes = [8, 222], strides = [1, 1]} : vector<8x256xf32> to vector<8x222xf32>
    %105 = vector.broadcast %103 : vector<8x1xf32> to vector<8x222xf32>
    %106 = arith.mulf %105, %104 : vector<8x222xf32>
    %107 = arith.addf %102, %106 : vector<8x222xf32>
    %108 = vector.extract_strided_slice %86 {offsets = [0, 4], sizes = [8, 1], strides = [1, 1]} : vector<8x36xf32> to vector<8x1xf32>
    %109 = vector.extract_strided_slice %88 {offsets = [0, 17], sizes = [8, 222], strides = [1, 1]} : vector<8x256xf32> to vector<8x222xf32>
    %110 = vector.broadcast %108 : vector<8x1xf32> to vector<8x222xf32>
    %111 = arith.mulf %110, %109 : vector<8x222xf32>
    %112 = arith.addf %107, %111 : vector<8x222xf32>
    %113 = vector.extract_strided_slice %86 {offsets = [0, 5], sizes = [8, 1], strides = [1, 1]} : vector<8x36xf32> to vector<8x1xf32>
    %114 = vector.extract_strided_slice %88 {offsets = [0, 18], sizes = [8, 222], strides = [1, 1]} : vector<8x256xf32> to vector<8x222xf32>
    %115 = vector.broadcast %113 : vector<8x1xf32> to vector<8x222xf32>
    %116 = arith.mulf %115, %114 : vector<8x222xf32>
    %117 = arith.addf %112, %116 : vector<8x222xf32>
    %118 = vector.extract_strided_slice %86 {offsets = [0, 6], sizes = [8, 1], strides = [1, 1]} : vector<8x36xf32> to vector<8x1xf32>
    %119 = vector.extract_strided_slice %88 {offsets = [0, 32], sizes = [8, 222], strides = [1, 1]} : vector<8x256xf32> to vector<8x222xf32>
    %120 = vector.broadcast %118 : vector<8x1xf32> to vector<8x222xf32>
    %121 = arith.mulf %120, %119 : vector<8x222xf32>
    %122 = arith.addf %117, %121 : vector<8x222xf32>
    %123 = vector.extract_strided_slice %86 {offsets = [0, 7], sizes = [8, 1], strides = [1, 1]} : vector<8x36xf32> to vector<8x1xf32>
    %124 = vector.extract_strided_slice %88 {offsets = [0, 33], sizes = [8, 222], strides = [1, 1]} : vector<8x256xf32> to vector<8x222xf32>
    %125 = vector.broadcast %123 : vector<8x1xf32> to vector<8x222xf32>
    %126 = arith.mulf %125, %124 : vector<8x222xf32>
    %127 = arith.addf %122, %126 : vector<8x222xf32>
    %128 = vector.extract_strided_slice %86 {offsets = [0, 8], sizes = [8, 1], strides = [1, 1]} : vector<8x36xf32> to vector<8x1xf32>
    %129 = vector.extract_strided_slice %88 {offsets = [0, 34], sizes = [8, 222], strides = [1, 1]} : vector<8x256xf32> to vector<8x222xf32>
    %130 = vector.broadcast %128 : vector<8x1xf32> to vector<8x222xf32>
    %131 = arith.mulf %130, %129 : vector<8x222xf32>
    %132 = arith.addf %127, %131 : vector<8x222xf32>
    %133 = vector.extract_strided_slice %85 {offsets = [2, 0], sizes = [2, 256], strides = [1, 1]} : vector<8x256xf32> to vector<2x256xf32>
    %134 = tpu.concatenate %133, %133, %133, %133 in 0 : vector<2x256xf32>, vector<2x256xf32>, vector<2x256xf32>, vector<2x256xf32> -> vector<8x256xf32>
    %135 = vector.extract_strided_slice %86 {offsets = [0, 9], sizes = [8, 1], strides = [1, 1]} : vector<8x36xf32> to vector<8x1xf32>
    %136 = vector.extract_strided_slice %134 {offsets = [0, 0], sizes = [8, 222], strides = [1, 1]} : vector<8x256xf32> to vector<8x222xf32>
    %137 = vector.broadcast %135 : vector<8x1xf32> to vector<8x222xf32>
    %138 = arith.mulf %137, %136 : vector<8x222xf32>
    %139 = arith.addf %132, %138 : vector<8x222xf32>
    %140 = vector.extract_strided_slice %86 {offsets = [0, 10], sizes = [8, 1], strides = [1, 1]} : vector<8x36xf32> to vector<8x1xf32>
    %141 = vector.extract_strided_slice %134 {offsets = [0, 1], sizes = [8, 222], strides = [1, 1]} : vector<8x256xf32> to vector<8x222xf32>
    %142 = vector.broadcast %140 : vector<8x1xf32> to vector<8x222xf32>
    %143 = arith.mulf %142, %141 : vector<8x222xf32>
    %144 = arith.addf %139, %143 : vector<8x222xf32>
    %145 = vector.extract_strided_slice %86 {offsets = [0, 11], sizes = [8, 1], strides = [1, 1]} : vector<8x36xf32> to vector<8x1xf32>
    %146 = vector.extract_strided_slice %134 {offsets = [0, 2], sizes = [8, 222], strides = [1, 1]} : vector<8x256xf32> to vector<8x222xf32>
    %147 = vector.broadcast %145 : vector<8x1xf32> to vector<8x222xf32>
    %148 = arith.mulf %147, %146 : vector<8x222xf32>
    %149 = arith.addf %144, %148 : vector<8x222xf32>
    %150 = vector.extract_strided_slice %86 {offsets = [0, 12], sizes = [8, 1], strides = [1, 1]} : vector<8x36xf32> to vector<8x1xf32>
    %151 = vector.extract_strided_slice %134 {offsets = [0, 16], sizes = [8, 222], strides = [1, 1]} : vector<8x256xf32> to vector<8x222xf32>
    %152 = vector.broadcast %150 : vector<8x1xf32> to vector<8x222xf32>
    %153 = arith.mulf %152, %151 : vector<8x222xf32>
    %154 = arith.addf %149, %153 : vector<8x222xf32>
    %155 = vector.extract_strided_slice %86 {offsets = [0, 13], sizes = [8, 1], strides = [1, 1]} : vector<8x36xf32> to vector<8x1xf32>
    %156 = vector.extract_strided_slice %134 {offsets = [0, 17], sizes = [8, 222], strides = [1, 1]} : vector<8x256xf32> to vector<8x222xf32>
    %157 = vector.broadcast %155 : vector<8x1xf32> to vector<8x222xf32>
    %158 = arith.mulf %157, %156 : vector<8x222xf32>
    %159 = arith.addf %154, %158 : vector<8x222xf32>
    %160 = vector.extract_strided_slice %86 {offsets = [0, 14], sizes = [8, 1], strides = [1, 1]} : vector<8x36xf32> to vector<8x1xf32>
    %161 = vector.extract_strided_slice %134 {offsets = [0, 18], sizes = [8, 222], strides = [1, 1]} : vector<8x256xf32> to vector<8x222xf32>
    %162 = vector.broadcast %160 : vector<8x1xf32> to vector<8x222xf32>
    %163 = arith.mulf %162, %161 : vector<8x222xf32>
    %164 = arith.addf %159, %163 : vector<8x222xf32>
    %165 = vector.extract_strided_slice %86 {offsets = [0, 15], sizes = [8, 1], strides = [1, 1]} : vector<8x36xf32> to vector<8x1xf32>
    %166 = vector.extract_strided_slice %134 {offsets = [0, 32], sizes = [8, 222], strides = [1, 1]} : vector<8x256xf32> to vector<8x222xf32>
    %167 = vector.broadcast %165 : vector<8x1xf32> to vector<8x222xf32>
    %168 = arith.mulf %167, %166 : vector<8x222xf32>
    %169 = arith.addf %164, %168 : vector<8x222xf32>
    %170 = vector.extract_strided_slice %86 {offsets = [0, 16], sizes = [8, 1], strides = [1, 1]} : vector<8x36xf32> to vector<8x1xf32>
    %171 = vector.extract_strided_slice %134 {offsets = [0, 33], sizes = [8, 222], strides = [1, 1]} : vector<8x256xf32> to vector<8x222xf32>
    %172 = vector.broadcast %170 : vector<8x1xf32> to vector<8x222xf32>
    %173 = arith.mulf %172, %171 : vector<8x222xf32>
    %174 = arith.addf %169, %173 : vector<8x222xf32>
    %175 = vector.extract_strided_slice %86 {offsets = [0, 17], sizes = [8, 1], strides = [1, 1]} : vector<8x36xf32> to vector<8x1xf32>
    %176 = vector.extract_strided_slice %134 {offsets = [0, 34], sizes = [8, 222], strides = [1, 1]} : vector<8x256xf32> to vector<8x222xf32>
    %177 = vector.broadcast %175 : vector<8x1xf32> to vector<8x222xf32>
    %178 = arith.mulf %177, %176 : vector<8x222xf32>
    %179 = arith.addf %174, %178 : vector<8x222xf32>
    %180 = vector.extract_strided_slice %85 {offsets = [4, 0], sizes = [2, 256], strides = [1, 1]} : vector<8x256xf32> to vector<2x256xf32>
    %181 = tpu.concatenate %180, %180, %180, %180 in 0 : vector<2x256xf32>, vector<2x256xf32>, vector<2x256xf32>, vector<2x256xf32> -> vector<8x256xf32>
    %182 = vector.extract_strided_slice %86 {offsets = [0, 18], sizes = [8, 1], strides = [1, 1]} : vector<8x36xf32> to vector<8x1xf32>
    %183 = vector.extract_strided_slice %181 {offsets = [0, 0], sizes = [8, 222], strides = [1, 1]} : vector<8x256xf32> to vector<8x222xf32>
    %184 = vector.broadcast %182 : vector<8x1xf32> to vector<8x222xf32>
    %185 = arith.mulf %184, %183 : vector<8x222xf32>
    %186 = arith.addf %179, %185 : vector<8x222xf32>
    %187 = vector.extract_strided_slice %86 {offsets = [0, 19], sizes = [8, 1], strides = [1, 1]} : vector<8x36xf32> to vector<8x1xf32>
    %188 = vector.extract_strided_slice %181 {offsets = [0, 1], sizes = [8, 222], strides = [1, 1]} : vector<8x256xf32> to vector<8x222xf32>
    %189 = vector.broadcast %187 : vector<8x1xf32> to vector<8x222xf32>
    %190 = arith.mulf %189, %188 : vector<8x222xf32>
    %191 = arith.addf %186, %190 : vector<8x222xf32>
    %192 = vector.extract_strided_slice %86 {offsets = [0, 20], sizes = [8, 1], strides = [1, 1]} : vector<8x36xf32> to vector<8x1xf32>
    %193 = vector.extract_strided_slice %181 {offsets = [0, 2], sizes = [8, 222], strides = [1, 1]} : vector<8x256xf32> to vector<8x222xf32>
    %194 = vector.broadcast %192 : vector<8x1xf32> to vector<8x222xf32>
    %195 = arith.mulf %194, %193 : vector<8x222xf32>
    %196 = arith.addf %191, %195 : vector<8x222xf32>
    %197 = vector.extract_strided_slice %86 {offsets = [0, 21], sizes = [8, 1], strides = [1, 1]} : vector<8x36xf32> to vector<8x1xf32>
    %198 = vector.extract_strided_slice %181 {offsets = [0, 16], sizes = [8, 222], strides = [1, 1]} : vector<8x256xf32> to vector<8x222xf32>
    %199 = vector.broadcast %197 : vector<8x1xf32> to vector<8x222xf32>
    %200 = arith.mulf %199, %198 : vector<8x222xf32>
    %201 = arith.addf %196, %200 : vector<8x222xf32>
    %202 = vector.extract_strided_slice %86 {offsets = [0, 22], sizes = [8, 1], strides = [1, 1]} : vector<8x36xf32> to vector<8x1xf32>
    %203 = vector.extract_strided_slice %181 {offsets = [0, 17], sizes = [8, 222], strides = [1, 1]} : vector<8x256xf32> to vector<8x222xf32>
    %204 = vector.broadcast %202 : vector<8x1xf32> to vector<8x222xf32>
    %205 = arith.mulf %204, %203 : vector<8x222xf32>
    %206 = arith.addf %201, %205 : vector<8x222xf32>
    %207 = vector.extract_strided_slice %86 {offsets = [0, 23], sizes = [8, 1], strides = [1, 1]} : vector<8x36xf32> to vector<8x1xf32>
    %208 = vector.extract_strided_slice %181 {offsets = [0, 18], sizes = [8, 222], strides = [1, 1]} : vector<8x256xf32> to vector<8x222xf32>
    %209 = vector.broadcast %207 : vector<8x1xf32> to vector<8x222xf32>
    %210 = arith.mulf %209, %208 : vector<8x222xf32>
    %211 = arith.addf %206, %210 : vector<8x222xf32>
    %212 = vector.extract_strided_slice %86 {offsets = [0, 24], sizes = [8, 1], strides = [1, 1]} : vector<8x36xf32> to vector<8x1xf32>
    %213 = vector.extract_strided_slice %181 {offsets = [0, 32], sizes = [8, 222], strides = [1, 1]} : vector<8x256xf32> to vector<8x222xf32>
    %214 = vector.broadcast %212 : vector<8x1xf32> to vector<8x222xf32>
    %215 = arith.mulf %214, %213 : vector<8x222xf32>
    %216 = arith.addf %211, %215 : vector<8x222xf32>
    %217 = vector.extract_strided_slice %86 {offsets = [0, 25], sizes = [8, 1], strides = [1, 1]} : vector<8x36xf32> to vector<8x1xf32>
    %218 = vector.extract_strided_slice %181 {offsets = [0, 33], sizes = [8, 222], strides = [1, 1]} : vector<8x256xf32> to vector<8x222xf32>
    %219 = vector.broadcast %217 : vector<8x1xf32> to vector<8x222xf32>
    %220 = arith.mulf %219, %218 : vector<8x222xf32>
    %221 = arith.addf %216, %220 : vector<8x222xf32>
    %222 = vector.extract_strided_slice %86 {offsets = [0, 26], sizes = [8, 1], strides = [1, 1]} : vector<8x36xf32> to vector<8x1xf32>
    %223 = vector.extract_strided_slice %181 {offsets = [0, 34], sizes = [8, 222], strides = [1, 1]} : vector<8x256xf32> to vector<8x222xf32>
    %224 = vector.broadcast %222 : vector<8x1xf32> to vector<8x222xf32>
    %225 = arith.mulf %224, %223 : vector<8x222xf32>
    %226 = arith.addf %221, %225 : vector<8x222xf32>
    %227 = vector.extract_strided_slice %85 {offsets = [6, 0], sizes = [2, 256], strides = [1, 1]} : vector<8x256xf32> to vector<2x256xf32>
    %228 = tpu.concatenate %227, %227, %227, %227 in 0 : vector<2x256xf32>, vector<2x256xf32>, vector<2x256xf32>, vector<2x256xf32> -> vector<8x256xf32>
    %229 = vector.extract_strided_slice %86 {offsets = [0, 27], sizes = [8, 1], strides = [1, 1]} : vector<8x36xf32> to vector<8x1xf32>
    %230 = vector.extract_strided_slice %228 {offsets = [0, 0], sizes = [8, 222], strides = [1, 1]} : vector<8x256xf32> to vector<8x222xf32>
    %231 = vector.broadcast %229 : vector<8x1xf32> to vector<8x222xf32>
    %232 = arith.mulf %231, %230 : vector<8x222xf32>
    %233 = arith.addf %226, %232 : vector<8x222xf32>
    %234 = vector.extract_strided_slice %86 {offsets = [0, 28], sizes = [8, 1], strides = [1, 1]} : vector<8x36xf32> to vector<8x1xf32>
    %235 = vector.extract_strided_slice %228 {offsets = [0, 1], sizes = [8, 222], strides = [1, 1]} : vector<8x256xf32> to vector<8x222xf32>
    %236 = vector.broadcast %234 : vector<8x1xf32> to vector<8x222xf32>
    %237 = arith.mulf %236, %235 : vector<8x222xf32>
    %238 = arith.addf %233, %237 : vector<8x222xf32>
    %239 = vector.extract_strided_slice %86 {offsets = [0, 29], sizes = [8, 1], strides = [1, 1]} : vector<8x36xf32> to vector<8x1xf32>
    %240 = vector.extract_strided_slice %228 {offsets = [0, 2], sizes = [8, 222], strides = [1, 1]} : vector<8x256xf32> to vector<8x222xf32>
    %241 = vector.broadcast %239 : vector<8x1xf32> to vector<8x222xf32>
    %242 = arith.mulf %241, %240 : vector<8x222xf32>
    %243 = arith.addf %238, %242 : vector<8x222xf32>
    %244 = vector.extract_strided_slice %86 {offsets = [0, 30], sizes = [8, 1], strides = [1, 1]} : vector<8x36xf32> to vector<8x1xf32>
    %245 = vector.extract_strided_slice %228 {offsets = [0, 16], sizes = [8, 222], strides = [1, 1]} : vector<8x256xf32> to vector<8x222xf32>
    %246 = vector.broadcast %244 : vector<8x1xf32> to vector<8x222xf32>
    %247 = arith.mulf %246, %245 : vector<8x222xf32>
    %248 = arith.addf %243, %247 : vector<8x222xf32>
    %249 = vector.extract_strided_slice %86 {offsets = [0, 31], sizes = [8, 1], strides = [1, 1]} : vector<8x36xf32> to vector<8x1xf32>
    %250 = vector.extract_strided_slice %228 {offsets = [0, 17], sizes = [8, 222], strides = [1, 1]} : vector<8x256xf32> to vector<8x222xf32>
    %251 = vector.broadcast %249 : vector<8x1xf32> to vector<8x222xf32>
    %252 = arith.mulf %251, %250 : vector<8x222xf32>
    %253 = arith.addf %248, %252 : vector<8x222xf32>
    %254 = vector.extract_strided_slice %86 {offsets = [0, 32], sizes = [8, 1], strides = [1, 1]} : vector<8x36xf32> to vector<8x1xf32>
    %255 = vector.extract_strided_slice %228 {offsets = [0, 18], sizes = [8, 222], strides = [1, 1]} : vector<8x256xf32> to vector<8x222xf32>
    %256 = vector.broadcast %254 : vector<8x1xf32> to vector<8x222xf32>
    %257 = arith.mulf %256, %255 : vector<8x222xf32>
    %258 = arith.addf %253, %257 : vector<8x222xf32>
    %259 = vector.extract_strided_slice %86 {offsets = [0, 33], sizes = [8, 1], strides = [1, 1]} : vector<8x36xf32> to vector<8x1xf32>
    %260 = vector.extract_strided_slice %228 {offsets = [0, 32], sizes = [8, 222], strides = [1, 1]} : vector<8x256xf32> to vector<8x222xf32>
    %261 = vector.broadcast %259 : vector<8x1xf32> to vector<8x222xf32>
    %262 = arith.mulf %261, %260 : vector<8x222xf32>
    %263 = arith.addf %258, %262 : vector<8x222xf32>
    %264 = vector.extract_strided_slice %86 {offsets = [0, 34], sizes = [8, 1], strides = [1, 1]} : vector<8x36xf32> to vector<8x1xf32>
    %265 = vector.extract_strided_slice %228 {offsets = [0, 33], sizes = [8, 222], strides = [1, 1]} : vector<8x256xf32> to vector<8x222xf32>
    %266 = vector.broadcast %264 : vector<8x1xf32> to vector<8x222xf32>
    %267 = arith.mulf %266, %265 : vector<8x222xf32>
    %268 = arith.addf %263, %267 : vector<8x222xf32>
    %269 = vector.extract_strided_slice %86 {offsets = [0, 35], sizes = [8, 1], strides = [1, 1]} : vector<8x36xf32> to vector<8x1xf32>
    %270 = vector.extract_strided_slice %228 {offsets = [0, 34], sizes = [8, 222], strides = [1, 1]} : vector<8x256xf32> to vector<8x222xf32>
    %271 = vector.broadcast %269 : vector<8x1xf32> to vector<8x222xf32>
    %272 = arith.mulf %271, %270 : vector<8x222xf32>
    %273 = arith.addf %268, %272 : vector<8x222xf32>
    %c0_31 = arith.constant 0 : index
    %c0_32 = arith.constant 0 : index
    %274 = vector.load %arg10[%c0_31, %c0_32] : memref<1x222xf32, #tpu.memory_space<vmem>>, vector<1x222xf32>
    %275 = vector.broadcast %274 : vector<1x222xf32> to vector<8x222xf32>
    %276 = arith.mulf %273, %275 : vector<8x222xf32>
    %cst_33 = arith.constant dense<0.000000e+00> : vector<8xf32>
    %277 = vector.multi_reduction <add>, %276, %cst_33 [1] : vector<8x222xf32> to vector<8xf32>
    %278 = vector.shape_cast %277 : vector<8xf32> to vector<8x1xf32>
    %cst_34 = arith.constant dense<0.000000e+00> : vector<8x1xf32>
    %279 = tpu.matmul %0, %278, %cst_34 {dimension_numbers = #tpu.dot_dimension_numbers<[1], [0], [0], [1], [0, 0, 1, 1], [], []>, precision = #tpu.contract_precision<fp32>} : vector<8x8xf32>, vector<8x1xf32>, vector<8x1xf32> -> vector<8x1xf32>
    %cst_35 = arith.constant 0.00255102036 : f32
    %280 = vector.broadcast %cst_35 : f32 to vector<8x1xf32>
    %281 = arith.mulf %279, %280 : vector<8x1xf32>
    %282 = vector.broadcast %281 : vector<8x1xf32> to vector<8x222xf32>
    %283 = arith.subf %273, %282 : vector<8x222xf32>
    %284 = arith.mulf %283, %283 : vector<8x222xf32>
    %285 = vector.broadcast %274 : vector<1x222xf32> to vector<8x222xf32>
    %286 = arith.mulf %284, %285 : vector<8x222xf32>
    %cst_36 = arith.constant dense<0.000000e+00> : vector<8xf32>
    %287 = vector.multi_reduction <add>, %286, %cst_36 [1] : vector<8x222xf32> to vector<8xf32>
    %288 = vector.shape_cast %287 : vector<8xf32> to vector<8x1xf32>
    %cst_37 = arith.constant dense<0.000000e+00> : vector<8x1xf32>
    %289 = tpu.matmul %0, %288, %cst_37 {dimension_numbers = #tpu.dot_dimension_numbers<[1], [0], [0], [1], [0, 0, 1, 1], [], []>, precision = #tpu.contract_precision<fp32>} : vector<8x8xf32>, vector<8x1xf32>, vector<8x1xf32> -> vector<8x1xf32>
    %cst_38 = arith.constant 0.00255102036 : f32
    %290 = vector.broadcast %cst_38 : f32 to vector<8x1xf32>
    %291 = arith.mulf %289, %290 : vector<8x1xf32>
    %cst_39 = arith.constant 9.99999974E-6 : f32
    %292 = vector.broadcast %cst_39 : f32 to vector<8x1xf32>
    %293 = arith.addf %291, %292 : vector<8x1xf32>
    %294 = math.rsqrt %293 : vector<8x1xf32>
    %295 = vector.broadcast %294 : vector<8x1xf32> to vector<8x222xf32>
    %296 = arith.mulf %283, %295 : vector<8x222xf32>
    %c0_40 = arith.constant 0 : index
    %c0_41 = arith.constant 0 : index
    %297 = vector.load %arg8[%c0_40, %c0_41] : memref<8x1xf32, #tpu.memory_space<vmem>>, vector<8x1xf32>
    %298 = vector.broadcast %297 : vector<8x1xf32> to vector<8x222xf32>
    %299 = arith.mulf %296, %298 : vector<8x222xf32>
    %c0_42 = arith.constant 0 : index
    %c0_43 = arith.constant 0 : index
    %300 = vector.load %arg9[%c0_42, %c0_43] : memref<8x1xf32, #tpu.memory_space<vmem>>, vector<8x1xf32>
    %301 = vector.broadcast %300 : vector<8x1xf32> to vector<8x222xf32>
    %302 = arith.addf %299, %301 : vector<8x222xf32>
    %cst_44 = arith.constant 0.000000e+00 : f32
    %303 = vector.broadcast %cst_44 : f32 to vector<8x222xf32>
    %304 = arith.maximumf %302, %303 : vector<8x222xf32>
    %305 = vector.extract_strided_slice %304 {offsets = [0, 0], sizes = [8, 205], strides = [1, 1]} : vector<8x222xf32> to vector<8x205xf32>
    %306 = vector.extract_strided_slice %304 {offsets = [0, 1], sizes = [8, 205], strides = [1, 1]} : vector<8x222xf32> to vector<8x205xf32>
    %307 = arith.maximumf %305, %306 : vector<8x205xf32>
    %308 = vector.extract_strided_slice %304 {offsets = [0, 16], sizes = [8, 205], strides = [1, 1]} : vector<8x222xf32> to vector<8x205xf32>
    %309 = vector.extract_strided_slice %304 {offsets = [0, 17], sizes = [8, 205], strides = [1, 1]} : vector<8x222xf32> to vector<8x205xf32>
    %310 = arith.maximumf %308, %309 : vector<8x205xf32>
    %311 = arith.maximumf %307, %310 : vector<8x205xf32>
    %cst_45 = arith.constant 0.000000e+00 : f32
    %312 = vector.broadcast %cst_45 : f32 to vector<2x31xf32>
    %313 = vector.extract_strided_slice %311 {offsets = [0, 0], sizes = [2, 205], strides = [1, 1]} : vector<8x205xf32> to vector<2x205xf32>
    %c0_46 = arith.constant 0 : index
    %c0_47 = arith.constant 0 : index
    %c0_48 = arith.constant 0 : index
    %314 = vector.load %arg11[%c0_46, %c0_47, %c0_48] : memref<4x205x31xf32, #tpu.memory_space<vmem>>, vector<1x205x31xf32>
    %315 = vector.shape_cast %314 : vector<1x205x31xf32> to vector<205x31xf32>
    %cst_49 = arith.constant dense<0.000000e+00> : vector<2x31xf32>
    %316 = tpu.matmul %313, %315, %cst_49 {dimension_numbers = #tpu.dot_dimension_numbers<[1], [0], [0], [1], [0, 0, 1, 1], [], []>} : vector<2x205xf32>, vector<205x31xf32>, vector<2x31xf32> -> vector<2x31xf32>
    %317 = arith.addf %312, %316 : vector<2x31xf32>
    %318 = vector.extract_strided_slice %311 {offsets = [2, 0], sizes = [2, 205], strides = [1, 1]} : vector<8x205xf32> to vector<2x205xf32>
    %c1_50 = arith.constant 1 : index
    %c0_51 = arith.constant 0 : index
    %c0_52 = arith.constant 0 : index
    %319 = vector.load %arg11[%c1_50, %c0_51, %c0_52] : memref<4x205x31xf32, #tpu.memory_space<vmem>>, vector<1x205x31xf32>
    %320 = vector.shape_cast %319 : vector<1x205x31xf32> to vector<205x31xf32>
    %cst_53 = arith.constant dense<0.000000e+00> : vector<2x31xf32>
    %321 = tpu.matmul %318, %320, %cst_53 {dimension_numbers = #tpu.dot_dimension_numbers<[1], [0], [0], [1], [0, 0, 1, 1], [], []>} : vector<2x205xf32>, vector<205x31xf32>, vector<2x31xf32> -> vector<2x31xf32>
    %322 = arith.addf %317, %321 : vector<2x31xf32>
    %323 = vector.extract_strided_slice %311 {offsets = [4, 0], sizes = [2, 205], strides = [1, 1]} : vector<8x205xf32> to vector<2x205xf32>
    %c2_54 = arith.constant 2 : index
    %c0_55 = arith.constant 0 : index
    %c0_56 = arith.constant 0 : index
    %324 = vector.load %arg11[%c2_54, %c0_55, %c0_56] : memref<4x205x31xf32, #tpu.memory_space<vmem>>, vector<1x205x31xf32>
    %325 = vector.shape_cast %324 : vector<1x205x31xf32> to vector<205x31xf32>
    %cst_57 = arith.constant dense<0.000000e+00> : vector<2x31xf32>
    %326 = tpu.matmul %323, %325, %cst_57 {dimension_numbers = #tpu.dot_dimension_numbers<[1], [0], [0], [1], [0, 0, 1, 1], [], []>} : vector<2x205xf32>, vector<205x31xf32>, vector<2x31xf32> -> vector<2x31xf32>
    %327 = arith.addf %322, %326 : vector<2x31xf32>
    %328 = vector.extract_strided_slice %311 {offsets = [6, 0], sizes = [2, 205], strides = [1, 1]} : vector<8x205xf32> to vector<2x205xf32>
    %c3 = arith.constant 3 : index
    %c0_58 = arith.constant 0 : index
    %c0_59 = arith.constant 0 : index
    %329 = vector.load %arg11[%c3, %c0_58, %c0_59] : memref<4x205x31xf32, #tpu.memory_space<vmem>>, vector<1x205x31xf32>
    %330 = vector.shape_cast %329 : vector<1x205x31xf32> to vector<205x31xf32>
    %cst_60 = arith.constant dense<0.000000e+00> : vector<2x31xf32>
    %331 = tpu.matmul %328, %330, %cst_60 {dimension_numbers = #tpu.dot_dimension_numbers<[1], [0], [0], [1], [0, 0, 1, 1], [], []>} : vector<2x205xf32>, vector<205x31xf32>, vector<2x31xf32> -> vector<2x31xf32>
    %332 = arith.addf %327, %331 : vector<2x31xf32>
    %c0_61 = arith.constant 0 : index
    %c0_62 = arith.constant 0 : index
    %333 = vector.load %arg12[%c0_61, %c0_62] : memref<1x31xf32, #tpu.memory_space<vmem>>, vector<1x31xf32>
    %334 = vector.broadcast %333 : vector<1x31xf32> to vector<2x31xf32>
    %335 = arith.addf %332, %334 : vector<2x31xf32>
    %c0_63 = arith.constant 0 : index
    %c0_64 = arith.constant 0 : index
    %336 = vector.load %arg13[%c0_63, %c0_64] : memref<2x31xf32, #tpu.memory_space<vmem>>, vector<2x31xf32>
    tpu.vector_store %arg13[%c0_63, %c0_64], %335 {strides = array<i32>} : memref<2x31xf32, #tpu.memory_space<vmem>>, vector<2x31xf32>,
    return
  }
}

</mosaic_0001>

<bundles_post_ra>
// kernel: tile.9
= control target key start
LH: loop header
LB: loop body
LE: loop exit
PB: predicated region body
PF: predicated region fallthrough
CT: control target
= control target key end

     0   :  { %s520_s0 = inlined_call_operand.vmem [shape: f32[4,2,1024], index: 0, kind: input, shape index: {}]   ;;  %s521_s1 = inlined_call_operand.vmem [shape: f32[8,1024], index: 1, kind: output, shape index: {}]  }
   0x1   :  { %v256_v0 = vld [vmem:[%s520_s0 + $0x3e] sm:$0x3]  ;;  %v257_v1 = vld [vmem:[%s520_s0 + $0x3c] sm:$0x3]  ;;  %v258_v2 = vld [vmem:[%s520_s0 + $0x3a] sm:$0x3] }
   0x2   :  { %7 = vst [vmem:[#allocation0 + $0x48] sm:$0x3] %v256_v0  ;;  %v259_v3 = vld [vmem:[%s520_s0 + $0x38] sm:$0x3]  ;;  %v260_v4 = vld [vmem:[%s520_s0 + $0x36] sm:$0x3] }
   0x3   :  { %11 = vst [vmem:[#allocation0 + $0xf8] sm:$0x3] %v257_v1  ;;  %v261_v5 = vld [vmem:[%s520_s0 + $0x34] sm:$0x3]  ;;  %v262_v6 = vld [vmem:[%s520_s0 + $0x32] sm:$0x3] }
   0x4   :  { %15 = vst [vmem:[#allocation0 + $0x20] sm:$0x3] %v258_v2  ;;  %v263_v7 = vld [vmem:[%s520_s0 + $0x30] sm:$0x3]  ;;  %v264_v8 = vld [vmem:[%s520_s0 + $0x2e] sm:$0x3] }
   0x5   :  { %19 = vst [vmem:[#allocation0 + $0xe0] sm:$0x3] %v259_v3  ;;  %v265_v9 = vld [vmem:[%s520_s0 + $0x2c] sm:$0x3]  ;;  %v266_v10 = vld [vmem:[%s520_s0 + $0x2a] sm:$0x3] }
   0x6   :  { %23 = vst [vmem:[#allocation0 + $0xa8] sm:$0x3] %v260_v4  ;;  %v267_v11 = vld [vmem:[%s520_s0 + $0x28] sm:$0x3]  ;;  %v268_v12 = vld [vmem:[%s520_s0 + $0x26] sm:$0x3] }
   0x7   :  { %27 = vst [vmem:[#allocation0 + $0x90] sm:$0x3] %v261_v5  ;;  %v269_v13 = vld [vmem:[%s520_s0 + $0x24] sm:$0x3]  ;;  %v270_v14 = vld [vmem:[%s520_s0 + $0x22] sm:$0x3] }
   0x8   :  { %31 = vst [vmem:[#allocation0 + $0xc8] sm:$0x3] %v262_v6  ;;  %v271_v15 = vld [vmem:[%s520_s0 + $0x20] sm:$0x3]  ;;  %v272_v16 = vld [vmem:[%s520_s0 + $0x1e] sm:$0x3] }
   0x9   :  { %35 = vst [vmem:[#allocation0 + $0xb0] sm:$0x3] %v263_v7  ;;  %v273_v17 = vld [vmem:[%s520_s0 + $0x1c] sm:$0x3]  ;;  %v274_v18 = vld [vmem:[%s520_s0 + $0x1a] sm:$0x3] }
   0xa   :  { %39 = vst [vmem:[#allocation0 + $0x78] sm:$0x3] %v264_v8  ;;  %v275_v19 = vld [vmem:[%s520_s0 + $0x18] sm:$0x3]  ;;  %v276_v20 = vld [vmem:[%s520_s0 + $0x16] sm:$0x3] }
   0xb   :  { %43 = vst [vmem:[#allocation0 + $0x70] sm:$0x3] %v265_v9  ;;  %v277_v21 = vld [vmem:[%s520_s0 + $0x14] sm:$0x3]  ;;  %v278_v22 = vld [vmem:[%s520_s0 + $0x12] sm:$0x3] }
   0xc   :  { %47 = vst [vmem:[#allocation0 + $0x10] sm:$0x3] %v266_v10  ;;  %v279_v23 = vld [vmem:[%s520_s0 + $0x10] sm:$0x3]  ;;  %v280_v24 = vld [vmem:[%s520_s0 + $0xe] sm:$0x3] }
   0xd   :  { %51 = vst [vmem:[#allocation0 + $0x40] sm:$0x3] %v267_v11  ;;  %v281_v25 = vld [vmem:[%s520_s0 + $0xc] sm:$0x3]  ;;  %v282_v26 = vld [vmem:[%s520_s0 + $0xa] sm:$0x3] }
   0xe   :  { %55 = vst [vmem:[#allocation0 + $0x98] sm:$0x3] %v268_v12  ;;  %v283_v27 = vld [vmem:[%s520_s0 + $0x8] sm:$0x3]  ;;  %v284_v28 = vld [vmem:[%s520_s0 + $0x6] sm:$0x3] }
   0xf   :  { %59 = vst [vmem:[#allocation0 + $0x8] sm:$0x3] %v269_v13  ;;  %v285_v29 = vld [vmem:[%s520_s0 + $0x4] sm:$0x3]  ;;  %v286_v30 = vld [vmem:[%s520_s0 + $0x2] sm:$0x3] }
  0x10   :  { %63 = vst [vmem:[#allocation0 + $0xf0] sm:$0x3] %v270_v14  ;;  %v128_v31 = vld [vmem:[%s520_s0] sm:$0x3]  ;;  %v225_v56 = vld [vmem:[#allocation0 + $0xb0] sm:$0x3]  }
  0x11   :  { %67 = vst [vmem:[#allocation0 + $0x80] sm:$0x3] %v271_v15  ;;  %v221_v55 = vld [vmem:[#allocation0 + $0x78] sm:$0x3]   ;;  %v229_v57 = vld [vmem:[#allocation0 + $0xc8] sm:$0x3]  }
  0x12   :  { %71 = vst [vmem:[#allocation0 + $0xc0] sm:$0x3] %v272_v16  ;;  %v217_v54 = vld [vmem:[#allocation0 + $0x70] sm:$0x3]   ;;  %v237_v59 = vld [vmem:[#allocation0 + $0xa8] sm:$0x3]  }
  0x13   :  { %75 = vst [vmem:[#allocation0 + $0xa0] sm:$0x3] %v273_v17  ;;  %v213_v53 = vld [vmem:[#allocation0 + $0x10] sm:$0x3]   ;;  %v241_v60 = vld [vmem:[#allocation0 + $0xe0] sm:$0x3]  }
  0x14   :  { %79 = vst [vmem:[#allocation0 + $0xb8] sm:$0x3] %v274_v18  ;;  %v209_v52 = vld [vmem:[#allocation0 + $0x40] sm:$0x3]   ;;  %v233_v58 = vld [vmem:[#allocation0 + $0x90] sm:$0x3]  }
  0x15   :  { %83 = vst [vmem:[#allocation0 + $0x30] sm:$0x3] %v275_v19  ;;  %v205_v51 = vld [vmem:[#allocation0 + $0x98] sm:$0x3]   ;;  %v245_v61 = vld [vmem:[#allocation0 + $0x20] sm:$0x3]  }
  0x16   :  { %87 = vst [vmem:[#allocation0 + $0x18] sm:$0x3] %v276_v20  ;;  %v201_v50 = vld [vmem:[#allocation0 + $0x8] sm:$0x3]   ;;  %v249_v62 = vld [vmem:[#allocation0 + $0xf8] sm:$0x3]  }
  0x17   :  { %91 = vst [vmem:[#allocation0 + $0x68] sm:$0x3] %v277_v21  ;;  %v197_v49 = vld [vmem:[#allocation0 + $0xf0] sm:$0x3]   ;;  %v253_v63 = vld [vmem:[#allocation0 + $0x48] sm:$0x3]  }
  0x18   :  { %95 = vst [vmem:[#allocation0 + $0x88] sm:$0x3] %v278_v22  ;;  %v193_v48 = vld [vmem:[#allocation0 + $0x80] sm:$0x3]  }
  0x19   :  { %99 = vst [vmem:[#allocation0 + $0x38] sm:$0x3] %v279_v23  ;;  %v189_v47 = vld [vmem:[#allocation0 + $0xc0] sm:$0x3]  }
  0x1a   :  { %103 = vst [vmem:[#allocation0 + $0x50] sm:$0x3] %v280_v24  ;;  %v185_v46 = vld [vmem:[#allocation0 + $0xa0] sm:$0x3]  }
  0x1b   :  { %107 = vst [vmem:[#allocation0 + $0x28] sm:$0x3] %v281_v25  ;;  %v181_v45 = vld [vmem:[#allocation0 + $0xb8] sm:$0x3]  }
  0x1c   :  { %111 = vst [vmem:[#allocation0 + $0xe8] sm:$0x3] %v282_v26  ;;  %v177_v44 = vld [vmem:[#allocation0 + $0x30] sm:$0x3]  }
  0x1d   :  { %115 = vst [vmem:[#allocation0 + $0xd0] sm:$0x3] %v283_v27  ;;  %v173_v43 = vld [vmem:[#allocation0 + $0x18] sm:$0x3]  }
  0x1e   :  { %119 = vst [vmem:[#allocation0 + $0x58] sm:$0x3] %v284_v28  ;;  %v169_v42 = vld [vmem:[#allocation0 + $0x68] sm:$0x3]  }
  0x1f   :  { %123 = vst [vmem:[#allocation0] sm:$0x3] %v285_v29  ;;  %v165_v41 = vld [vmem:[#allocation0 + $0x88] sm:$0x3]  }
  0x20   :  { %127 = vst [vmem:[#allocation0 + $0xd8] sm:$0x3] %v286_v30  ;;  %v161_v39 = vld [vmem:[#allocation0 + $0x38] sm:$0x3]  }
  0x21   :  { %129 = vst [vmem:[#allocation0 + $0x60] sm:$0x3] %v128_v31  ;;  %v157_v32 = vld [vmem:[#allocation0 + $0x50] sm:$0x3]  }
  0x22   :  { %v153_v33 = vld [vmem:[#allocation0 + $0x28] sm:$0x3]   ;;  %293 = vst [vmem:[%s521_s1 + $0x38] sm:$0x3] %v157_v32  }
  0x23   :  { %v149_v34 = vld [vmem:[#allocation0 + $0xe8] sm:$0x3]   ;;  %292 = vst [vmem:[%s521_s1 + $0x30] sm:$0x3] %v153_v33  }
  0x24   :  { %v145_v35 = vld [vmem:[#allocation0 + $0xd0] sm:$0x3]   ;;  %291 = vst [vmem:[%s521_s1 + $0x28] sm:$0x3] %v149_v34  }
  0x25   :  { %v141_v36 = vld [vmem:[#allocation0 + $0x58] sm:$0x3]   ;;  %290 = vst [vmem:[%s521_s1 + $0x20] sm:$0x3] %v145_v35  }
  0x26   :  { %v137_v37 = vld [vmem:[#allocation0] sm:$0x3]   ;;  %289 = vst [vmem:[%s521_s1 + $0x18] sm:$0x3] %v141_v36  }
  0x27   :  { %v133_v38 = vld [vmem:[#allocation0 + $0xd8] sm:$0x3]   ;;  %288 = vst [vmem:[%s521_s1 + $0x10] sm:$0x3] %v137_v37  }
  0x28   :  { %v130_v40 = vld [vmem:[#allocation0 + $0x60] sm:$0x3]   ;;  %287 = vst [vmem:[%s521_s1 + $0x8] sm:$0x3] %v133_v38  }
  0x29   :  { %131 = vst [vmem:[%s521_s1] sm:$0x3] %v130_v40  }
  0x2a   :  { %294 = vst [vmem:[%s521_s1 + $0x2] sm:$0x3] %v161_v39  }
  0x2b   :  { %295 = vst [vmem:[%s521_s1 + $0xa] sm:$0x3] %v165_v41  }
  0x2c   :  { %296 = vst [vmem:[%s521_s1 + $0x12] sm:$0x3] %v169_v42  }
  0x2d   :  { %297 = vst [vmem:[%s521_s1 + $0x1a] sm:$0x3] %v173_v43  }
  0x2e   :  { %298 = vst [vmem:[%s521_s1 + $0x22] sm:$0x3] %v177_v44  }
  0x2f   :  { %299 = vst [vmem:[%s521_s1 + $0x2a] sm:$0x3] %v181_v45  }
  0x30   :  { %300 = vst [vmem:[%s521_s1 + $0x32] sm:$0x3] %v185_v46  }
  0x31   :  { %301 = vst [vmem:[%s521_s1 + $0x3a] sm:$0x3] %v189_v47  }
  0x32   :  { %302 = vst [vmem:[%s521_s1 + $0x4] sm:$0x3] %v193_v48  }
  0x33   :  { %303 = vst [vmem:[%s521_s1 + $0xc] sm:$0x3] %v197_v49  }
  0x34   :  { %304 = vst [vmem:[%s521_s1 + $0x14] sm:$0x3] %v201_v50  }
  0x35   :  { %305 = vst [vmem:[%s521_s1 + $0x1c] sm:$0x3] %v205_v51  }
  0x36   :  { %306 = vst [vmem:[%s521_s1 + $0x24] sm:$0x3] %v209_v52  }
  0x37   :  { %307 = vst [vmem:[%s521_s1 + $0x2c] sm:$0x3] %v213_v53  }
  0x38   :  { %308 = vst [vmem:[%s521_s1 + $0x34] sm:$0x3] %v217_v54  }
  0x39   :  { %309 = vst [vmem:[%s521_s1 + $0x3c] sm:$0x3] %v221_v55  }
  0x3a   :  { %310 = vst [vmem:[%s521_s1 + $0x6] sm:$0x3] %v225_v56  }
  0x3b   :  { %311 = vst [vmem:[%s521_s1 + $0xe] sm:$0x3] %v229_v57  }
  0x3c   :  { %312 = vst [vmem:[%s521_s1 + $0x16] sm:$0x3] %v233_v58  }
  0x3d   :  { %313 = vst [vmem:[%s521_s1 + $0x1e] sm:$0x3] %v237_v59  }
  0x3e   :  { %314 = vst [vmem:[%s521_s1 + $0x26] sm:$0x3] %v241_v60  }
  0x3f   :  { %315 = vst [vmem:[%s521_s1 + $0x2e] sm:$0x3] %v245_v61  }
  0x40   :  { %316 = vst [vmem:[%s521_s1 + $0x36] sm:$0x3] %v249_v62  }
  0x41   :  { %317 = vst [vmem:[%s521_s1 + $0x3e] sm:$0x3] %v253_v63  }

// kernel: cnnnet_forward.1
= control target key start
LH: loop header
LB: loop body
LE: loop exit
PB: predicated region body
PF: predicated region fallthrough
CT: control target
= control target key end

     0   :  { %v3117_v1 = vmov 1   ;;  %v3118_v2 = vmov 3   ;;  %s5489_s0 = inlined_call_operand.vmem [shape: f32[8,1024], index: 0, kind: input, shape index: {}]   ;;  %s5490_s1 = inlined_call_operand.vmem [shape: f32[8,9], index: 1, kind: input, shape index: {}]   ;;  %s5491_s2 = inlined_call_operand.vmem [shape: f32[8,1], index: 2, kind: input, shape index: {}]   ;;  %s5492_s3 = inlined_call_operand.vmem [shape: f32[8,1], index: 3, kind: input, shape index: {}]   ;;  %s5493_s4 = inlined_call_operand.vmem [shape: f32[1,896], index: 4, kind: input, shape index: {}]   ;;  %s5494_s5 = inlined_call_operand.vmem [shape: f32[8,8], index: 5, kind: input, shape index: {}]   ;;  %s5495_s6 = inlined_call_operand.vmem [shape: f32[859,256], index: 6, kind: input, shape index: {}]   ;;  %s5496_s7 = inlined_call_operand.vmem [shape: f32[8,36], index: 7, kind: input, shape index: {}]   ;;  %s5497_s8 = inlined_call_operand.vmem [shape: f32[8,1], index: 8, kind: input, shape index: {}]   ;;  %s5498_s9 = inlined_call_operand.vmem [shape: f32[8,1], index: 9, kind: input, shape index: {}]   ;;  %s5499_s10 = inlined_call_operand.vmem [shape: f32[1,222], index: 10, kind: input, shape index: {}]   ;;  %s5500_s11 = inlined_call_operand.vmem [shape: f32[4,205,31], index: 11, kind: input, shape index: {}]   ;;  %s5501_s12 = inlined_call_operand.vmem [shape: f32[1,31], index: 12, kind: input, shape index: {}]   ;;  %s5502_s13 = inlined_call_operand.hbm [shape: f32[2,31], index: 13, kind: output, shape index: {}]  }
   0x1   :  { %v46_v0 = vld [vmem:[%s5490_s1] sm:$0xff]  ;;  %3008 = vset.pattern.permute.xlu0 %v3117_v1  ;;  %3009 = vset.pattern.permute.xlu1 %v3118_v2 }
   0x2   :  { %75 = vperm.xlu0 %3008, %v46_v0   ;;  %191 = vperm.xlu1 %3009, %v46_v0  }
   0x3   :  { %18 = vsyncpa [#allocation3], 0  ;;  %v3119_v3 = vmov 5   ;;  %v5503_v4 = vmov 0   ;;  %v3121_v5 = vmov 4   ;;  %v3122_v6 = vmov 6  }
   0x4   :  { %3011 = vset.pattern.permute.xlu2 %v3119_v3  ;;  %v3123_v7 = vmov 2   ;;  %v3124_v8 = vmov 7   ;;  %v5505_v9 = vmov 8   ;;  %v3249_v10 = vld [vmem:[%s5489_s0 + $0x8] sm:$0xff]  ;;  %v3254_v11 = vld [vmem:[%s5489_s0] sm:$0xff]  ;;  %s3126_s30 = smov 127  }
   0x5   :  { %307 = vperm.xlu2 %3011, %v46_v0   ;;  %v3267_v15 = vld [vmem:[%s5489_s0 + $0x18] sm:$0xff]  ;;  %v3272_v16 = vld [vmem:[%s5489_s0 + $0x10] sm:$0xff]  ;;  %s3127_s18 = smov 126   ;;  %v3300_v26 = vld [vmem:[%s5489_s0 + $0x20] sm:$0xff]  ;;  %s3128_s21 = smov 96   ;;  %vm110_vm0 = vcmask 1039360  }
   0x6   :  { %v3312_v29 = vld [vmem:[%s5489_s0 + $0x28] sm:$0xff]  ;;  %s3129_s24 = smov 95   ;;  %v3337_v37 = vld [vmem:[%s5489_s0 + $0x30] sm:$0xff]  ;;  %s3130_s1 = smov 94   ;;  %v3373_v49 = vld [vmem:[%s5489_s0 + $0x38] sm:$0xff]  ;;  %vm168_vm1 = vcmask 1031168  }
   0x7   :  { %s3131_s0 = smov 64   ;;  %s3132_s29 = smov 63   ;;  %vm226_vm2 = vcmask 785408   ;;  %vm284_vm3 = vcmask 777216   ;;  %vm342_vm4 = vcmask 769024   ;;  %vm400_vm5 = vcmask 523264  }
   0x8   :  { %s3133_s14 = smov 62   ;;  %vm458_vm6 = vcmask 515072   ;;  %vm516_vm7 = vcmask 506880   ;;  %vm569_vm8 = vcmask 64512   ;;  %vm1259_vm12 = vcmask 1042432   ;;  %s3162_s22 = smov 112  }
   0x9   :  { %vm1255_vm13 = vcmask 744448   ;;  %vm1561_vm14 = vcmask 1041408   ;;  %vm1564_vm15 = vcmask 1043456   ;;  %s3163_s23 = smov 110   ;;  %s3164_s19 = smov [#allocation2]  }
   0xa   :  { %3015 = vset.pattern.permute.xlu0 %v5503_v4  ;;  %3010 = vset.pattern.permute.xlu1 %v3121_v5 }
   0xb   :  { %56 = vperm.xlu0 %3015, %v46_v0   ;;  %249 = vperm.xlu1 %3010, %v46_v0  }
   0xd   :  { %3012 = vset.pattern.permute.xlu2 %v3122_v6 }
   0xe   :  { %365 = vperm.xlu2 %3012, %v46_v0  }
  0x13   :  { %3016 = vset.pattern.permute.xlu0 %v3123_v7  ;;  %3013 = vset.pattern.permute.xlu1 %v3124_v8 }
  0x14   :  { %133 = vperm.xlu0 %3016, %v46_v0   ;;  %423 = vperm.xlu1 %3013, %v46_v0  }
  0x16   :  { %3014 = vset.pattern.permute.xlu2 %v5505_v9 }
  0x17   :  { %481 = vperm.xlu2 %3014, %v46_v0  }
  0x1c   :  { %3017 = vset.pattern.permute.xlu1 %v5503_v4 }
  0x1f   :  { %3048 = vset.pattern.permute.xlu2 %v3117_v1 }
  0x5f   :  { %v3357_v44 = vpop.permute.xlu2 %307 }
  0x60   :  { %v312_v45 = vmul.f32 %v3357_v44, %v3272_v16  ;;  %v311_v46 = vmul.f32 %v3357_v44, %v3249_v10  ;;  %v310_v47 = vmul.f32 %v3357_v44, %v3254_v11  ;;  %v313_v55 = vmul.f32 %v3357_v44, %v3267_v15 }
  0x61   :  { %v314_v61 = vmul.f32 %v3357_v44, %v3300_v26 }
  0x68   :  { %v3368_v48 = vpop.permute.xlu2 %365 }
  0x69   :  { %v368_v53 = vmul.f32 %v3368_v48, %v3254_v11  ;;  %v370_v57 = vmul.f32 %v3368_v48, %v3272_v16  ;;  %v369_v58 = vmul.f32 %v3368_v48, %v3249_v10 }
  0x71   :  { %v3386_v54 = vpop.permute.xlu2 %481 }
  0x74   :  { %v3256_v12 = vpop.permute.xlu0 %75  ;;  %v3293_v24 = vpop.permute.xlu1 %191 }
  0x75   :  { %v79_v13 = vmul.f32 %v3256_v12, %v3249_v10  ;;  %v78_v14 = vmul.f32 %v3256_v12, %v3254_v11  ;;  %v81_v18 = vmul.f32 %v3256_v12, %v3267_v15  ;;  %v80_v19 = vmul.f32 %v3256_v12, %v3272_v16 }
  0x76   :  { %v194_v25 = vmul.f32 %v3293_v24, %v3254_v11  ;;  %v82_v28 = vmul.f32 %v3256_v12, %v3300_v26  ;;  %v196_v30 = vmul.f32 %v3293_v24, %v3272_v16  ;;  %v195_v31 = vmul.f32 %v3293_v24, %v3249_v10 }
  0x77   :  { %96 = vrot.lane.b32.xlu2 %v79_v13, %s3126_s30  ;;  %94 = vrot.lane.b32.xlu1 %v78_v14, %s3126_s30  ;;  %v83_v32 = vmul.f32 %v3256_v12, %v3312_v29  ;;  %v197_v35 = vmul.f32 %v3293_v24, %v3267_v15  ;;  %v84_v40 = vmul.f32 %v3256_v12, %v3337_v37 }
  0x78   :  { %v198_v42 = vmul.f32 %v3293_v24, %v3300_v26  ;;  %v199_v50 = vmul.f32 %v3293_v24, %v3312_v29  ;;  %v85_v52 = vmul.f32 %v3256_v12, %v3373_v49  ;;  %v200_v63 = vmul.f32 %v3293_v24, %v3337_v37 }
  0x79   :  { %v371_v13 = vmul.f32 %v3368_v48, %v3267_v15 }
  0x7d   :  { %v3274_v17 = vpop.permute.xlu0 %56  ;;  %v3323_v33 = vpop.permute.xlu1 %249 }
  0x7e   :  { %v252_v34 = vmul.f32 %v3323_v33, %v3254_v11  ;;  %v254_v38 = vmul.f32 %v3323_v33, %v3272_v16  ;;  %v253_v39 = vmul.f32 %v3323_v33, %v3249_v10  ;;  %v255_v41 = vmul.f32 %v3323_v33, %v3267_v15 }
  0x7f   :  { %100 = vrot.lane.b32.xlu2 %v81_v18, %s3126_s30  ;;  %98 = vrot.lane.b32.xlu1 %v80_v19, %s3126_s30  ;;  %v256_v56 = vmul.f32 %v3323_v33, %v3300_v26  ;;  %v257_v62 = vmul.f32 %v3323_v33, %v3312_v29  ;;  %v258_v18 = vmul.f32 %v3323_v33, %v3337_v37 }
  0x80   :  { %v201_v19 = vmul.f32 %v3293_v24, %v3373_v49  ;;  %v315_v24 = vmul.f32 %v3357_v44, %v3312_v29  ;;  %v61_v4 = vmul.f32 %v3272_v16, %v3274_v17 }
  0x86   :  { %v3282_v20 = vpop.permute.xlu0 %133  ;;  %v3415_v0 = vpop.permute.xlu1 %423 }
  0x87   :  { %v138_v21 = vmul.f32 %v3282_v20, %v3272_v16  ;;  %v137_v22 = vmul.f32 %v3282_v20, %v3249_v10  ;;  %v136_v23 = vmul.f32 %v3282_v20, %v3254_v11  ;;  %v139_v27 = vmul.f32 %v3282_v20, %v3267_v15 }
  0x88   :  { %v140_v36 = vmul.f32 %v3282_v20, %v3300_v26  ;;  %v141_v43 = vmul.f32 %v3282_v20, %v3312_v29  ;;  %v142_v51 = vmul.f32 %v3282_v20, %v3337_v37  ;;  %v143_v59 = vmul.f32 %v3282_v20, %v3373_v49 }
  0x89   :  { %156 = vrot.lane.b32.xlu2 %v138_v21, %s3127_s18  ;;  %154 = vrot.lane.b32.xlu1 %v137_v22, %s3127_s18  ;;  %v427_v7 = vmul.f32 %v3415_v0, %v3249_v10  ;;  %v426_v12 = vmul.f32 %v3415_v0, %v3254_v11  ;;  %v428_v20 = vmul.f32 %v3415_v0, %v3272_v16 }
  0x8a   :  { %152 = vrot.lane.b32.xlu0 %v136_v23, %s3127_s18  ;;  %v429_v23 = vmul.f32 %v3415_v0, %v3267_v15 }
  0x91   :  { %210 = vrot.lane.b32.xlu2 %v194_v25, %s3128_s21  ;;  %158 = vrot.lane.b32.xlu1 %v139_v27, %s3127_s18  ;;  %v372_v25 = vmul.f32 %v3368_v48, %v3300_v26 }
  0x92   :  { %102 = vrot.lane.b32.xlu0 %v82_v28, %s3126_s30 }
  0x99   :  { %104 = vrot.lane.b32.xlu2 %v83_v32, %s3126_s30  ;;  %214 = vrot.lane.b32.xlu1 %v196_v30, %s3128_s21  ;;  %v486_v30 = vmul.f32 %v3386_v54, %v3272_v16  ;;  %v484_v32 = vmul.f32 %v3386_v54, %v3254_v11 }
  0x9a   :  { %212 = vrot.lane.b32.xlu0 %v195_v31, %s3128_s21  ;;  %v485_v31 = vmul.f32 %v3386_v54, %v3249_v10 }
  0xa1   :  { %268 = vrot.lane.b32.xlu2 %v252_v34, %s3129_s24  ;;  %216 = vrot.lane.b32.xlu1 %v197_v35, %s3128_s21 }
  0xa2   :  { %160 = vrot.lane.b32.xlu0 %v140_v36, %s3127_s18 }
  0xa9   :  { %106 = vrot.lane.b32.xlu2 %v84_v40, %s3126_s30  ;;  %272 = vrot.lane.b32.xlu1 %v254_v38, %s3129_s24  ;;  %v373_v38 = vmul.f32 %v3368_v48, %v3312_v29  ;;  %v259_v40 = vmul.f32 %v3323_v33, %v3373_v49  ;;  %v430_v33 = vmul.f32 %v3415_v0, %v3300_v26 }
  0xaa   :  { %270 = vrot.lane.b32.xlu0 %v253_v39, %s3129_s24  ;;  %v316_v39 = vmul.f32 %v3357_v44, %v3337_v37 }
  0xb1   :  { %274 = vrot.lane.b32.xlu2 %v255_v41, %s3129_s24  ;;  %218 = vrot.lane.b32.xlu1 %v198_v42, %s3128_s21 }
  0xb2   :  { %162 = vrot.lane.b32.xlu0 %v141_v43, %s3127_s18 }
  0xb9   :  { %330 = vrot.lane.b32.xlu2 %v312_v45, %s3130_s1  ;;  %328 = vrot.lane.b32.xlu1 %v311_v46, %s3130_s1  ;;  %v317_v45 = vmul.f32 %v3357_v44, %v3373_v49  ;;  %v487_v46 = vmul.f32 %v3386_v54, %v3267_v15  ;;  %v488_v44 = vmul.f32 %v3386_v54, %v3300_v26 }
  0xba   :  { %326 = vrot.lane.b32.xlu0 %v310_v47, %s3130_s1 }
  0xc1   :  { %220 = vrot.lane.b32.xlu2 %v199_v50, %s3128_s21  ;;  %164 = vrot.lane.b32.xlu1 %v142_v51, %s3127_s18 }
  0xc2   :  { %108 = vrot.lane.b32.xlu0 %v85_v52, %s3126_s30  ;;  %v431_v52 = vmul.f32 %v3415_v0, %v3312_v29 }
  0xc9   :  { %384 = vrot.lane.b32.xlu2 %v368_v53, %s3131_s0  ;;  %332 = vrot.lane.b32.xlu1 %v313_v55, %s3130_s1  ;;  %v374_v53 = vmul.f32 %v3368_v48, %v3337_v37 }
  0xca   :  { %276 = vrot.lane.b32.xlu0 %v256_v56, %s3129_s24 }
  0xd1   :  { %v3401_v60 = vpop.permute.xlu2 %96  ;;  %166 = vrot.lane.b32.xlu2 %v143_v59, %s3127_s18  ;;  %388 = vrot.lane.b32.xlu1 %v370_v57, %s3131_s0  ;;  %v432_v59 = vmul.f32 %v3415_v0, %v3337_v37 }
  0xd2   :  { %386 = vrot.lane.b32.xlu0 %v369_v58, %s3131_s0  ;;  %v489_v58 = vmul.f32 %v3386_v54, %v3312_v29 }
  0xd9   :  { %334 = vrot.lane.b32.xlu2 %v314_v61, %s3130_s1  ;;  %278 = vrot.lane.b32.xlu1 %v257_v62, %s3129_s24  ;;  %v3417_v1 = vpop.permute.xlu2 %100  ;;  %v375_v61 = vmul.f32 %v3368_v48, %v3373_v49  ;;  %v433_v48 = vmul.f32 %v3415_v0, %v3373_v49  ;;  %v59_v0 = vmul.f32 %v3254_v11, %v3274_v17 }
  0xda   :  { %222 = vrot.lane.b32.xlu0 %v200_v63, %s3128_s21 }
  0xe1   :  { %444 = vrot.lane.b32.xlu2 %v427_v7, %s3132_s29  ;;  %442 = vrot.lane.b32.xlu1 %v426_v12, %s3132_s29  ;;  %v491_v12 = vmul.f32 %v3386_v54, %v3373_v49 }
  0xe2   :  { %390 = vrot.lane.b32.xlu0 %v371_v13, %s3131_s0  ;;  %v490_v13 = vmul.f32 %v3386_v54, %v3337_v37 }
  0xe3   :  { %v3428_v14 = vpop.permute.xlu2 %156 }
  0xe9   :  { %v3436_v21 = vpop.permute.xlu1 %94  ;;  %280 = vrot.lane.b32.xlu2 %v258_v18, %s3129_s24  ;;  %224 = vrot.lane.b32.xlu1 %v201_v19, %s3128_s21 }
  0xea   :  { %446 = vrot.lane.b32.xlu0 %v428_v20, %s3132_s29  ;;  %v111_v49 = vsel %vm110_vm0, %v3436_v21, %v3401_v60 }
  0xeb   :  { %v3441_v22 = vpop.permute.xlu2 %210 }
  0xf1   :  { %448 = vrot.lane.b32.xlu2 %v429_v23, %s3132_s29  ;;  %392 = vrot.lane.b32.xlu1 %v372_v25, %s3131_s0  ;;  %v3452_v27 = vpop.permute.xlu1 %98 }
  0xf2   :  { %336 = vrot.lane.b32.xlu0 %v315_v24, %s3130_s1 }
  0xf3   :  { %v3454_v28 = vpop.permute.xlu2 %104 }
  0xf9   :  { %504 = vrot.lane.b32.xlu2 %v486_v30, %s3133_s14  ;;  %502 = vrot.lane.b32.xlu1 %v485_v31, %s3133_s14 }
  0xfa   :  { %500 = vrot.lane.b32.xlu0 %v484_v32, %s3133_s14 }
  0xfb   :  { %v3465_v34 = vpop.permute.xlu2 %268  ;;  %v3467_v35 = vpop.permute.xlu1 %154 }
  0xfc   :  { %v153_v36 = vpop.permute.xlu0 %152 }
  0xfd   :  { %v169_v31 = vsel %vm168_vm1, %v153_v36, %v3467_v35 }
 0x101   :  { %394 = vrot.lane.b32.xlu2 %v373_v38, %s3131_s0  ;;  %338 = vrot.lane.b32.xlu1 %v316_v39, %s3130_s1  ;;  %v125_v39 = vadd.f32 %v111_v49, %v59_v0 }
 0x102   :  { %282 = vrot.lane.b32.xlu0 %v259_v40, %s3129_s24 }
 0x103   :  { %v3478_v41 = vpop.permute.xlu2 %106  ;;  %v3480_v42 = vpop.permute.xlu1 %158  ;;  %v183_v21 = vadd.f32 %v169_v31, %v125_v39 }
 0x104   :  { %v3482_v43 = vpop.permute.xlu0 %102 }
 0x109   :  { %340 = vrot.lane.b32.xlu2 %v317_v45, %s3130_s1  ;;  %506 = vrot.lane.b32.xlu1 %v487_v46, %s3133_s14 }
 0x10a   :  { %450 = vrot.lane.b32.xlu0 %v430_v33, %s3132_s29  ;;  %v115_v33 = vsel %vm110_vm0, %v3482_v43, %v3454_v28 }
 0x10b   :  { %v3493_v47 = vpop.permute.xlu2 %274  ;;  %v3495_v50 = vpop.permute.xlu1 %214 }
 0x10c   :  { %v3497_v51 = vpop.permute.xlu0 %212 }
 0x10d   :  { %v227_v45 = vsel %vm226_vm2, %v3441_v22, %v3497_v51  ;;  %v228_v9 = vsel %vm226_vm2, %v3497_v51, %v3495_v50 }
 0x10e   :  { %v241_v46 = vadd.f32 %v227_v45, %v183_v21 }
 0x111   :  { %508 = vrot.lane.b32.xlu2 %v488_v44, %s3133_s14  ;;  %452 = vrot.lane.b32.xlu1 %v431_v52, %s3132_s29  ;;  %v63_v52 = vmul.f32 %v3300_v26, %v3274_v17 }
 0x112   :  { %396 = vrot.lane.b32.xlu0 %v374_v53, %s3131_s0 }
 0x113   :  { %v3508_v55 = vpop.permute.xlu2 %330  ;;  %v3510_v56 = vpop.permute.xlu1 %216 }
 0x114   :  { %v3512_v57 = vpop.permute.xlu0 %160 }
 0x119   :  { %510 = vrot.lane.b32.xlu2 %v489_v58, %s3133_s14  ;;  %454 = vrot.lane.b32.xlu1 %v432_v59, %s3132_s29  ;;  %v129_v59 = vadd.f32 %v115_v33, %v63_v52 }
 0x11a   :  { %398 = vrot.lane.b32.xlu0 %v375_v61, %s3131_s0 }
 0x11b   :  { %v3523_v62 = vpop.permute.xlu1 %272  ;;  %v3527_v7 = vpop.permute.xlu2 %220 }
 0x11c   :  { %v3525_v63 = vpop.permute.xlu0 %270 }
 0x11d   :  { %v285_v11 = vsel %vm284_vm3, %v3465_v34, %v3525_v63 }
 0x11e   :  { %v299_v44 = vadd.f32 %v285_v11, %v241_v46  ;;  %v65_v46 = vmul.f32 %v3337_v37, %v3274_v17 }
 0x121   :  { %514 = vrot.lane.b32.xlu2 %v491_v12, %s3133_s14  ;;  %512 = vrot.lane.b32.xlu1 %v490_v13, %s3133_s14 }
 0x122   :  { %456 = vrot.lane.b32.xlu0 %v433_v48, %s3132_s29 }
 0x123   :  { %v3538_v18 = vpop.permute.xlu1 %218  ;;  %v385_v20 = vpop.permute.xlu2 %384 }
 0x124   :  { %v3540_v19 = vpop.permute.xlu0 %162  ;;  %v231_v26 = vsel %vm226_vm2, %v3538_v18, %v3527_v7  ;;  %v230_v16 = vsel %vm226_vm2, %v3510_v56, %v3538_v18 }
 0x125   :  { %v173_v53 = vsel %vm168_vm1, %v3512_v57, %v3540_v19 }
 0x126   :  { %v187_v48 = vadd.f32 %v173_v53, %v129_v59 }
 0x12b   :  { %v3542_v23 = vpop.permute.xlu1 %328  ;;  %v167_v24 = vpop.permute.xlu2 %166 }
 0x12c   :  { %v327_v25 = vpop.permute.xlu0 %326 }
 0x12d   :  { %v343_v36 = vsel %vm342_vm4, %v327_v25, %v3542_v23  ;;  %v245_v25 = vadd.f32 %v231_v26, %v187_v48 }
 0x12e   :  { %v357_v34 = vadd.f32 %v343_v36, %v299_v44 }
 0x133   :  { %v3544_v30 = vpop.permute.xlu1 %164  ;;  %v3553_v32 = vpop.permute.xlu2 %334 }
 0x134   :  { %v109_v54 = vpop.permute.xlu0 %108  ;;  %v175_v44 = vsel %vm168_vm1, %v3544_v30, %v167_v24 }
 0x135   :  { %v117_v21 = vsel %vm110_vm0, %v3478_v41, %v109_v54 }
 0x136   :  { %v131_v36 = vadd.f32 %v117_v21, %v65_v46  ;;  %v112_v46 = vsel %vm110_vm0, %v3401_v60, %v3452_v27  ;;  %v170_v60 = vsel %vm168_vm1, %v3467_v35, %v3428_v14 }
 0x138   :  { %v189_v53 = vadd.f32 %v175_v44, %v131_v36  ;;  %v114_v36 = vsel %vm110_vm0, %v3417_v1, %v3482_v43  ;;  %v60_v44 = vmul.f32 %v3249_v10, %v3274_v17  ;;  %v172_v10 = vsel %vm168_vm1, %v3480_v42, %v3512_v57 }
 0x139   :  { %v229_v57 = vsel %vm226_vm2, %v3495_v50, %v3510_v56  ;;  %v64_v50 = vmul.f32 %v3312_v29, %v3274_v17 }
 0x13a   :  { %v126_v43 = vadd.f32 %v112_v46, %v60_v44 }
 0x13b   :  { %v3555_v38 = vpop.permute.xlu1 %332  ;;  %v3579_v61 = vpop.permute.xlu2 %444 }
 0x13c   :  { %v3557_v40 = vpop.permute.xlu0 %276  ;;  %v184_v35 = vadd.f32 %v170_v60, %v126_v43 }
 0x13d   :  { %v288_v51 = vsel %vm284_vm3, %v3493_v47, %v3557_v40 }
 0x13e   :  { %v242_v56 = vadd.f32 %v228_v9, %v184_v35  ;;  %v345_v9 = vsel %vm342_vm4, %v3508_v55, %v3555_v38 }
 0x143   :  { %v3572_v22 = vpop.permute.xlu1 %388  ;;  %v3597_v45 = vpop.permute.xlu2 %280 }
 0x144   :  { %v3577_v58 = vpop.permute.xlu0 %386 }
 0x145   :  { %v401_v12 = vsel %vm400_vm5, %v385_v20, %v3577_v58  ;;  %v402_v29 = vsel %vm400_vm5, %v3577_v58, %v3572_v22 }
 0x146   :  { %v3583_v13 = vadd.f32 %v401_v12, %v357_v34 }
 0x14b   :  { %v3588_v49 = vpop.permute.xlu1 %278  ;;  %v3607_v33 = vpop.permute.xlu2 %448 }
 0x14c   :  { %v289_v0 = vsel %vm284_vm3, %v3557_v40, %v3588_v49  ;;  %v3593_v31 = vpop.permute.xlu0 %222 }
 0x14d   :  { %v3595_v39 = vadd.f32 %v289_v0, %v245_v25 }
 0x153   :  { %v3599_v20 = vpop.permute.xlu1 %442  ;;  %v3617_v54 = vpop.permute.xlu2 %504 }
 0x154   :  { %v3603_v11 = vpop.permute.xlu0 %390 }
 0x15b   :  { %v225_v52 = vpop.permute.xlu1 %224  ;;  %v3623_v0 = vpop.permute.xlu2 %394 }
 0x15c   :  { %v233_v34 = vsel %vm226_vm2, %v3593_v31, %v225_v52  ;;  %v3613_v59 = vpop.permute.xlu0 %446  ;;  %v113_v52 = vsel %vm110_vm0, %v3452_v27, %v3417_v1  ;;  %v171_v1 = vsel %vm168_vm1, %v3428_v14, %v3480_v42  ;;  %v286_v42 = vsel %vm284_vm3, %v3525_v63, %v3523_v62 }
 0x15d   :  { %v3615_v12 = vadd.f32 %v233_v34, %v189_v53  ;;  %v62_v53 = vmul.f32 %v3267_v15, %v3274_v17  ;;  %v127_v15 = vadd.f32 %v113_v52, %v61_v4  ;;  %v116_v4 = vsel %vm110_vm0, %v3454_v28, %v3478_v41 }
 0x15e   :  { %v344_v41 = vsel %vm342_vm4, %v3542_v23, %v3508_v55  ;;  %v174_v63 = vsel %vm168_vm1, %v3540_v19, %v3544_v30  ;;  %v130_v40 = vadd.f32 %v116_v4, %v64_v50  ;;  %v346_v23 = vsel %vm342_vm4, %v3555_v38, %v3553_v32 }
 0x15f   :  { %v128_v27 = vadd.f32 %v114_v36, %v62_v53  ;;  %v185_v14 = vadd.f32 %v171_v1, %v127_v15  ;;  %v287_v36 = vsel %vm284_vm3, %v3523_v62, %v3493_v47  ;;  %v300_v53 = vadd.f32 %v286_v42, %v242_v56 }
 0x160   :  { %v188_v62 = vadd.f32 %v174_v63, %v130_v40  ;;  %v459_v30 = vsel %vm458_vm6, %v3599_v20, %v3579_v61  ;;  %v403_v55 = vsel %vm400_vm5, %v3572_v22, %v3603_v11  ;;  %v460_v58 = vsel %vm458_vm6, %v3579_v61, %v3613_v59  ;;  %v3713_v20 = vld [vmem:[%s5493_s4] sm:$0xff] }
 0x161   :  { %v186_v46 = vadd.f32 %v172_v10, %v128_v27  ;;  %v243_v28 = vadd.f32 %v229_v57, %v185_v14  ;;  %v358_v47 = vadd.f32 %v344_v41, %v300_v53  ;;  %v232_v27 = vsel %vm226_vm2, %v3527_v7, %v3593_v31 }
 0x162   :  { %v461_v61 = vsel %vm458_vm6, %v3613_v59, %v3607_v33  ;;  %v473_v31 = vadd.f32 %v459_v30, %v3583_v13  ;;  %v541_v4 = vperm.slane %v3713_v20, 1  ;;  %v540_v59 = vperm.slane %v3713_v20, 0 }
 0x163   :  { %v3619_v48 = vpop.permute.xlu1 %392  ;;  %v3642_v34 = vpop.permute.xlu2 %340  ;;  %v244_v52 = vadd.f32 %v230_v16, %v186_v46  ;;  %v301_v17 = vadd.f32 %v287_v36, %v243_v28  ;;  %v416_v1 = vadd.f32 %v402_v29, %v358_v47  ;;  %v542_v36 = vperm.slane %v3713_v20, 2 }
 0x164   :  { %v3621_v37 = vpop.permute.xlu0 %336  ;;  %v290_v40 = vsel %vm284_vm3, %v3588_v49, %v3597_v45  ;;  %v544_v30 = vperm.slane %v3713_v20, 4 }
 0x165   :  { %v302_v60 = vadd.f32 %v288_v51, %v244_v52  ;;  %v347_v10 = vsel %vm342_vm4, %v3553_v32, %v3621_v37  ;;  %v359_v43 = vadd.f32 %v345_v9, %v301_v17  ;;  %v404_v32 = vsel %vm400_vm5, %v3603_v11, %v3619_v48 }
 0x166   :  { %v474_v57 = vadd.f32 %v460_v58, %v416_v1  ;;  %v361_v46 = vadd.f32 %v347_v10, %v3595_v39  ;;  %v246_v51 = vadd.f32 %v232_v27, %v188_v62  ;;  %v405_v39 = vsel %vm400_vm5, %v3619_v48, %v3623_v0 }
 0x167   :  { %v360_v38 = vadd.f32 %v346_v23, %v302_v60  ;;  %v417_v35 = vadd.f32 %v403_v55, %v359_v43  ;;  %v545_v27 = vperm.slane %v3713_v20, 5 }
 0x168   :  { %v419_v56 = vadd.f32 %v405_v39, %v361_v46  ;;  %v304_v9 = vadd.f32 %v290_v40, %v246_v51  ;;  %v45_v39 = vld [vmem:[%s5494_s5] sm:$0xff] }
 0x169   :  { %v475_v42 = vadd.f32 %v461_v61, %v417_v35  ;;  %v546_v35 = vperm.slane %v3713_v20, 6 }
 0x16b   :  { %v503_v26 = vpop.permute.xlu1 %502  ;;  %v509_v19 = vpop.permute.xlu2 %508 }
 0x16c   :  { %v501_v25 = vpop.permute.xlu0 %500  ;;  %v518_v15 = vsel %vm516_vm7, %v503_v26, %v3617_v54 }
 0x16d   :  { %v517_v16 = vsel %vm516_vm7, %v501_v25, %v503_v26  ;;  %v418_v26 = vadd.f32 %v404_v32, %v360_v38  ;;  %v3733_v25 = vadd.f32 %v518_v15, %v474_v57 }
 0x16e   :  { %v3735_v13 = vadd.f32 %v517_v16, %v473_v31 }
 0x170   :  { %v554_v28 = vmul.f32 %v540_v59, %v3735_v13 }
 0x173   :  { %v3625_v24 = vpop.permute.xlu1 %338  ;;  %v511_v41 = vpop.permute.xlu2 %510 }
 0x174   :  { %v3627_v21 = vpop.permute.xlu0 %282  ;;  %v348_v53 = vsel %vm342_vm4, %v3621_v37, %v3625_v24  ;;  %v521_v62 = vsel %vm516_vm7, %v509_v19, %v511_v41  ;;  %v349_v55 = vsel %vm342_vm4, %v3625_v24, %v3642_v34 }
 0x175   :  { %v291_v48 = vsel %vm284_vm3, %v3597_v45, %v3627_v21  ;;  %v543_v21 = vperm.slane %v3713_v20, 3  ;;  %v362_v23 = vadd.f32 %v348_v53, %v304_v9 }
 0x176   :  { %v305_v49 = vadd.f32 %v291_v48, %v3615_v12 }
 0x178   :  { %v363_v43 = vadd.f32 %v349_v55, %v305_v49 }
 0x17b   :  { %v3664_v44 = vpop.permute.xlu1 %506  ;;  %v515_v31 = vpop.permute.xlu2 %514 }
 0x17c   :  { %v451_v18 = vpop.permute.xlu0 %450  ;;  %v519_v11 = vsel %vm516_vm7, %v3617_v54, %v3664_v44  ;;  %v520_v60 = vsel %vm516_vm7, %v3664_v44, %v509_v19 }
 0x17d   :  { %v462_v14 = vsel %vm458_vm6, %v3607_v33, %v451_v18  ;;  %v3742_v54 = vadd.f32 %v519_v11, %v475_v42  ;;  %v555_v33 = vmul.f32 %v541_v4, %v3733_v25 }
 0x17e   :  { %v476_v52 = vadd.f32 %v462_v14, %v418_v26 }
 0x17f   :  { %v556_v29 = vmul.f32 %v542_v36, %v3742_v54  ;;  %v561_v37 = vadd.f32 %v555_v33, %v554_v28 }
 0x180   :  { %v3765_v47 = vadd.f32 %v520_v60, %v476_v52 }
 0x181   :  { %v562_v10 = vadd.f32 %v561_v37, %v556_v29 }
 0x182   :  { %v557_v12 = vmul.f32 %v543_v21, %v3765_v47 }
 0x183   :  { %v453_v22 = vpop.permute.xlu1 %452 }
 0x184   :  { %v397_v7 = vpop.permute.xlu0 %396  ;;  %v463_v50 = vsel %vm458_vm6, %v451_v18, %v453_v22  ;;  %v563_v16 = vadd.f32 %v562_v10, %v557_v12 }
 0x185   :  { %v477_v18 = vadd.f32 %v463_v50, %v419_v56  ;;  %v406_v45 = vsel %vm400_vm5, %v3623_v0, %v397_v7  ;;  %v571_v50 = vsel %vm569_vm8, %v45_v39, 0  ;;  %vm1659_vm8 = vcmask 900096  }
 0x186   :  { %v420_v19 = vadd.f32 %v406_v45, %v362_v23  ;;  %v3800_v56 = vand.u32 4294901760, %v571_v50 }
 0x187   :  { %v3771_v44 = vadd.f32 %v521_v62, %v477_v18 }
 0x188   :  { %v3803_v52 = vsub.f32 %v571_v50, %v3800_v56 }
 0x189   :  { %v558_v61 = vmul.f32 %v544_v30, %v3771_v44 }
 0x18a   :  { %v3806_v33 = vand.u32 4294901760, %v3803_v52 }
 0x18b   :  { %v455_v63 = vpop.permute.xlu1 %454  ;;  %v564_v11 = vadd.f32 %v563_v16, %v558_v61 }
 0x18c   :  { %v399_v17 = vpop.permute.xlu0 %398  ;;  %v464_v58 = vsel %vm458_vm6, %v453_v22, %v455_v63  ;;  %v593_v28 = vsub.f32 %v3803_v52, %v3806_v33 }
 0x18d   :  { %v407_v0 = vsel %vm400_vm5, %v397_v7, %v399_v17  ;;  %v478_v38 = vadd.f32 %v464_v58, %v420_v19  ;;  %v924_v19 = vld [vmem:[%s5491_s2] sm:$0xff]  ;;  %vm1567_vm5 = vcmask 1045504   ;;  %s2859_s2 = sshll.u32 %s3164_s19, 4  ;;  %s2860_s2 = int_to_ptr.vmem [resolvable:$true] %s2859_s2 }
 0x18e   :  { %v421_v24 = vadd.f32 %v407_v0, %v363_v43  ;;  %v3810_v48 = vand.u32 4294901760, %v593_v28 }
 0x193   :  { %v513_v1 = vpop.permute.xlu1 %512 }
 0x194   :  { %v522_v34 = vsel %vm516_vm7, %v511_v41, %v513_v1  ;;  %v457_v22 = vpop.permute.xlu0 %456  ;;  %v523_v57 = vsel %vm516_vm7, %v513_v1, %v515_v31  ;;  %vm1641_vm7 = vcmask 908288  }
 0x195   :  { %v3787_v32 = vadd.f32 %v522_v34, %v478_v38  ;;  %v465_v15 = vsel %vm458_vm6, %v455_v63, %v457_v22  ;;  %vm1623_vm6 = vcmask 916480  }
 0x196   :  { %v479_v7 = vadd.f32 %v465_v15, %v421_v24 }
 0x197   :  { %v559_v46 = vmul.f32 %v545_v27, %v3787_v32 }
 0x198   :  { %v537_v14 = vadd.f32 %v523_v57, %v479_v7 }
 0x199   :  { %v565_v42 = vadd.f32 %v564_v11, %v559_v46 }
 0x19a   :  { %v560_v26 = vmul.f32 %v546_v35, %v537_v14 }
 0x19c   :  { %v566_v51 = vadd.f32 %v565_v42, %v560_v26 }
 0x19e   :  { %567 = vadd.xlane.f32.xlu0 %v566_v51 }
 0x211   :  { %v568_v41 = vpop.xlane.xlu0 %567 }
 0x212   :  { %v588_v18 = vand.u32 4294901760, %v568_v41 }
 0x214   :  { %v615_v63 = vsub.f32 %v568_v41, %v588_v18  ;;  %589 = vmatpush.msra.mxu0 %v588_v18  ;;  %665 = vmatpush.msra.mxu3 %v588_v18 }
 0x215   :  { %595 = vmatmul.f32.vlgmr.msra.gmra.mxu0 %v3810_v48  ;;  %669 = vmatmul.f32.vlgmr.msra.gmra.mxu3 %v3806_v33 }
 0x216   :  { %v616_v40 = vand.u32 4294901760, %v615_v63 }
 0x218   :  { %691 = vmatpush.msrb.mxu0 %v616_v40  ;;  %v617_v53 = vsub.f32 %v615_v63, %v616_v40 }
 0x21a   :  { %v618_v60 = vand.u32 4294901760, %v617_v53 }
 0x21c   :  { %619 = vmatpush.msra.mxu1 %v618_v60 }
 0x21d   :  { %621 = vmatmul.f32.vlgmr.msra.gmra.mxu1 %v3800_v56  ;;  %693 = vmatmul.f32.vlgmr.msrb.gmra.mxu0 %v3800_v56 }
 0x21e   :  { %642 = vmatpush.msrb.mxu1 %v615_v63 }
 0x220   :  { %713 = vmatpush.msra.mxu1 %v588_v18 }
 0x225   :  { %645 = vmatmul.f32.vlgmr.msrb.gmra.mxu1 %v3803_v52 }
 0x22d   :  { %715 = vmatmul.f32.vlgmr.msra.gmra.mxu1 %v3800_v56 }
 0x292   :  { %v596_v9 = vpop.f32.mrf.mxu0 }
 0x298   :  { %v670_v49 = vpop.f32.mrf.mxu3 }
 0x29a   :  { %v622_v17 = vpop.f32.mrf.mxu1  ;;  %v694_v23 = vpop.f32.mrf.mxu0 }
 0x29b   :  { %v623_v29 = vadd.f32 %v622_v17, %v596_v9 }
 0x2a2   :  { %v646_v62 = vpop.f32.mrf.mxu1 }
 0x2a3   :  { %v647_v45 = vadd.f32 %v646_v62, %v623_v29 }
 0x2a5   :  { %v671_v37 = vadd.f32 %v670_v49, %v647_v45 }
 0x2a7   :  { %v695_v55 = vadd.f32 %v694_v23, %v671_v37 }
 0x2aa   :  { %v716_v58 = vpop.f32.mrf.mxu1 }
 0x2ab   :  { %v717_v10 = vadd.f32 %v716_v58, %v695_v55 }
 0x2ad   :  { %v719_v12 = vmul.f32 0.0006377551, %v717_v10 }
 0x2af   :  { %722 = vperm.xlu1 %3017, %v719_v12  }
 0x2b7   :  { %927 = vperm.xlu1 %3017, %v924_v19   ;;  %v937_v19 = vld [vmem:[%s5492_s3] sm:$0xff] }
 0x321   :  { %v723_v0 = vpop.permute.xlu1 %722 }
 0x322   :  { %v3822_v43 = vsub.f32 %v3735_v13, %v723_v0  ;;  %v3825_v38 = vsub.f32 %v3733_v25, %v723_v0  ;;  %v3828_v1 = vsub.f32 %v3742_v54, %v723_v0  ;;  %v3831_v61 = vsub.f32 %v3765_v47, %v723_v0 }
 0x323   :  { %v3834_v24 = vsub.f32 %v3771_v44, %v723_v0  ;;  %v3843_v25 = vsub.f32 %v3787_v32, %v723_v0  ;;  %v3851_v15 = vsub.f32 %v537_v14, %v723_v0 }
 0x324   :  { %v732_v34 = vmul.f32 %v3822_v43, %v3822_v43  ;;  %v733_v22 = vmul.f32 %v3825_v38, %v3825_v38  ;;  %v734_v13 = vmul.f32 %v3828_v1, %v3828_v1  ;;  %v735_v54 = vmul.f32 %v3831_v61, %v3831_v61 }
 0x325   :  { %v736_v16 = vmul.f32 %v3834_v24, %v3834_v24  ;;  %v737_v32 = vmul.f32 %v3843_v25, %v3843_v25 }
 0x326   :  { %v739_v47 = vmul.f32 %v732_v34, %v540_v59  ;;  %v740_v44 = vmul.f32 %v733_v22, %v541_v4  ;;  %v741_v31 = vmul.f32 %v734_v13, %v542_v36  ;;  %v742_v57 = vmul.f32 %v735_v54, %v543_v21 }
 0x327   :  { %v738_v59 = vmul.f32 %v3851_v15, %v3851_v15  ;;  %v743_v4 = vmul.f32 %v736_v16, %v544_v30  ;;  %v744_v14 = vmul.f32 %v737_v32, %v545_v27 }
 0x328   :  { %v746_v7 = vadd.f32 %v740_v44, %v739_v47 }
 0x329   :  { %v745_v36 = vmul.f32 %v738_v59, %v546_v35  ;;  %v928_v0 = vpop.permute.xlu1 %927 }
 0x32a   :  { %v747_v46 = vadd.f32 %v746_v7, %v741_v31 }
 0x32c   :  { %v748_v11 = vadd.f32 %v747_v46, %v742_v57 }
 0x32e   :  { %v749_v42 = vadd.f32 %v748_v11, %v743_v4 }
 0x330   :  { %v750_v26 = vadd.f32 %v749_v42, %v744_v14 }
 0x332   :  { %v751_v51 = vadd.f32 %v750_v26, %v745_v36 }
 0x334   :  { %752 = vadd.xlane.f32.xlu2 %v751_v51 }
 0x3a7   :  { %v753_v39 = vpop.xlane.xlu2 %752 }
 0x3a8   :  { %v769_v21 = vand.u32 4294901760, %v753_v39 }
 0x3aa   :  { %v796_v50 = vsub.f32 %v753_v39, %v769_v21  ;;  %770 = vmatpush.msra.mxu2 %v769_v21  ;;  %846 = vmatpush.msrb.mxu1 %v769_v21 }
 0x3ab   :  { %776 = vmatmul.f32.vlgmr.msra.gmra.mxu2 %v3810_v48  ;;  %850 = vmatmul.f32.vlgmr.msrb.gmra.mxu1 %v3806_v33 }
 0x3ac   :  { %823 = vmatpush.msra.mxu0 %v796_v50  ;;  %v797_v30 = vand.u32 4294901760, %v796_v50 }
 0x3ad   :  { %826 = vmatmul.f32.vlgmr.msra.gmra.mxu0 %v3803_v52 }
 0x3ae   :  { %872 = vmatpush.msrb.mxu2 %v797_v30  ;;  %v798_v27 = vsub.f32 %v796_v50, %v797_v30 }
 0x3b0   :  { %v799_v20 = vand.u32 4294901760, %v798_v27 }
 0x3b2   :  { %800 = vmatpush.msrb.mxu3 %v799_v20  ;;  %v3893_v20 = vld [vmem:[%s5496_s7] sm:$0xff] }
 0x3b3   :  { %802 = vmatmul.f32.vlgmr.msrb.gmra.mxu3 %v3800_v56  ;;  %874 = vmatmul.f32.vlgmr.msrb.gmra.mxu2 %v3800_v56 }
 0x3b4   :  { %894 = vmatpush.msra.mxu3 %v769_v21 }
 0x3bb   :  { %896 = vmatmul.f32.vlgmr.msra.gmra.mxu3 %v3800_v56 }
 0x428   :  { %v851_v63 = vpop.f32.mrf.mxu1 }
 0x42a   :  { %v827_v41 = vpop.f32.mrf.mxu0 }
 0x42e   :  { %v777_v35 = vpop.f32.mrf.mxu2 }
 0x436   :  { %v803_v28 = vpop.f32.mrf.mxu3  ;;  %v875_v53 = vpop.f32.mrf.mxu2 }
 0x437   :  { %v804_v18 = vadd.f32 %v803_v28, %v777_v35 }
 0x439   :  { %v828_v40 = vadd.f32 %v827_v41, %v804_v18 }
 0x43b   :  { %v852_v60 = vadd.f32 %v851_v63, %v828_v40 }
 0x43d   :  { %v876_v17 = vadd.f32 %v875_v53, %v852_v60 }
 0x43e   :  { %v897_v9 = vpop.f32.mrf.mxu3 }
 0x43f   :  { %v898_v29 = vadd.f32 %v897_v9, %v876_v17 }
 0x441   :  { %v900_v62 = vmul.f32 0.0006377551, %v898_v29 }
 0x443   :  { %v901_v49 = vadd.f32 1e-05, %v900_v62 }
 0x445   :  { %3086 = vrsqrt.f32 %v901_v49  ;;  %vm908_vm10 = vweird.f32 %v901_v49 }
 0x44b   :  { %v3087_v45 = vpop.eup %3086 }
 0x44c   :  { %v903_v37 = vmul.f32 %v3087_v45, %v901_v49  ;;  %vm909_vm9 = vweird.f32 %v3087_v45 }
 0x44d   :  { %vm910_vm11 = vmor %vm908_vm10, %vm909_vm9  ;;  %vm2852_vm9 = vcmask 246784  }
 0x44e   :  { %v904_v23 = vmul.f32 %v3087_v45, %v903_v37 }
 0x450   :  { %v905_v55 = vmul.f32 0.5, %v904_v23 }
 0x452   :  { %v906_v58 = vsub.f32 1.5, %v905_v55 }
 0x454   :  { %v907_v10 = vmul.f32 %v3087_v45, %v906_v58 }
 0x456   :  { %v911_v12 = vsel %vm910_vm11, %v3087_v45, %v907_v10 }
 0x457   :  { %914 = vperm.xlu1 %3017, %v911_v12  }
 0x45f   :  { %940 = vperm.xlu1 %3017, %v937_v19  }
 0x467   :  { %3049 = vset.pattern.permute.xlu1 %v3118_v2 }
 0x4c9   :  { %v915_v34 = vpop.permute.xlu1 %914 }
 0x4ca   :  { %v923_v22 = vmul.f32 %v915_v34, %v3851_v15  ;;  %v919_v13 = vmul.f32 %v915_v34, %v3828_v1  ;;  %v920_v54 = vmul.f32 %v915_v34, %v3831_v61  ;;  %v917_v47 = vmul.f32 %v915_v34, %v3822_v43 }
 0x4cb   :  { %v918_v44 = vmul.f32 %v915_v34, %v3825_v38  ;;  %v921_v16 = vmul.f32 %v915_v34, %v3834_v24  ;;  %v922_v31 = vmul.f32 %v915_v34, %v3843_v25 }
 0x4cc   :  { %v936_v7 = vmul.f32 %v928_v0, %v923_v22  ;;  %v932_v32 = vmul.f32 %v928_v0, %v919_v13  ;;  %v933_v57 = vmul.f32 %v928_v0, %v920_v54  ;;  %v930_v2 = vmul.f32 %v928_v0, %v917_v47  ;;  %v1101_v13 = vld [vmem:[%s5495_s6 + $0x1f0] sm:$0xff]  ;;  %v1099_v54 = vld [vmem:[%s5495_s6 + $0x1e0] sm:$0xff] }
 0x4cd   :  { %v931_v59 = vmul.f32 %v928_v0, %v918_v44  ;;  %v934_v61 = vmul.f32 %v928_v0, %v921_v16  ;;  %v935_v42 = vmul.f32 %v928_v0, %v922_v31  ;;  %1286 = vmatpush.msra.mxu1 %v1101_v13  ;;  %v1097_v47 = vld [vmem:[%s5495_s6 + $0x1d0] sm:$0xff]  ;;  %v1095_v44 = vld [vmem:[%s5495_s6 + $0x1c0] sm:$0xff] }
 0x4ce   :  { %v1133_v16 = vld [vmem:[%s5495_s6 + $0x2f0] sm:$0xff]  ;;  %v1111_v13 = vld [vmem:[%s5495_s6 + $0x240] sm:$0xff] }
 0x4cf   :  { %1287 = vmatpush.msra.mxu1 %v1099_v54  ;;  %v1165_v31 = vld [vmem:[%s5495_s6 + $0x3f0] sm:$0xff]  ;;  %1306 = vmatpush.msra.mxu2 %v1133_v16  ;;  %v1143_v54 = vld [vmem:[%s5495_s6 + $0x340] sm:$0xff] }
 0x4d0   :  { %1326 = vmatpush.msrb.mxu3 %v1165_v31  ;;  %v1109_v16 = vld [vmem:[%s5495_s6 + $0x230] sm:$0xff] }
 0x4d1   :  { %v941_v46 = vpop.permute.xlu1 %940  ;;  %1288 = vmatpush.msra.mxu1 %v1097_v47  ;;  %v1229_v47 = vld [vmem:[%s5495_s6 + $0x5f0] sm:$0xff] }
 0x4d2   :  { %v949_v4 = vadd.f32 %v941_v46, %v936_v7  ;;  %v945_v15 = vadd.f32 %v941_v46, %v932_v32  ;;  %v946_v11 = vadd.f32 %v941_v46, %v933_v57  ;;  %v943_v1 = vadd.f32 %v941_v46, %v930_v2  ;;  %v1067_v7 = vld [vmem:[%s5495_s6 + $0xe0] sm:$0xff]  ;;  %v1093_v57 = vld [vmem:[%s5495_s6 + $0x1b0] sm:$0xff] }
 0x4d3   :  { %v944_v14 = vadd.f32 %v941_v46, %v931_v59  ;;  %v947_v51 = vadd.f32 %v941_v46, %v934_v61  ;;  %v948_v39 = vadd.f32 %v941_v46, %v935_v42  ;;  %v1131_v32 = vld [vmem:[%s5495_s6 + $0x2e0] sm:$0xff]  ;;  %1289 = vmatpush.msra.mxu1 %v1095_v44  ;;  %v1065_v59 = vld [vmem:[%s5495_s6 + $0xd0] sm:$0xff]  ;;  %v3135_v44 = vmov 14  }
 0x4d4   :  { %v956_v43 = vmax.f32 %v949_v4, 0.0  ;;  %v952_v36 = vmax.f32 %v945_v15, 0.0  ;;  %v953_v38 = vmax.f32 %v946_v11, 0.0  ;;  %v950_v26 = vmax.f32 %v943_v1, 0.0  ;;  %v1163_v2 = vld [vmem:[%s5495_s6 + $0x3e0] sm:$0xff]  ;;  %1307 = vmatpush.msra.mxu2 %v1131_v32  ;;  %v1089_v4 = vld [vmem:[%s5495_s6 + $0x190] sm:$0xff] }
 0x4d5   :  { %v951_v24 = vmax.f32 %v944_v14, 0.0  ;;  %v954_v50 = vmax.f32 %v947_v51, 0.0  ;;  %v955_v30 = vmax.f32 %v948_v39, 0.0  ;;  %v1091_v46 = vld [vmem:[%s5495_s6 + $0x1a0] sm:$0xff]  ;;  %1290 = vmatpush.msra.mxu1 %v1093_v57  ;;  %1327 = vmatpush.msrb.mxu3 %v1163_v2  ;;  %v1161_v15 = vld [vmem:[%s5495_s6 + $0x3d0] sm:$0xff] }
 0x4d6   :  { %976 = vrot.lane.b32.xlu0 %v956_v43, %s3126_s30  ;;  %v3018_v25 = vpack.i.bf16 %v953_v38, %v952_v36  ;;  %v1063_v11 = vld [vmem:[%s5495_s6 + $0xc0] sm:$0xff]  ;;  %v1061_v42 = vld [vmem:[%s5495_s6 + $0xb0] sm:$0xff] }
 0x4d7   :  { %v3028_v21 = vpack.i.bf16 %v951_v24, %v950_v26  ;;  %v3023_v27 = vpack.i.bf16 %v955_v30, %v954_v50  ;;  %1291 = vmatpush.msra.mxu1 %v1091_v46  ;;  %v1087_v1 = vld [vmem:[%s5495_s6 + $0x180] sm:$0xff]  ;;  %1328 = vmatpush.msrb.mxu3 %v1161_v15  ;;  %v1141_v31 = vld [vmem:[%s5495_s6 + $0x330] sm:$0xff] }
 0x4d8   :  { %3019 = vrot.lane.b32.xlu1 %v3018_v25, %s3126_s30  ;;  %v1127_v14 = vld [vmem:[%s5495_s6 + $0x2c0] sm:$0xff]  ;;  %v1225_v46 = vld [vmem:[%s5495_s6 + $0x5d0] sm:$0xff] }
 0x4d9   :  { %3029 = vrot.lane.b32.xlu2 %v3028_v21, %s3126_s30  ;;  %1292 = vmatpush.msra.mxu1 %v1089_v4  ;;  %v1159_v61 = vld [vmem:[%s5495_s6 + $0x3c0] sm:$0xff]  ;;  %v1057_v21 = vld [vmem:[%s5495_s6 + $0x90] sm:$0xff] }
 0x4da   :  { %1329 = vmatpush.msrb.mxu3 %v1159_v61  ;;  %v1083_v25 = vld [vmem:[%s5495_s6 + $0x160] sm:$0xff]  ;;  %v1105_v4 = vld [vmem:[%s5495_s6 + $0x210] sm:$0xff] }
 0x4db   :  { %1293 = vmatpush.msra.mxu1 %v1087_v1  ;;  %v1123_v51 = vld [vmem:[%s5495_s6 + $0x2a0] sm:$0xff]  ;;  %v1197_v61 = vld [vmem:[%s5495_s6 + $0x4f0] sm:$0xff] }
 0x4dc   :  { %v1155_v39 = vld [vmem:[%s5495_s6 + $0x3a0] sm:$0xff] }
 0x4dd   :  { %v1043_v32 = vld [vmem:[%s5495_s6 + $0x20] sm:$0xff] }
 0x4de   :  { %v1107_v57 = vld [vmem:[%s5495_s6 + $0x220] sm:$0xff] }
 0x4df   :  { %v1139_v2 = vld [vmem:[%s5495_s6 + $0x320] sm:$0xff] }
 0x4e0   :  { %3024 = vrot.lane.b32.xlu1 %v3023_v27, %s3126_s30  ;;  %v1153_v27 = vld [vmem:[%s5495_s6 + $0x390] sm:$0xff]  ;;  %v1223_v15 = vld [vmem:[%s5495_s6 + $0x5c0] sm:$0xff] }
 0x4e1   :  { %1578 = vperm.xlu2 %3048, %v3893_v20   ;;  %v1103_v1 = vld [vmem:[%s5495_s6 + $0x200] sm:$0xff] }
 0x4e9   :  { %3050 = vset.pattern.permute.xlu2 %v3121_v5 }
 0x4ea   :  { %1630 = vperm.xlu2 %3050, %v3893_v20  }
 0x4f2   :  { %3052 = vset.pattern.permute.xlu2 %v3122_v6 }
 0x4f3   :  { %1666 = vperm.xlu2 %3052, %v3893_v20  }
 0x533   :  { %v3030_v28 = vpop.permute.xlu2 %3029 }
 0x534   :  { %v3032_v63 = vunpack.i.h.bf16 %v3030_v28  ;;  %v3031_v23 = vunpack.i.l.bf16 %v3030_v28  ;;  %v1079_v28 = vld [vmem:[%s5495_s6 + $0x140] sm:$0xff] }
 0x536   :  { %v978_v12 = vsel %vm110_vm0, %v3031_v23, %v3032_v63  ;;  %v1049_v23 = vld [vmem:[%s5495_s6 + $0x50] sm:$0xff] }
 0x537   :  { %v3922_v0 = vmax.f32 %v950_v26, %v978_v12  ;;  %v1157_v26 = vld [vmem:[%s5495_s6 + $0x3b0] sm:$0xff]  ;;  %v1047_v12 = vld [vmem:[%s5495_s6 + $0x40] sm:$0xff] }
 0x538   :  { %1330 = vmatpush.msrb.mxu3 %v1157_v26  ;;  %v1195_v26 = vld [vmem:[%s5495_s6 + $0x4e0] sm:$0xff] }
 0x53a   :  { %1331 = vmatpush.msrb.mxu3 %v1155_v39  ;;  %v1193_v39 = vld [vmem:[%s5495_s6 + $0x4d0] sm:$0xff] }
 0x53c   :  { %1332 = vmatpush.msrb.mxu3 %v1153_v27  ;;  %v1191_v27 = vld [vmem:[%s5495_s6 + $0x4c0] sm:$0xff] }
 0x548   :  { %v977_v29 = vpop.permute.xlu0 %976 }
 0x549   :  { %v3928_v22 = vmax.f32 %v956_v43, %v977_v29  ;;  %v1085_v43 = vld [vmem:[%s5495_s6 + $0x170] sm:$0xff] }
 0x54a   :  { %v3020_v35 = vpop.permute.xlu1 %3019  ;;  %1294 = vmatpush.msra.mxu1 %v1085_v43  ;;  %v3136_v43 = vmov 16  }
 0x54b   :  { %v3022_v41 = vunpack.i.h.bf16 %v3020_v35  ;;  %v3021_v18 = vunpack.i.l.bf16 %v3020_v35  ;;  %v1055_v35 = vld [vmem:[%s5495_s6 + $0x80] sm:$0xff] }
 0x54c   :  { %1295 = vmatpush.msra.mxu1 %v1083_v25  ;;  %v1251_v25 = vld [vmem:[%s5495_s6 + $0x6a0] sm:$0xff] }
 0x54d   :  { %v979_v53 = vsel %vm110_vm0, %v3032_v63, %v3021_v18  ;;  %v980_v60 = vsel %vm110_vm0, %v3021_v18, %v3022_v41  ;;  %v1151_v18 = vld [vmem:[%s5495_s6 + $0x380] sm:$0xff]  ;;  %v1053_v63 = vld [vmem:[%s5495_s6 + $0x70] sm:$0xff] }
 0x54e   :  { %v3904_v49 = vmax.f32 %v952_v36, %v980_v60  ;;  %v3908_v45 = vmax.f32 %v951_v24, %v979_v53  ;;  %v5506_v36 = vmov 8   ;;  %v1059_v24 = vld [vmem:[%s5495_s6 + $0xa0] sm:$0xff]  ;;  %v3134_v53 = vmov 11   ;;  %v1117_v60 = vld [vmem:[%s5495_s6 + $0x270] sm:$0xff]  ;;  %1333 = vmatpush.msrb.mxu3 %v1151_v18 }
 0x54f   :  { %v1189_v18 = vld [vmem:[%s5495_s6 + $0x4b0] sm:$0xff] }
 0x552   :  { %v3025_v40 = vpop.permute.xlu1 %3024 }
 0x553   :  { %v3027_v17 = vunpack.i.h.bf16 %v3025_v40  ;;  %v3026_v9 = vunpack.i.l.bf16 %v3025_v40  ;;  %v1077_v40 = vld [vmem:[%s5495_s6 + $0x130] sm:$0xff] }
 0x555   :  { %v983_v5 = vsel %vm110_vm0, %v3027_v17, %v977_v29  ;;  %v981_v62 = vsel %vm110_vm0, %v3022_v41, %v3026_v9  ;;  %v982_v10 = vsel %vm110_vm0, %v3026_v9, %v3027_v17  ;;  %v1119_v41 = vld [vmem:[%s5495_s6 + $0x280] sm:$0xff]  ;;  %v1149_v17 = vld [vmem:[%s5495_s6 + $0x370] sm:$0xff] }
 0x556   :  { %v3906_v6 = vmax.f32 %v953_v38, %v981_v62  ;;  %v3910_v37 = vmax.f32 %v955_v30, %v983_v5  ;;  %v3920_v19 = vmax.f32 %v954_v50, %v982_v10  ;;  %v1125_v38 = vld [vmem:[%s5495_s6 + $0x2b0] sm:$0xff]  ;;  %v1051_v9 = vld [vmem:[%s5495_s6 + $0x60] sm:$0xff]  ;;  %1334 = vmatpush.msrb.mxu3 %v1149_v17 }
 0x557   :  { %v1081_v50 = vld [vmem:[%s5495_s6 + $0x150] sm:$0xff]  ;;  %v1075_v29 = vld [vmem:[%s5495_s6 + $0x120] sm:$0xff] }
 0x558   :  { %v3033_v55 = vpack.i.bf16 %v3906_v6, %v3904_v49  ;;  %v3043_v58 = vpack.i.bf16 %v3910_v37, %v3908_v45  ;;  %v3038_v34 = vpack.i.bf16 %v3922_v0, %v3920_v19  ;;  %v1121_v30 = vld [vmem:[%s5495_s6 + $0x290] sm:$0xff]  ;;  %1296 = vmatpush.msra.mxu1 %v1081_v50  ;;  %v1115_v5 = vld [vmem:[%s5495_s6 + $0x260] sm:$0xff] }
 0x559   :  { %v1147_v62 = vld [vmem:[%s5495_s6 + $0x360] sm:$0xff]  ;;  %v1145_v10 = vld [vmem:[%s5495_s6 + $0x350] sm:$0xff] }
 0x55a   :  { %3034 = vrot.lane.b32.xlu1 %v3033_v55, %s3128_s21  ;;  %3044 = vrot.lane.b32.xlu0 %v3043_v58, %s3128_s21  ;;  %v1073_v55 = vld [vmem:[%s5495_s6 + $0x110] sm:$0xff]  ;;  %v1187_v17 = vld [vmem:[%s5495_s6 + $0x4a0] sm:$0xff] }
 0x55b   :  { %1297 = vmatpush.msra.mxu1 %v1079_v28  ;;  %v1113_v58 = vld [vmem:[%s5495_s6 + $0x250] sm:$0xff]  ;;  %1335 = vmatpush.msrb.mxu3 %v1147_v62  ;;  %v1247_v28 = vld [vmem:[%s5495_s6 + $0x680] sm:$0xff] }
 0x55c   :  { %v1249_v50 = vld [vmem:[%s5495_s6 + $0x690] sm:$0xff] }
 0x55d   :  { %1298 = vmatpush.msra.mxu1 %v1077_v40  ;;  %1336 = vmatpush.msrb.mxu3 %v1145_v10  ;;  %v3137_v40 = vmov 20   ;;  %v1185_v62 = vld [vmem:[%s5495_s6 + $0x490] sm:$0xff]  ;;  %v1183_v10 = vld [vmem:[%s5495_s6 + $0x480] sm:$0xff] }
 0x55f   :  { %1299 = vmatpush.msra.mxu1 %v1075_v29  ;;  %1337 = vmatpush.msrb.mxu3 %v1143_v54  ;;  %v1243_v29 = vld [vmem:[%s5495_s6 + $0x660] sm:$0xff]  ;;  %v1181_v54 = vld [vmem:[%s5495_s6 + $0x470] sm:$0xff] }
 0x561   :  { %1300 = vmatpush.msra.mxu1 %v1073_v55  ;;  %1338 = vmatpush.msrb.mxu3 %v1141_v31  ;;  %v1241_v55 = vld [vmem:[%s5495_s6 + $0x650] sm:$0xff]  ;;  %v1179_v31 = vld [vmem:[%s5495_s6 + $0x460] sm:$0xff] }
 0x562   :  { %1595 = vperm.xlu0 %3016, %v3893_v20   ;;  %3039 = vrot.lane.b32.xlu1 %v3038_v34, %s3128_s21  ;;  %v1071_v34 = vld [vmem:[%s5495_s6 + $0x100] sm:$0xff] }
 0x563   :  { %1301 = vmatpush.msra.mxu1 %v1071_v34  ;;  %1339 = vmatpush.msrb.mxu3 %v1139_v2  ;;  %v1239_v34 = vld [vmem:[%s5495_s6 + $0x640] sm:$0xff]  ;;  %v1177_v2 = vld [vmem:[%s5495_s6 + $0x450] sm:$0xff] }
 0x565   :  { %1366 = vmatpush.msrb.mxu1 %v1229_v47  ;;  %v1205_v47 = vld [vmem:[%s5495_s6 + $0x530] sm:$0xff] }
 0x56a   :  { %1017 = vrot.lane.b32.xlu1 %v3928_v22, %s3128_s21  ;;  %3053 = vset.pattern.permute.xlu0 %v3124_v8  ;;  %v1069_v8 = vld [vmem:[%s5495_s6 + $0xf0] sm:$0xff] }
 0x56b   :  { %1683 = vperm.xlu0 %3053, %v3893_v20   ;;  %1266 = vmatpush.msrb.mxu0 %v1069_v8  ;;  %v1045_v8 = vld [vmem:[%s5495_s6 + $0x30] sm:$0xff] }
 0x56d   :  { %1267 = vmatpush.msrb.mxu0 %v1067_v7  ;;  %v1227_v7 = vld [vmem:[%s5495_s6 + $0x5e0] sm:$0xff] }
 0x56e   :  { %1367 = vmatpush.msrb.mxu1 %v1227_v7  ;;  %v1203_v7 = vld [vmem:[%s5495_s6 + $0x520] sm:$0xff] }
 0x56f   :  { %1268 = vmatpush.msrb.mxu0 %v1065_v59  ;;  %v1041_v59 = vld [vmem:[%s5495_s6 + $0x10] sm:$0xff] }
 0x570   :  { %1368 = vmatpush.msrb.mxu1 %v1225_v46  ;;  %v1201_v46 = vld [vmem:[%s5495_s6 + $0x510] sm:$0xff] }
 0x571   :  { %1269 = vmatpush.msrb.mxu0 %v1063_v11  ;;  %v1039_v11 = vld [vmem:[%s5495_s6] sm:$0xff] }
 0x572   :  { %1612 = vperm.xlu1 %3049, %v3893_v20   ;;  %1369 = vmatpush.msrb.mxu1 %v1223_v15  ;;  %v1199_v15 = vld [vmem:[%s5495_s6 + $0x500] sm:$0xff] }
 0x573   :  { %1270 = vmatpush.msrb.mxu0 %v1061_v42  ;;  %v1221_v42 = vld [vmem:[%s5495_s6 + $0x5b0] sm:$0xff] }
 0x574   :  { %1370 = vmatpush.msrb.mxu1 %v1221_v42  ;;  %v1046_v42 = vld [vmem:[%s5495_s6 + $0x38] sm:$0xff] }
 0x575   :  { %1271 = vmatpush.msrb.mxu0 %v1059_v24  ;;  %v1219_v24 = vld [vmem:[%s5495_s6 + $0x5a0] sm:$0xff] }
 0x576   :  { %1371 = vmatpush.msrb.mxu1 %v1219_v24  ;;  %v1042_v24 = vld [vmem:[%s5495_s6 + $0x18] sm:$0xff] }
 0x577   :  { %1272 = vmatpush.msrb.mxu0 %v1057_v21  ;;  %v1217_v21 = vld [vmem:[%s5495_s6 + $0x590] sm:$0xff] }
 0x578   :  { %1372 = vmatpush.msrb.mxu1 %v1217_v21  ;;  %v3142_v21 = vmov 23  }
 0x579   :  { %1273 = vmatpush.msrb.mxu0 %v1055_v35  ;;  %v1215_v35 = vld [vmem:[%s5495_s6 + $0x580] sm:$0xff] }
 0x57a   :  { %3051 = vset.pattern.permute.xlu1 %v3119_v3  ;;  %v1129_v3 = vld [vmem:[%s5495_s6 + $0x2d0] sm:$0xff]  ;;  %1373 = vmatpush.msrb.mxu1 %v1215_v35 }
 0x57b   :  { %1648 = vperm.xlu1 %3051, %v3893_v20   ;;  %1308 = vmatpush.msra.mxu2 %v1129_v3  ;;  %v1137_v3 = vld [vmem:[%s5495_s6 + $0x310] sm:$0xff] }
 0x57c   :  { %1274 = vmatpush.msrb.mxu0 %v1053_v63  ;;  %1340 = vmatpush.msrb.mxu3 %v1137_v3  ;;  %v1213_v63 = vld [vmem:[%s5495_s6 + $0x570] sm:$0xff]  ;;  %v1175_v3 = vld [vmem:[%s5495_s6 + $0x440] sm:$0xff] }
 0x57d   :  { %1309 = vmatpush.msra.mxu2 %v1127_v14  ;;  %v1135_v14 = vld [vmem:[%s5495_s6 + $0x300] sm:$0xff]  ;;  %1374 = vmatpush.msrb.mxu1 %v1213_v63 }
 0x57e   :  { %1275 = vmatpush.msrb.mxu0 %v1051_v9  ;;  %1341 = vmatpush.msrb.mxu3 %v1135_v14  ;;  %v1211_v9 = vld [vmem:[%s5495_s6 + $0x560] sm:$0xff]  ;;  %v1173_v14 = vld [vmem:[%s5495_s6 + $0x430] sm:$0xff] }
 0x57f   :  { %1310 = vmatpush.msra.mxu2 %v1125_v38  ;;  %v1070_v38 = vld [vmem:[%s5495_s6 + $0xf8] sm:$0xff]  ;;  %1375 = vmatpush.msrb.mxu1 %v1211_v9 }
 0x580   :  { %1276 = vmatpush.msrb.mxu0 %v1049_v23  ;;  %1406 = vmatpush.msra.mxu3 %v1070_v38  ;;  %v1209_v23 = vld [vmem:[%s5495_s6 + $0x550] sm:$0xff]  ;;  %v3140_v38 = vmov 10   ;;  %v1102_v9 = vld [vmem:[%s5495_s6 + $0x1f8] sm:$0xff] }
 0x581   :  { %1311 = vmatpush.msra.mxu2 %v1123_v51  ;;  %v1068_v51 = vld [vmem:[%s5495_s6 + $0xe8] sm:$0xff]  ;;  %1376 = vmatpush.msrb.mxu1 %v1209_v23 }
 0x582   :  { %1277 = vmatpush.msrb.mxu0 %v1047_v12  ;;  %1407 = vmatpush.msra.mxu3 %v1068_v51  ;;  %v1207_v12 = vld [vmem:[%s5495_s6 + $0x540] sm:$0xff]  ;;  %v3141_v51 = vmov 13  }
 0x583   :  { %3054 = vset.pattern.permute.xlu1 %v5506_v36  ;;  %1312 = vmatpush.msra.mxu2 %v1121_v30  ;;  %v1253_v36 = vld [vmem:[%s5495_s6 + $0x6b0] sm:$0x7]  ;;  %v1066_v30 = vld [vmem:[%s5495_s6 + $0xd8] sm:$0xff] }
 0x584   :  { %1700 = vperm.xlu1 %3054, %v3893_v20   ;;  %1278 = vmatpush.msrb.mxu0 %v1045_v8  ;;  %v3138_v8 = vmov 21  }
 0x585   :  { %1313 = vmatpush.msra.mxu2 %v1119_v41  ;;  %1408 = vmatpush.msra.mxu3 %v1066_v30  ;;  %v1064_v41 = vld [vmem:[%s5495_s6 + $0xc8] sm:$0xff]  ;;  %v3144_v30 = vmov 19  }
 0x586   :  { %1279 = vmatpush.msrb.mxu0 %v1043_v32  ;;  %1377 = vmatpush.msrb.mxu1 %v1207_v12  ;;  %v1235_v32 = vld [vmem:[%s5495_s6 + $0x620] sm:$0xff] }
 0x587   :  { %1314 = vmatpush.msra.mxu2 %v1117_v60  ;;  %v1062_v60 = vld [vmem:[%s5495_s6 + $0xb8] sm:$0xff]  ;;  %1409 = vmatpush.msra.mxu3 %v1064_v41 }
 0x588   :  { %1280 = vmatpush.msrb.mxu0 %v1041_v59  ;;  %1378 = vmatpush.msrb.mxu1 %v1205_v47  ;;  %v1233_v59 = vld [vmem:[%s5495_s6 + $0x610] sm:$0xff] }
 0x589   :  { %1315 = vmatpush.msra.mxu2 %v1115_v5  ;;  %v1060_v5 = vld [vmem:[%s5495_s6 + $0xa8] sm:$0xff]  ;;  %1410 = vmatpush.msra.mxu3 %v1062_v60 }
 0x58a   :  { %1281 = vmatpush.msrb.mxu0 %v1039_v11  ;;  %1379 = vmatpush.msrb.mxu1 %v1203_v7  ;;  %v1231_v11 = vld [vmem:[%s5495_s6 + $0x600] sm:$0xff]  ;;  %v1134_v7 = vld [vmem:[%s5495_s6 + $0x2f8] sm:$0xff] }
 0x58b   :  { %1316 = vmatpush.msra.mxu2 %v1113_v58  ;;  %v1058_v58 = vld [vmem:[%s5495_s6 + $0x98] sm:$0xff]  ;;  %1411 = vmatpush.msra.mxu3 %v1060_v5  ;;  %v3146_v5 = vmov 15  }
 0x58c   :  { %3056 = vset.pattern.permute.xlu1 %v3134_v53  ;;  %1346 = vmatpush.msra.mxu0 %v1197_v61  ;;  %v1245_v53 = vld [vmem:[%s5495_s6 + $0x670] sm:$0xff]  ;;  %v3139_v61 = vmov 22  }
 0x58d   :  { %1748 = vperm.xlu1 %3056, %v3893_v20   ;;  %1317 = vmatpush.msra.mxu2 %v1111_v13  ;;  %v1056_v13 = vld [vmem:[%s5495_s6 + $0x88] sm:$0xff] }
 0x58e   :  { %1347 = vmatpush.msra.mxu0 %v1195_v26  ;;  %1412 = vmatpush.msra.mxu3 %v1058_v58  ;;  %v1169_v26 = vld [vmem:[%s5495_s6 + $0x410] sm:$0xff]  ;;  %v1162_v58 = vld [vmem:[%s5495_s6 + $0x3d8] sm:$0xff] }
 0x58f   :  { %1318 = vmatpush.msra.mxu2 %v1109_v16  ;;  %v1054_v16 = vld [vmem:[%s5495_s6 + $0x78] sm:$0xff]  ;;  %1380 = vmatpush.msrb.mxu1 %v1201_v46  ;;  %v1156_v46 = vld [vmem:[%s5495_s6 + $0x3a8] sm:$0xff] }
 0x590   :  { %1348 = vmatpush.msra.mxu0 %v1193_v39  ;;  %1413 = vmatpush.msra.mxu3 %v1056_v13  ;;  %v1040_v39 = vld [vmem:[%s5495_s6 + $0x8] sm:$0xff] }
 0x591   :  { %1319 = vmatpush.msra.mxu2 %v1107_v57  ;;  %v1052_v57 = vld [vmem:[%s5495_s6 + $0x68] sm:$0xff]  ;;  %1381 = vmatpush.msrb.mxu1 %v1199_v15 }
 0x592   :  { %1349 = vmatpush.msra.mxu0 %v1191_v27  ;;  %1414 = vmatpush.msra.mxu3 %v1054_v16  ;;  %v3145_v27 = vmov 24   ;;  %v1160_v13 = vld [vmem:[%s5495_s6 + $0x3c8] sm:$0xff] }
 0x593   :  { %1320 = vmatpush.msra.mxu2 %v1105_v4  ;;  %v1050_v4 = vld [vmem:[%s5495_s6 + $0x58] sm:$0xff]  ;;  %3055 = vset.pattern.permute.xlu2 %v3140_v38  ;;  %v1152_v38 = vld [vmem:[%s5495_s6 + $0x388] sm:$0xff] }
 0x594   :  { %1350 = vmatpush.msra.mxu0 %v1189_v18  ;;  %1415 = vmatpush.msra.mxu3 %v1052_v57  ;;  %v1132_v57 = vld [vmem:[%s5495_s6 + $0x2e8] sm:$0xff] }
 0x595   :  { %3059 = vset.pattern.permute.xlu1 %v3135_v44  ;;  %1321 = vmatpush.msra.mxu2 %v1103_v1  ;;  %v1237_v44 = vld [vmem:[%s5495_s6 + $0x630] sm:$0xff]  ;;  %v1048_v1 = vld [vmem:[%s5495_s6 + $0x48] sm:$0xff] }
 0x596   :  { %1799 = vperm.xlu1 %3059, %v3893_v20   ;;  %1351 = vmatpush.msra.mxu0 %v1187_v17 }
 0x597   :  { %2870 = vmatpush.msk.msrb.mxu2 %vm1259_vm12, %v1253_v36  ;;  %1416 = vmatpush.msra.mxu3 %v1050_v4  ;;  %v1044_v36 = vld [vmem:[%s5495_s6 + $0x28] sm:$0xff] }
 0x598   :  { %1352 = vmatpush.msra.mxu0 %v1185_v62  ;;  %1731 = vperm.xlu2 %3055, %v3893_v20   ;;  %v3147_v62 = vmov 25  }
 0x599   :  { %1391 = vmatpush.msrb.mxu2 %v1251_v25  ;;  %1417 = vmatpush.msra.mxu3 %v1048_v1  ;;  %v1167_v25 = vld [vmem:[%s5495_s6 + $0x400] sm:$0xff] }
 0x59a   :  { %1353 = vmatpush.msra.mxu0 %v1183_v10  ;;  %3058 = vset.pattern.permute.xlu0 %v3141_v51  ;;  %v1126_v51 = vld [vmem:[%s5495_s6 + $0x2b8] sm:$0xff] }
 0x59b   :  { %1392 = vmatpush.msrb.mxu2 %v1249_v50  ;;  %1418 = vmatpush.msra.mxu3 %v1046_v42  ;;  %v3143_v50 = vmov 12   ;;  %v1194_v42 = vld [vmem:[%s5495_s6 + $0x4d8] sm:$0xff] }
 0x59c   :  { %1354 = vmatpush.msra.mxu0 %v1181_v54  ;;  %1782 = vperm.xlu0 %3058, %v3893_v20   ;;  %v3148_v54 = vmov 28  }
 0x59d   :  { %1393 = vmatpush.msrb.mxu2 %v1247_v28  ;;  %1419 = vmatpush.msra.mxu3 %v1044_v36 }
 0x59e   :  { %3061 = vset.pattern.permute.xlu1 %v3136_v43  ;;  %1355 = vmatpush.msra.mxu0 %v1179_v31  ;;  %v1171_v43 = vld [vmem:[%s5495_s6 + $0x420] sm:$0xff]  ;;  %v1094_v31 = vld [vmem:[%s5495_s6 + $0x1b8] sm:$0xff] }
 0x59f   :  { %1833 = vperm.xlu1 %3061, %v3893_v20   ;;  %1394 = vmatpush.msrb.mxu2 %v1245_v53 }
 0x5a0   :  { %1356 = vmatpush.msra.mxu0 %v1177_v2  ;;  %1420 = vmatpush.msra.mxu3 %v1042_v24  ;;  %v1086_v24 = vld [vmem:[%s5495_s6 + $0x178] sm:$0xff] }
 0x5a1   :  { %1395 = vmatpush.msrb.mxu2 %v1243_v29  ;;  %3057 = vset.pattern.permute.xlu2 %v3143_v50  ;;  %v1166_v29 = vld [vmem:[%s5495_s6 + $0x3f8] sm:$0xff] }
 0x5a2   :  { %1357 = vmatpush.msra.mxu0 %v1175_v3  ;;  %1421 = vmatpush.msra.mxu3 %v1040_v39  ;;  %v1090_v3 = vld [vmem:[%s5495_s6 + $0x198] sm:$0xff] }
 0x5a3   :  { %1396 = vmatpush.msrb.mxu2 %v1241_v55  ;;  %1765 = vperm.xlu2 %3057, %v3893_v20   ;;  %v1098_v55 = vld [vmem:[%s5495_s6 + $0x1d8] sm:$0xff] }
 0x5a4   :  { %1358 = vmatpush.msra.mxu0 %v1173_v14  ;;  %3063 = vset.pattern.permute.xlu0 %v3144_v30  ;;  %v1150_v39 = vld [vmem:[%s5495_s6 + $0x378] sm:$0xff]  ;;  %v1124_v30 = vld [vmem:[%s5495_s6 + $0x2a8] sm:$0xff] }
 0x5a5   :  { %1397 = vmatpush.msrb.mxu2 %v1239_v34  ;;  %1881 = vperm.xlu0 %3063, %v3893_v20   ;;  %v1096_v34 = vld [vmem:[%s5495_s6 + $0x1c8] sm:$0xff] }
 0x5a6   :  { %1359 = vmatpush.msra.mxu0 %v1171_v43  ;;  %v3149_v43 = vmov 26  }
 0x5a7   :  { %3064 = vset.pattern.permute.xlu1 %v3137_v40  ;;  %1398 = vmatpush.msrb.mxu2 %v1237_v44 }
 0x5a8   :  { %1898 = vperm.xlu1 %3064, %v3893_v20   ;;  %1360 = vmatpush.msra.mxu0 %v1169_v26  ;;  %v1192_v26 = vld [vmem:[%s5495_s6 + $0x4c8] sm:$0xff] }
 0x5a9   :  { %1399 = vmatpush.msrb.mxu2 %v1235_v32  ;;  %v1158_v32 = vld [vmem:[%s5495_s6 + $0x3b8] sm:$0xff] }
 0x5aa   :  { %1361 = vmatpush.msra.mxu0 %v1167_v25 }
 0x5ab   :  { %1400 = vmatpush.msrb.mxu2 %v1233_v59  ;;  %3060 = vset.pattern.permute.xlu2 %v3146_v5  ;;  %v1196_v59 = vld [vmem:[%s5495_s6 + $0x4e8] sm:$0xff] }
 0x5ac   :  { %1816 = vperm.xlu2 %3060, %v3893_v20   ;;  %v1184_v5 = vld [vmem:[%s5495_s6 + $0x488] sm:$0xff] }
 0x5ad   :  { %1401 = vmatpush.msrb.mxu2 %v1231_v11  ;;  %3072 = vset.pattern.permute.xlu0 %v3148_v54  ;;  %v1154_v11 = vld [vmem:[%s5495_s6 + $0x398] sm:$0xff] }
 0x5ae   :  { %2031 = vperm.xlu0 %3072, %v3893_v20   ;;  %v1114_v54 = vld [vmem:[%s5495_s6 + $0x258] sm:$0xff] }
 0x5b0   :  { %3066 = vset.pattern.permute.xlu1 %v3138_v8 }
 0x5b1   :  { %1915 = vperm.xlu1 %3066, %v3893_v20  }
 0x5b9   :  { %3067 = vset.pattern.permute.xlu1 %v3139_v61  ;;  %v1130_v61 = vld [vmem:[%s5495_s6 + $0x2d8] sm:$0xff] }
 0x5ba   :  { %1932 = vperm.xlu1 %3067, %v3893_v20  }
 0x5c2   :  { %3068 = vset.pattern.permute.xlu1 %v3142_v21  ;;  %v1190_v21 = vld [vmem:[%s5495_s6 + $0x4b8] sm:$0xff] }
 0x5c3   :  { %1949 = vperm.xlu1 %3068, %v3893_v20  }
 0x5cb   :  { %3069 = vset.pattern.permute.xlu1 %v3145_v27  ;;  %v1148_v27 = vld [vmem:[%s5495_s6 + $0x368] sm:$0xff] }
 0x5cc   :  { %v3035_v35 = vpop.permute.xlu1 %3034  ;;  %v4323_v28 = vpop.permute.xlu0 %3044  ;;  %1966 = vperm.xlu1 %3069, %v3893_v20  }
 0x5cd   :  { %v3037_v41 = vunpack.i.h.bf16 %v3035_v35  ;;  %v3036_v18 = vunpack.i.l.bf16 %v3035_v35  ;;  %v3046_v63 = vunpack.i.l.bf16 %v4323_v28  ;;  %v3047_v2 = vunpack.i.h.bf16 %v4323_v28  ;;  %v1188_v35 = vld [vmem:[%s5495_s6 + $0x4a8] sm:$0xff]  ;;  %v1082_v28 = vld [vmem:[%s5495_s6 + $0x158] sm:$0xff] }
 0x5cf   :  { %v1021_v40 = vsel %vm226_vm2, %v3036_v18, %v3037_v41  ;;  %v1020_v53 = vsel %vm226_vm2, %v3046_v63, %v3036_v18  ;;  %v1122_v18 = vld [vmem:[%s5495_s6 + $0x298] sm:$0xff] }
 0x5d0   :  { %v4330_v60 = vmax.f32 %v3904_v49, %v1021_v40  ;;  %v4333_v17 = vmax.f32 %v3908_v45, %v1020_v53  ;;  %v1100_v49 = vld [vmem:[%s5495_s6 + $0x1e8] sm:$0xff]  ;;  %v3150_v40 = vmov 9  }
 0x5d1   :  { %v1164_v45 = vld [vmem:[%s5495_s6 + $0x3e8] sm:$0xff] }
 0x5d2   :  { %1302 = vmatmul.f32.vlgmr.msra.gmra.mxu1 %v4333_v17  ;;  %1322 = vmatmul.f32.vlgmr.msra.gmra.mxu2 %v4330_v60  ;;  %v1080_v53 = vld [vmem:[%s5495_s6 + $0x148] sm:$0xff] }
 0x5d3   :  { %1426 = vmatpush.msra.mxu2 %v1102_v9  ;;  %1466 = vmatpush.msra.mxu1 %v1166_v29  ;;  %v1120_v9 = vld [vmem:[%s5495_s6 + $0x288] sm:$0xff] }
 0x5d4   :  { %3070 = vset.pattern.permute.xlu1 %v3147_v62  ;;  %v3040_v23 = vpop.permute.xlu1 %3039  ;;  %v1144_v29 = vld [vmem:[%s5495_s6 + $0x348] sm:$0xff]  ;;  %v1142_v62 = vld [vmem:[%s5495_s6 + $0x338] sm:$0xff] }
 0x5d5   :  { %1427 = vmatpush.msra.mxu2 %v1100_v49  ;;  %1467 = vmatpush.msra.mxu1 %v1164_v45  ;;  %v3042_v10 = vunpack.i.h.bf16 %v3040_v23  ;;  %v3041_v12 = vunpack.i.l.bf16 %v3040_v23  ;;  %v1078_v49 = vld [vmem:[%s5495_s6 + $0x138] sm:$0xff] }
 0x5d6   :  { %1983 = vperm.xlu1 %3070, %v3893_v20   ;;  %v1118_v45 = vld [vmem:[%s5495_s6 + $0x278] sm:$0xff] }
 0x5d7   :  { %v1019_v47 = vsel %vm226_vm2, %v3042_v10, %v3046_v63  ;;  %v1022_v8 = vsel %vm226_vm2, %v3037_v41, %v3041_v12  ;;  %1428 = vmatpush.msra.mxu2 %v1098_v55  ;;  %1468 = vmatpush.msra.mxu1 %v1162_v58  ;;  %v1023_v36 = vsel %vm226_vm2, %v3041_v12, %v3047_v2  ;;  %v1146_v41 = vld [vmem:[%s5495_s6 + $0x358] sm:$0xff]  ;;  %v1076_v58 = vld [vmem:[%s5495_s6 + $0x128] sm:$0xff] }
 0x5d8   :  { %v1032_v44 = vmax.f32 %v3922_v0, %v1019_v47  ;;  %v4367_v16 = vmax.f32 %v3906_v6, %v1022_v8  ;;  %v1198_v6 = vld [vmem:[%s5495_s6 + $0x4f8] sm:$0xff]  ;;  %v1092_v0 = vld [vmem:[%s5495_s6 + $0x1a8] sm:$0xff]  ;;  %v4436_v25 = vmax.f32 %v3920_v19, %v1023_v36 }
 0x5d9   :  { %1429 = vmatpush.msra.mxu2 %v1096_v34  ;;  %1469 = vmatpush.msra.mxu1 %v1160_v13  ;;  %v1084_v19 = vld [vmem:[%s5495_s6 + $0x168] sm:$0xff]  ;;  %v1186_v63 = vld [vmem:[%s5495_s6 + $0x498] sm:$0xff] }
 0x5da   :  { %1282 = vmatmul.f32.vlgmr.msrb.gmra.mxu0 %v1032_v44  ;;  %1342 = vmatmul.f32.vlgmr.msrb.gmra.mxu3 %v4367_v16  ;;  %v1182_v23 = vld [vmem:[%s5495_s6 + $0x478] sm:$0xff]  ;;  %v1116_v10 = vld [vmem:[%s5495_s6 + $0x268] sm:$0xff] }
 0x5db   :  { %1430 = vmatpush.msra.mxu2 %v1094_v31  ;;  %1446 = vmatpush.msrb.mxu0 %v1134_v7  ;;  %v1140_v12 = vld [vmem:[%s5495_s6 + $0x328] sm:$0xff]  ;;  %v1074_v13 = vld [vmem:[%s5495_s6 + $0x118] sm:$0xff] }
 0x5dc   :  { %1470 = vmatpush.msra.mxu1 %v1158_v32  ;;  %1486 = vmatpush.msrb.mxu3 %v1198_v6  ;;  %v1018_v4 = vpop.permute.xlu1 %1017  ;;  %v1180_v34 = vld [vmem:[%s5495_s6 + $0x468] sm:$0xff]  ;;  %v1138_v47 = vld [vmem:[%s5495_s6 + $0x318] sm:$0xff]  ;;  %v3151_v6 = vmov 31  }
 0x5dd   :  { %1431 = vmatpush.msra.mxu2 %v1092_v0  ;;  %v1024_v15 = vsel %vm226_vm2, %v3047_v2, %v1018_v4  ;;  %1447 = vmatpush.msrb.mxu0 %v1132_v57  ;;  %v4407_v14 = vmax.f32 %v3928_v22, %v1018_v4  ;;  %v1128_v22 = vld [vmem:[%s5495_s6 + $0x2c8] sm:$0xff]  ;;  %v1178_v8 = vld [vmem:[%s5495_s6 + $0x458] sm:$0xff] }
 0x5de   :  { %1471 = vmatpush.msra.mxu1 %v1156_v46  ;;  %v4404_v1 = vmax.f32 %v3910_v37, %v1024_v15  ;;  %1487 = vmatpush.msrb.mxu3 %v1196_v59  ;;  %v1088_v37 = vld [vmem:[%s5495_s6 + $0x188] sm:$0xff]  ;;  %v1230_v0 = vld [vmem:[%s5495_s6 + $0x5f8] sm:$0xff] }
 0x5df   :  { %3071 = vset.pattern.permute.xlu1 %v3149_v43  ;;  %1432 = vmatpush.msra.mxu2 %v1090_v3  ;;  %v1136_v31 = vld [vmem:[%s5495_s6 + $0x308] sm:$0xff]  ;;  %v1110_v57 = vld [vmem:[%s5495_s6 + $0x238] sm:$0xff]  ;;  %v3152_v3 = vmov 17   ;;  %v3153_v43 = vmov 30  }
 0x5e0   :  { %1472 = vmatpush.msra.mxu1 %v1154_v11  ;;  %2000 = vperm.xlu1 %3071, %v3893_v20   ;;  %v1112_v7 = vld [vmem:[%s5495_s6 + $0x248] sm:$0xff]  ;;  %v1174_v46 = vld [vmem:[%s5495_s6 + $0x438] sm:$0xff]  ;;  %v4572_v11 = vld [vmem:[%s5496_s7] sm:$0xff] }
 0x5e1   :  { %1448 = vmatpush.msrb.mxu0 %v1130_v61  ;;  %1488 = vmatpush.msrb.mxu3 %v1194_v42  ;;  %v1176_v32 = vld [vmem:[%s5495_s6 + $0x448] sm:$0xff]  ;;  %v1170_v15 = vld [vmem:[%s5495_s6 + $0x418] sm:$0xff] }
 0x5e2   :  { %2871 = vmatmul.msk.f32.vlgmr.msrb.gmra.mxu2 %vm1255_vm13, %v4407_v14  ;;  %1382 = vmatmul.f32.vlgmr.msrb.gmra.mxu1 %v4404_v1  ;;  %v1108_v59 = vld [vmem:[%s5495_s6 + $0x228] sm:$0xff] }
 0x5e3   :  { %1433 = vmatpush.msra.mxu2 %v1088_v37  ;;  %1449 = vmatpush.msrb.mxu0 %v1128_v22  ;;  %v1172_v4 = vld [vmem:[%s5495_s6 + $0x428] sm:$0xff]  ;;  %v3154_v22 = vmov 32  }
 0x5e4   :  { %1473 = vmatpush.msra.mxu1 %v1152_v38  ;;  %1489 = vmatpush.msrb.mxu3 %v1192_v26  ;;  %v4447_v50 = vpop.permute.xlu1 %1612  ;;  %v1224_v61 = vld [vmem:[%s5495_s6 + $0x5c8] sm:$0xff]  ;;  %v1222_v38 = vld [vmem:[%s5495_s6 + $0x5b8] sm:$0xff] }
 0x5e5   :  { %1434 = vmatpush.msra.mxu2 %v1086_v24  ;;  %1362 = vmatmul.f32.vlgmr.msra.gmra.mxu0 %v4436_v25  ;;  %v1104_v42 = vld [vmem:[%s5495_s6 + $0x208] sm:$0xff]  ;;  %v1254_v26 = vld [vmem:[%s5495_s6 + $0x6b8] sm:$0x7] }
 0x5e6   :  { %1422 = vmatmul.f32.vlgmr.msra.gmra.mxu3 %v1032_v44  ;;  %1450 = vmatpush.msrb.mxu0 %v1126_v51  ;;  %v1072_v44 = vld [vmem:[%s5495_s6 + $0x108] sm:$0xff] }
 0x5e7   :  { %1474 = vmatpush.msra.mxu1 %v1150_v39  ;;  %1490 = vmatpush.msrb.mxu3 %v1190_v21  ;;  %v1168_v36 = vld [vmem:[%s5495_s6 + $0x408] sm:$0xff]  ;;  %v5507_v39 = vmov 0   ;;  %v1218_v21 = vld [vmem:[%s5495_s6 + $0x598] sm:$0xff] }
 0x5e8   :  { %1435 = vmatpush.msra.mxu2 %v1084_v19  ;;  %1451 = vmatpush.msrb.mxu0 %v1124_v30  ;;  %v1220_v24 = vld [vmem:[%s5495_s6 + $0x5a8] sm:$0xff]  ;;  %v1214_v30 = vld [vmem:[%s5495_s6 + $0x578] sm:$0xff] }
 0x5e9   :  { %1475 = vmatpush.msra.mxu1 %v1148_v27  ;;  %1491 = vmatpush.msrb.mxu3 %v1188_v35  ;;  %v1252_v51 = vld [vmem:[%s5495_s6 + $0x6a8] sm:$0xff]  ;;  %v1246_v27 = vld [vmem:[%s5495_s6 + $0x678] sm:$0xff] }
 0x5ea   :  { %1436 = vmatpush.msra.mxu2 %v1082_v28  ;;  %3073 = vset.pattern.permute.xlu1 %v3150_v40  ;;  %v1248_v19 = vld [vmem:[%s5495_s6 + $0x688] sm:$0xff]  ;;  %v3155_v28 = vmov 33   ;;  %v1242_v40 = vld [vmem:[%s5495_s6 + $0x658] sm:$0xff] }
 0x5eb   :  { %1476 = vmatpush.msra.mxu1 %v1146_v41  ;;  %1452 = vmatpush.msrb.mxu0 %v1122_v18  ;;  %v1212_v41 = vld [vmem:[%s5495_s6 + $0x568] sm:$0xff] }
 0x5ec   :  { %1492 = vmatpush.msrb.mxu3 %v1186_v63  ;;  %1723 = vperm.xlu1 %3073, %v3893_v20   ;;  %v1244_v18 = vld [vmem:[%s5495_s6 + $0x668] sm:$0xff]  ;;  %v1210_v63 = vld [vmem:[%s5495_s6 + $0x558] sm:$0xff] }
 0x5ed   :  { %1437 = vmatpush.msra.mxu2 %v1080_v53  ;;  %1453 = vmatpush.msrb.mxu0 %v1120_v9  ;;  %v4499_v55 = vpop.permute.xlu1 %1648  ;;  %v3156_v53 = vmov 29   ;;  %v1208_v9 = vld [vmem:[%s5495_s6 + $0x548] sm:$0xff] }
 0x5ee   :  { %1477 = vmatpush.msra.mxu1 %v1144_v29  ;;  %1493 = vmatpush.msrb.mxu3 %v1184_v5  ;;  %v1240_v29 = vld [vmem:[%s5495_s6 + $0x648] sm:$0xff]  ;;  %v1206_v5 = vld [vmem:[%s5495_s6 + $0x538] sm:$0xff] }
 0x5ef   :  { %1438 = vmatpush.msra.mxu2 %v1078_v49  ;;  %1454 = vmatpush.msrb.mxu0 %v1118_v45  ;;  %v1238_v49 = vld [vmem:[%s5495_s6 + $0x638] sm:$0xff]  ;;  %v1204_v45 = vld [vmem:[%s5495_s6 + $0x528] sm:$0xff] }
 0x5f0   :  { %1478 = vmatpush.msra.mxu1 %v1142_v62  ;;  %1494 = vmatpush.msrb.mxu3 %v1182_v23  ;;  %v1236_v62 = vld [vmem:[%s5495_s6 + $0x628] sm:$0xff] }
 0x5f1   :  { %1439 = vmatpush.msra.mxu2 %v1076_v58  ;;  %1455 = vmatpush.msrb.mxu0 %v1116_v10  ;;  %v3157_v58 = vmov 34   ;;  %v1202_v10 = vld [vmem:[%s5495_s6 + $0x518] sm:$0xff] }
 0x5f2   :  { %1479 = vmatpush.msra.mxu1 %v1140_v12  ;;  %1495 = vmatpush.msrb.mxu3 %v1180_v34  ;;  %v1234_v12 = vld [vmem:[%s5495_s6 + $0x618] sm:$0xff]  ;;  %v1200_v34 = vld [vmem:[%s5495_s6 + $0x508] sm:$0xff] }
 0x5f3   :  { %1440 = vmatpush.msra.mxu2 %v1074_v13  ;;  %1456 = vmatpush.msrb.mxu0 %v1114_v54  ;;  %v1232_v13 = vld [vmem:[%s5495_s6 + $0x608] sm:$0xff]  ;;  %v3158_v54 = vmov 18  }
 0x5f4   :  { %1480 = vmatpush.msra.mxu1 %v1138_v47  ;;  %1496 = vmatpush.msrb.mxu3 %v1178_v8  ;;  %v3159_v47 = vmov 35  }
 0x5f5   :  { %3076 = vset.pattern.permute.xlu1 %v3151_v6  ;;  %1441 = vmatpush.msra.mxu2 %v1072_v44  ;;  %v3160_v44 = vmov 27  }
 0x5f6   :  { %1481 = vmatpush.msra.mxu1 %v1136_v31  ;;  %2082 = vperm.xlu1 %3076, %v3893_v20   ;;  %v4544_v2 = vpop.permute.xlu1 %1700  ;;  %v1228_v20 = vld [vmem:[%s5495_s6 + $0x5e8] sm:$0xff] }
 0x5f7   :  { %1457 = vmatpush.msrb.mxu0 %v1112_v7  ;;  %1497 = vmatpush.msrb.mxu3 %v1176_v32  ;;  %v4684_v7 = vpop.permute.xlu2 %1578 }
 0x5f8   :  { %1442 = vmatmul.f32.vlgmr.msra.gmra.mxu2 %v4333_v17  ;;  %1482 = vmatmul.f32.vlgmr.msra.gmra.mxu1 %v4367_v16  ;;  %v1226_v17 = vld [vmem:[%s5495_s6 + $0x5d8] sm:$0xff] }
 0x5f9   :  { %1506 = vmatpush.msrb.mxu2 %v1230_v0  ;;  %1458 = vmatpush.msrb.mxu0 %v1110_v57  ;;  %v1106_v16 = vld [vmem:[%s5495_s6 + $0x218] sm:$0xff]  ;;  %v4696_v57 = vpop.permute.xlu0 %1595 }
 0x5fa   :  { %1498 = vmatpush.msrb.mxu3 %v1174_v46  ;;  %3062 = vset.pattern.permute.xlu2 %v3152_v3 }
 0x5fb   :  { %1507 = vmatpush.msrb.mxu2 %v1228_v20  ;;  %1459 = vmatpush.msrb.mxu0 %v1108_v59 }
 0x5fc   :  { %1499 = vmatpush.msrb.mxu3 %v1172_v4  ;;  %1850 = vperm.xlu2 %3062, %v4572_v11  }
 0x5fd   :  { %1508 = vmatpush.msrb.mxu2 %v1226_v17  ;;  %1460 = vmatpush.msrb.mxu0 %v1106_v16 }
 0x5fe   :  { %1500 = vmatpush.msrb.mxu3 %v1170_v15  ;;  %3075 = vset.pattern.permute.xlu0 %v3153_v43 }
 0x5ff   :  { %1509 = vmatpush.msrb.mxu2 %v1224_v61  ;;  %2065 = vperm.xlu0 %3075, %v4572_v11   ;;  %v4585_v37 = vpop.permute.xlu1 %1748  ;;  %v4688_v32 = vpop.permute.xlu2 %1630 }
 0x600   :  { %3077 = vset.pattern.permute.xlu1 %v3154_v22  ;;  %1461 = vmatpush.msrb.mxu0 %v1104_v42 }
 0x601   :  { %1501 = vmatpush.msrb.mxu3 %v1168_v36  ;;  %2099 = vperm.xlu1 %3077, %v4572_v11   ;;  %v4702_v59 = vpop.permute.xlu0 %1683 }
 0x602   :  { %1462 = vmatmul.f32.vlgmr.msrb.gmra.mxu0 %v4330_v60  ;;  %1502 = vmatmul.f32.vlgmr.msrb.gmra.mxu3 %v4436_v25  ;;  %v1250_v60 = vld [vmem:[%s5495_s6 + $0x698] sm:$0xff]  ;;  %v1216_v25 = vld [vmem:[%s5495_s6 + $0x588] sm:$0xff]  ;;  %s3161_s6 = smov 111  }
 0x603   :  { %1510 = vmatpush.msrb.mxu2 %v1222_v38  ;;  %2872 = vmatpush.msk.msra.mxu0 %vm1259_vm12, %v1254_v26 }
 0x604   :  { %3065 = vset.pattern.permute.xlu2 %v5507_v39 }
 0x605   :  { %1511 = vmatpush.msrb.mxu2 %v1220_v24  ;;  %1531 = vmatpush.msra.mxu0 %v1252_v51 }
 0x606   :  { %1572 = vperm.xlu2 %3065, %v4572_v11  }
 0x607   :  { %1512 = vmatpush.msrb.mxu2 %v1218_v21  ;;  %1532 = vmatpush.msra.mxu0 %v1250_v60  ;;  %v4692_v6 = vpop.permute.xlu2 %1666 }
 0x608   :  { %3084 = vset.pattern.permute.xlu0 %v5507_v39  ;;  %v4624_v35 = vpop.permute.xlu1 %1799 }
 0x609   :  { %1513 = vmatpush.msrb.mxu2 %v1216_v25  ;;  %1533 = vmatpush.msra.mxu0 %v1248_v19 }
 0x60a   :  { %3078 = vset.pattern.permute.xlu1 %v3155_v28 }
 0x60b   :  { %1514 = vmatpush.msrb.mxu2 %v1214_v30  ;;  %1534 = vmatpush.msra.mxu0 %v1246_v27 }
 0x60c   :  { %2116 = vperm.xlu1 %3078, %v4572_v11  }
 0x60d   :  { %1515 = vmatpush.msrb.mxu2 %v1212_v41  ;;  %1535 = vmatpush.msra.mxu0 %v1244_v18 }
 0x60e   :  { %3074 = vset.pattern.permute.xlu2 %v3156_v53  ;;  %v4708_v36 = vpop.permute.xlu0 %1782 }
 0x60f   :  { %1516 = vmatpush.msrb.mxu2 %v1210_v63  ;;  %1536 = vmatpush.msra.mxu0 %v1242_v40  ;;  %v4698_v46 = vpop.permute.xlu2 %1731 }
 0x610   :  { %2048 = vperm.xlu2 %3074, %v4572_v11  }
 0x611   :  { %1517 = vmatpush.msrb.mxu2 %v1208_v9  ;;  %1537 = vmatpush.msra.mxu0 %v1240_v29  ;;  %v4658_v23 = vpop.permute.xlu1 %1833 }
 0x613   :  { %1518 = vmatpush.msrb.mxu2 %v1206_v5  ;;  %1538 = vmatpush.msra.mxu0 %v1238_v49 }
 0x614   :  { %3079 = vset.pattern.permute.xlu1 %v3157_v58 }
 0x615   :  { %2133 = vperm.xlu1 %3079, %v4572_v11   ;;  %1519 = vmatpush.msrb.mxu2 %v1204_v45 }
 0x616   :  { %1539 = vmatpush.msra.mxu0 %v1236_v62 }
 0x617   :  { %1520 = vmatpush.msrb.mxu2 %v1202_v10  ;;  %v4704_v17 = vpop.permute.xlu2 %1765  ;;  %v4714_v27 = vpop.permute.xlu0 %1881 }
 0x618   :  { %1540 = vmatpush.msra.mxu0 %v1234_v12  ;;  %3081 = vset.pattern.permute.xlu2 %v3158_v54 }
 0x619   :  { %1521 = vmatpush.msrb.mxu2 %v1200_v34  ;;  %1873 = vperm.xlu2 %3081, %v4572_v11  }
 0x61a   :  { %1541 = vmatpush.msra.mxu0 %v1232_v13  ;;  %1522 = vmatmul.f32.vlgmr.msrb.gmra.mxu2 %v4404_v1  ;;  %v4677_v8 = vpop.permute.xlu1 %1898 }
 0x61b   :  { %2873 = vmatmul.msk.f32.vlgmr.msra.gmra.mxu0 %vm1255_vm13, %v4407_v14 }
 0x61d   :  { %3080 = vset.pattern.permute.xlu1 %v3159_v47 }
 0x61e   :  { %2150 = vperm.xlu1 %3080, %v4572_v11  }
 0x61f   :  { %v4710_v38 = vpop.permute.xlu2 %1816 }
 0x620   :  { %v4753_v47 = vpop.permute.xlu0 %2031 }
 0x623   :  { %v4681_v31 = vpop.permute.xlu1 %1915 }
 0x626   :  { %3082 = vset.pattern.permute.xlu1 %v3160_v44 }
 0x627   :  { %2023 = vperm.xlu1 %3082, %v4572_v11  }
 0x62c   :  { %v4686_v1 = vpop.permute.xlu1 %1932 }
 0x62f   :  { %3083 = vset.pattern.permute.xlu1 %v5507_v39 }
 0x635   :  { %v4690_v14 = vpop.permute.xlu1 %1949 }
 0x63e   :  { %v4694_v0 = vpop.permute.xlu1 %1966 }
 0x648   :  { %v4700_v20 = vpop.permute.xlu1 %1983 }
 0x64f   :  { %v1303_v3 = vpop.f32.mrf.mxu1 }
 0x652   :  { %v4706_v16 = vpop.permute.xlu1 %2000 }
 0x655   :  { %v1323_v11 = vpop.f32.mrf.mxu2 }
 0x656   :  { %v4722_v9 = vpop.permute.xlu2 %1850 }
 0x657   :  { %v1283_v4 = vpop.f32.mrf.mxu0 }
 0x658   :  { %v1304_v15 = vadd.f32 %v1303_v3, %v1283_v4 }
 0x65a   :  { %v1324_v61 = vadd.f32 %v1323_v11, %v1304_v15 }
 0x65d   :  { %v1343_v42 = vpop.f32.mrf.mxu3 }
 0x65e   :  { %v1344_v43 = vadd.f32 %v1343_v42, %v1324_v61  ;;  %v4712_v26 = vpop.permute.xlu1 %1723 }
 0x65f   :  { %v1383_v51 = vpop.f32.mrf.mxu1 }
 0x662   :  { %v1363_v22 = vpop.f32.mrf.mxu0 }
 0x663   :  { %v1364_v24 = vadd.f32 %v1363_v22, %v1344_v43 }
 0x665   :  { %v1384_v39 = vadd.f32 %v1383_v51, %v1364_v24  ;;  %v1403_v21 = vpop.f32.mrf.mxu2 }
 0x667   :  { %v1404_v60 = vadd.f32 %v1403_v21, %v1384_v39 }
 0x668   :  { %v4724_v29 = vpop.permute.xlu1 %2082 }
 0x669   :  { %v1549_v25 = vrot.slane %v1404_v60, 6  ;;  %v1553_v19 = vrot.slane %v1404_v60, 4  ;;  %v1557_v30 = vrot.slane %v1404_v60, 2 }
 0x66b   :  { %v1562_v28 = vsel %vm1561_vm14, %v1404_v60, %v1549_v25  ;;  %v1716_v41 = vsel %vm1561_vm14, %v1557_v30, %v1404_v60  ;;  %v2016_v18 = vsel %vm1561_vm14, %v1549_v25, %v1553_v19  ;;  %v1866_v49 = vsel %vm1561_vm14, %v1553_v19, %v1557_v30 }
 0x66c   :  { %v1565_v63 = vsel %vm1564_vm15, %v1562_v28, %v1553_v19  ;;  %v2018_v40 = vsel %vm1564_vm15, %v2016_v18, %v1557_v30  ;;  %v1718_v53 = vsel %vm1564_vm15, %v1716_v41, %v1549_v25  ;;  %v1868_v13 = vsel %vm1564_vm15, %v1866_v49, %v1404_v60  ;;  %v4799_v28 = vpop.permute.xlu2 %1572 }
 0x66d   :  { %v4727_v5 = vsel %vm1567_vm5, %v2018_v40, %v1404_v60  ;;  %v4731_v45 = vsel %vm1567_vm5, %v1718_v53, %v1553_v19  ;;  %v4734_v62 = vsel %vm1567_vm5, %v1565_v63, %v1557_v30  ;;  %v4751_v54 = vsel %vm1567_vm5, %v1868_v13, %v1549_v25  ;;  %v1423_v30 = vpop.f32.mrf.mxu3 }
 0x66e   :  { %v4738_v58 = vmul.f32 %v4724_v29, %v4727_v5  ;;  %v1853_v10 = vmul.f32 %v4722_v9, %v4731_v45  ;;  %v1686_v12 = vmul.f32 %v4702_v59, %v4734_v62  ;;  %v1581_v34 = vmul.f32 %v4684_v7, %v4734_v62 }
 0x66f   :  { %v4757_v44 = vmul.f32 %v4753_v47, %v4727_v5  ;;  %v1884_v4 = vmul.f32 %v4714_v27, %v4751_v54  ;;  %v1703_v3 = vmul.f32 %v4544_v2, %v4734_v62  ;;  %v1598_v15 = vmul.f32 %v4696_v57, %v4734_v62 }
 0x670   :  { %1857 = vrot.lane.b32.xlu0 %v1853_v10, %s3130_s1  ;;  %1690 = vrot.lane.b32.xlu1 %v1686_v12, %s3129_s24  ;;  %v1935_v11 = vmul.f32 %v4686_v1, %v4751_v54  ;;  %v1734_v61 = vmul.f32 %v4698_v46, %v4731_v45  ;;  %v1615_v42 = vmul.f32 %v4447_v50, %v4734_v62 }
 0x671   :  { %1585 = vrot.lane.b32.xlu2 %v1581_v34, %s3126_s30  ;;  %v1986_v43 = vmul.f32 %v4700_v20, %v4751_v54  ;;  %v1836_v22 = vmul.f32 %v4658_v23, %v4731_v45  ;;  %v1633_v24 = vmul.f32 %v4688_v32, %v4734_v62  ;;  %v4788_v39 = vpop.permute.xlu0 %2065  ;;  %v1918_v60 = vmul.f32 %v4681_v31, %v4751_v54 }
 0x672   :  { %v2068_v21 = vmul.f32 %v4788_v39, %v4727_v5  ;;  %v1651_v19 = vmul.f32 %v4499_v55, %v4734_v62  ;;  %v1969_v49 = vmul.f32 %v4694_v0, %v4751_v54  ;;  %v1669_v10 = vmul.f32 %v4692_v6, %v4734_v62 }
 0x673   :  { %v4785_v51 = vpop.permute.xlu1 %2099 }
 0x675   :  { %v1483_v12 = vpop.f32.mrf.mxu1 }
 0x678   :  { %1888 = vrot.lane.b32.xlu0 %v1884_v4, %s3126_s30  ;;  %1707 = vrot.lane.b32.xlu1 %v1703_v3, %s3130_s1  ;;  %v2049_v3 = vpop.permute.xlu2 %2048 }
 0x679   :  { %1602 = vrot.lane.b32.xlu2 %v1598_v15, %s3127_s18 }
 0x67b   :  { %v1443_v25 = vpop.f32.mrf.mxu2 }
 0x67c   :  { %v1444_v41 = vadd.f32 %v1443_v25, %v1423_v30  ;;  %v2102_v25 = vmul.f32 %v4785_v51, %v4727_v5 }
 0x67e   :  { %v2117_v18 = vpop.permute.xlu1 %2116 }
 0x67f   :  { %v1463_v63 = vpop.f32.mrf.mxu0  ;;  %v2119_v40 = vmul.f32 %v2117_v18, %v4727_v5 }
 0x680   :  { %1939 = vrot.lane.b32.xlu0 %v1935_v11, %s3161_s6  ;;  %1738 = vrot.lane.b32.xlu1 %v1734_v61, %s3126_s30  ;;  %v1464_v53 = vadd.f32 %v1463_v63, %v1444_v41  ;;  %v2051_v61 = vmul.f32 %v2049_v3, %v4727_v5 }
 0x681   :  { %1619 = vrot.lane.b32.xlu2 %v1615_v42, %s3162_s22 }
 0x682   :  { %v1484_v13 = vadd.f32 %v1483_v12, %v1464_v53 }
 0x685   :  { %v1503_v34 = vpop.f32.mrf.mxu3 }
 0x686   :  { %v1504_v4 = vadd.f32 %v1503_v34, %v1484_v13 }
 0x688   :  { %1990 = vrot.lane.b32.xlu0 %v1986_v43, %s3129_s24  ;;  %1840 = vrot.lane.b32.xlu1 %v1836_v22, %s3129_s24  ;;  %v1751_v43 = vmul.f32 %v4585_v37, %v4731_v45 }
 0x689   :  { %1637 = vrot.lane.b32.xlu2 %v1633_v24, %s3161_s6 }
 0x690   :  { %2072 = vrot.lane.b32.xlu0 %v2068_v21, %s3162_s22  ;;  %1922 = vrot.lane.b32.xlu1 %v1918_v60, %s3162_s22 }
 0x691   :  { %1655 = vrot.lane.b32.xlu2 %v1651_v19, %s3163_s23  ;;  %v4816_v19 = vpop.permute.xlu1 %2133 }
 0x698   :  { %2123 = vrot.lane.b32.xlu0 %v2119_v40, %s3128_s21  ;;  %1973 = vrot.lane.b32.xlu1 %v1969_v49, %s3128_s21  ;;  %v1543_v42 = vpop.f32.mrf.mxu0 }
 0x699   :  { %1673 = vrot.lane.b32.xlu2 %v1669_v10, %s3128_s21 }
 0x69d   :  { %v1523_v15 = vpop.f32.mrf.mxu2 }
 0x69e   :  { %v1524_v11 = vadd.f32 %v1523_v15, %v1504_v4 }
 0x6a0   :  { %v1544_v22 = vadd.f32 %v1543_v42, %v1524_v11  ;;  %2055 = vrot.lane.b32.xlu1 %v2051_v61, %s3127_s18  ;;  %v1768_v61 = vmul.f32 %v4704_v17, %v4731_v45 }
 0x6a1   :  { %1755 = vrot.lane.b32.xlu2 %v1751_v43, %s3127_s18 }
 0x6a2   :  { %v1550_v24 = vrot.slane %v1544_v22, 6  ;;  %v1554_v21 = vrot.slane %v1544_v22, 4  ;;  %v1558_v60 = vrot.slane %v1544_v22, 2 }
 0x6a4   :  { %v1563_v30 = vsel %vm1561_vm14, %v1544_v22, %v1550_v24  ;;  %v1717_v41 = vsel %vm1561_vm14, %v1558_v60, %v1544_v22  ;;  %v1867_v63 = vsel %vm1561_vm14, %v1554_v21, %v1558_v60  ;;  %v2017_v40 = vsel %vm1561_vm14, %v1550_v24, %v1554_v21 }
 0x6a5   :  { %v1719_v53 = vsel %vm1564_vm15, %v1717_v41, %v1550_v24  ;;  %v1869_v49 = vsel %vm1564_vm15, %v1867_v63, %v1544_v22  ;;  %v2019_v10 = vsel %vm1564_vm15, %v2017_v40, %v1558_v60  ;;  %v1566_v12 = vsel %vm1564_vm15, %v1563_v30, %v1554_v21 }
 0x6a6   :  { %v4827_v34 = vsel %vm1567_vm5, %v2019_v10, %v1544_v22  ;;  %v4830_v13 = vsel %vm1567_vm5, %v1566_v12, %v1558_v60  ;;  %v4833_v4 = vsel %vm1567_vm5, %v1719_v53, %v1554_v21  ;;  %v4836_v15 = vsel %vm1567_vm5, %v1869_v49, %v1550_v24  ;;  %v2151_v24 = vpop.permute.xlu1 %2150 }
 0x6a7   :  { %v1582_v11 = vmul.f32 %v4684_v7, %v4830_v13  ;;  %v1854_v42 = vmul.f32 %v4722_v9, %v4833_v4  ;;  %v1885_v43 = vmul.f32 %v4714_v27, %v4836_v15  ;;  %v2120_v22 = vmul.f32 %v2117_v18, %v4827_v34 }
 0x6a8   :  { %2106 = vrot.lane.b32.xlu1 %v2102_v25, %s3163_s23  ;;  %v4852_v7 = vmul.f32 %v4753_v47, %v4827_v34  ;;  %v4856_v21 = vmul.f32 %v4724_v29, %v4827_v34  ;;  %v4860_v9 = vmul.f32 %v4816_v19, %v4827_v34  ;;  %v4863_v27 = vmul.f32 %v2049_v3, %v4827_v34 }
 0x6a9   :  { %1587 = vrot.lane.b32.xlu0 %v1582_v11, %s3126_s30  ;;  %1772 = vrot.lane.b32.xlu2 %v1768_v61, %s3162_s22  ;;  %v1599_v60 = vmul.f32 %v4696_v57, %v4830_v13  ;;  %v1785_v18 = vmul.f32 %v4708_v36, %v4731_v45  ;;  %v4871_v47 = vmul.f32 %v4785_v51, %v4827_v34 }
 0x6aa   :  { %v4874_v29 = vmul.f32 %v2151_v24, %v4827_v34  ;;  %v1616_v3 = vmul.f32 %v4447_v50, %v4830_v13  ;;  %v1802_v57 = vmul.f32 %v4624_v35, %v4731_v45  ;;  %v1936_v51 = vmul.f32 %v4686_v1, %v4836_v15  ;;  %v4895_v50 = vpop.permute.xlu2 %1873 }
 0x6ab   :  { %v1634_v25 = vmul.f32 %v4688_v32, %v4830_v13  ;;  %v1819_v30 = vmul.f32 %v4710_v38, %v4731_v45  ;;  %v1987_v41 = vmul.f32 %v4700_v20, %v4836_v15  ;;  %v1652_v1 = vmul.f32 %v4499_v55, %v4830_v13 }
 0x6ac   :  { %v1901_v32 = vmul.f32 %v4677_v8, %v4751_v54  ;;  %v2069_v40 = vmul.f32 %v4788_v39, %v4827_v34  ;;  %v1670_v20 = vmul.f32 %v4692_v6, %v4830_v13  ;;  %v1952_v55 = vmul.f32 %v4690_v14, %v4751_v54 }
 0x6ad   :  { %v1752_v49 = vmul.f32 %v4585_v37, %v4833_v4  ;;  %v2003_v39 = vmul.f32 %v4706_v16, %v4751_v54  ;;  %v2153_v10 = vmul.f32 %v2151_v24, %v4727_v5  ;;  %v1769_v12 = vmul.f32 %v4704_v17, %v4833_v4 }
 0x6ae   :  { %v1786_v61 = vmul.f32 %v4708_v36, %v4833_v4  ;;  %v1704_v24 = vmul.f32 %v4544_v2, %v4830_v13  ;;  %v4976_v2 = vpop.permute.xlu1 %2023 }
 0x6b0   :  { %1859 = vrot.lane.b32.xlu1 %v1854_v42, %s3130_s1 }
 0x6b1   :  { %1604 = vrot.lane.b32.xlu0 %v1599_v60, %s3127_s18  ;;  %1789 = vrot.lane.b32.xlu2 %v1785_v18, %s3161_s6  ;;  %v1735_v18 = vmul.f32 %v4698_v46, %v4833_v4 }
 0x6b8   :  { %1890 = vrot.lane.b32.xlu1 %v1885_v43, %s3126_s30  ;;  %v1803_v43 = vmul.f32 %v4624_v35, %v4833_v4 }
 0x6b9   :  { %1621 = vrot.lane.b32.xlu0 %v1616_v3, %s3162_s22  ;;  %1806 = vrot.lane.b32.xlu2 %v1802_v57, %s3163_s23  ;;  %v2136_v3 = vmul.f32 %v4816_v19, %v4727_v5  ;;  %v1953_v57 = vmul.f32 %v4690_v14, %v4836_v15 }
 0x6c0   :  { %1941 = vrot.lane.b32.xlu1 %v1936_v51, %s3161_s6 }
 0x6c1   :  { %1639 = vrot.lane.b32.xlu0 %v1634_v25, %s3161_s6  ;;  %1823 = vrot.lane.b32.xlu2 %v1819_v30, %s3128_s21  ;;  %v2004_v25 = vmul.f32 %v4706_v16, %v4836_v15  ;;  %v1837_v30 = vmul.f32 %v4658_v23, %v4833_v4  ;;  %v1970_v23 = vmul.f32 %v4694_v0, %v4836_v15 }
 0x6c8   :  { %1992 = vrot.lane.b32.xlu1 %v1987_v41, %s3129_s24  ;;  %v1919_v41 = vmul.f32 %v4681_v31, %v4836_v15 }
 0x6c9   :  { %1657 = vrot.lane.b32.xlu0 %v1652_v1, %s3163_s23  ;;  %1905 = vrot.lane.b32.xlu2 %v1901_v32, %s3127_s18 }
 0x6cb   :  { %v4906_v63 = vpop.permute.xlu2 %1585 }
 0x6d0   :  { %2074 = vrot.lane.b32.xlu1 %v2069_v40, %s3162_s22 }
 0x6d1   :  { %1675 = vrot.lane.b32.xlu0 %v1670_v20, %s3128_s21  ;;  %1956 = vrot.lane.b32.xlu2 %v1952_v55, %s3163_s23 }
 0x6d3   :  { %v4917_v53 = vpop.permute.xlu2 %1602 }
 0x6d8   :  { %2125 = vrot.lane.b32.xlu1 %v2120_v22, %s3128_s21 }
 0x6d9   :  { %1757 = vrot.lane.b32.xlu0 %v1752_v49, %s3127_s18  ;;  %2007 = vrot.lane.b32.xlu2 %v2003_v39, %s3130_s1 }
 0x6db   :  { %v4926_v6 = vpop.permute.xlu2 %1619 }
 0x6e0   :  { %2157 = vrot.lane.b32.xlu1 %v2153_v10, %s3130_s1 }
 0x6e1   :  { %1774 = vrot.lane.b32.xlu0 %v1769_v12, %s3162_s22  ;;  %2038 = vrot.lane.b32.xlu2 %v4757_v44, %s3126_s30  ;;  %v1687_v44 = vmul.f32 %v4702_v59, %v4830_v13  ;;  %v1902_v59 = vmul.f32 %v4677_v8, %v4836_v15 }
 0x6e2   :  { %v4935_v37 = vpop.permute.xlu0 %1857  ;;  %v1691_v51 = vpop.permute.xlu1 %1690 }
 0x6e3   :  { %v4937_v11 = vpop.permute.xlu2 %1637 }
 0x6e9   :  { %1791 = vrot.lane.b32.xlu0 %v1786_v61, %s3161_s6  ;;  %2089 = vrot.lane.b32.xlu2 %v4738_v58, %s3161_s6  ;;  %v1820_v58 = vmul.f32 %v4710_v38, %v4833_v4 }
 0x6ea   :  { %v4944_v17 = vpop.permute.xlu0 %1888  ;;  %v1708_v1 = vpop.permute.xlu1 %1707 }
 0x6eb   :  { %v4946_v42 = vpop.permute.xlu2 %1655 }
 0x6f1   :  { %1808 = vrot.lane.b32.xlu0 %v1803_v43, %s3163_s23  ;;  %1692 = vrot.lane.b32.xlu2 %v1687_v44, %s3129_s24  ;;  %v1576_v43 = vmul.f32 %v4799_v28, %v4830_v13  ;;  %v1575_v44 = vmul.f32 %v4799_v28, %v4734_v62 }
 0x6f2   :  { %v4956_v22 = vpop.permute.xlu0 %1939  ;;  %v1739_v40 = vpop.permute.xlu1 %1738 }
 0x6f3   :  { %v4954_v36 = vpop.permute.xlu2 %1673 }
 0x6f9   :  { %1825 = vrot.lane.b32.xlu0 %v1820_v58, %s3128_s21  ;;  %1709 = vrot.lane.b32.xlu2 %v1704_v24, %s3130_s1 }
 0x6fa   :  { %v4968_v60 = vpop.permute.xlu0 %1990  ;;  %v5018_v49 = vpop.permute.xlu1 %1840 }
 0x6fb   :  { %v4964_v35 = vpop.permute.xlu2 %1755 }
 0x701   :  { %1907 = vrot.lane.b32.xlu0 %v1902_v59, %s3127_s18  ;;  %1740 = vrot.lane.b32.xlu2 %v1735_v18, %s3126_s30 }
 0x702   :  { %v4983_v8 = vpop.permute.xlu0 %2072  ;;  %v5024_v39 = vpop.permute.xlu1 %1922 }
 0x703   :  { %v4974_v38 = vpop.permute.xlu2 %1772 }
 0x709   :  { %1958 = vrot.lane.b32.xlu0 %v1953_v57, %s3163_s23  ;;  %2140 = vrot.lane.b32.xlu2 %v2136_v3, %s3129_s24 }
 0x70a   :  { %v4994_v14 = vpop.permute.xlu0 %2123 }
 0x70b   :  { %v4986_v46 = vpop.permute.xlu2 %1789 }
 0x711   :  { %2009 = vrot.lane.b32.xlu0 %v2004_v25, %s3130_s1  ;;  %1842 = vrot.lane.b32.xlu2 %v1837_v30, %s3129_s24 }
 0x713   :  { %v4996_v19 = vpop.permute.xlu2 %1806 }
 0x719   :  { %2040 = vrot.lane.b32.xlu0 %v4852_v7, %s3126_s30  ;;  %1924 = vrot.lane.b32.xlu2 %v1919_v41, %s3162_s22 }
 0x71b   :  { %v1588_v16 = vpop.permute.xlu0 %1587  ;;  %v5003_v32 = vpop.permute.xlu2 %1823 }
 0x71c   :  { %v1593_v58 = vadd.f32 %v1588_v16, %v1576_v43 }
 0x721   :  { %2091 = vrot.lane.b32.xlu0 %v4856_v21, %s3161_s6  ;;  %1975 = vrot.lane.b32.xlu2 %v1970_v23, %s3128_s21 }
 0x723   :  { %v1605_v20 = vpop.permute.xlu0 %1604  ;;  %v5010_v31 = vpop.permute.xlu2 %1905 }
 0x724   :  { %v1610_v59 = vadd.f32 %v1605_v20, %v1593_v58 }
 0x729   :  { %2142 = vrot.lane.b32.xlu0 %v4860_v9, %s3129_s24  ;;  %2057 = vrot.lane.b32.xlu2 %v4863_v27, %s3127_s18  ;;  %v5030_v27 = vpop.permute.xlu1 %1973 }
 0x72b   :  { %v1622_v7 = vpop.permute.xlu0 %1621  ;;  %v5016_v55 = vpop.permute.xlu2 %1956 }
 0x72c   :  { %v1624_v18 = vsel %vm1623_vm6, %v4926_v6, %v1622_v7  ;;  %v1628_v57 = vadd.f32 %v1622_v7, %v1610_v59 }
 0x731   :  { %2108 = vrot.lane.b32.xlu2 %v4871_v47, %s3163_s23  ;;  %v1589_v47 = vsel %vm110_vm0, %v4906_v63, %v1588_v16  ;;  %v5044_v13 = vpop.permute.xlu1 %2055 }
 0x732   :  { %v1592_v24 = vadd.f32 %v1589_v47, %v1575_v44 }
 0x733   :  { %v1640_v0 = vpop.permute.xlu0 %1639  ;;  %v5022_v21 = vpop.permute.xlu2 %2007 }
 0x734   :  { %v1642_v63 = vsel %vm1641_vm7, %v4937_v11, %v1640_v0  ;;  %v1646_v30 = vadd.f32 %v1640_v0, %v1628_v57 }
 0x739   :  { %2159 = vrot.lane.b32.xlu2 %v4874_v29, %s3130_s1  ;;  %v1606_v29 = vsel %vm168_vm1, %v4917_v53, %v1605_v20 }
 0x73a   :  { %v1609_v3 = vadd.f32 %v1606_v29, %v1592_v24  ;;  %v5053_v29 = vpop.permute.xlu1 %2106 }
 0x73b   :  { %v1658_v9 = vpop.permute.xlu0 %1657  ;;  %v5028_v10 = vpop.permute.xlu2 %2038 }
 0x73c   :  { %v1627_v62 = vadd.f32 %v1624_v18, %v1609_v3  ;;  %v1660_v53 = vsel %vm1659_vm8, %v4946_v42, %v1658_v9  ;;  %v1664_v16 = vadd.f32 %v1658_v9, %v1646_v30  ;;  %v1727_v42 = vmul.f32 %v4712_v26, %v4833_v4 }
 0x73e   :  { %v1645_v41 = vadd.f32 %v1642_v63, %v1627_v62 }
 0x740   :  { %v1663_v23 = vadd.f32 %v1660_v53, %v1645_v41 }
 0x742   :  { %v1860_v62 = vpop.permute.xlu1 %1859 }
 0x743   :  { %v1676_v12 = vpop.permute.xlu0 %1675  ;;  %v5032_v61 = vpop.permute.xlu2 %2089 }
 0x744   :  { %v1677_v6 = vsel %vm226_vm2, %v4954_v36, %v1676_v12  ;;  %v1681_v20 = vadd.f32 %v1676_v12, %v1664_v16  ;;  %v1726_v36 = vmul.f32 %v4712_v26, %v4731_v45 }
 0x745   :  { %v1680_v7 = vadd.f32 %v1677_v6, %v1663_v23 }
 0x74a   :  { %v1891_v23 = vpop.permute.xlu1 %1890 }
 0x74b   :  { %v1758_v28 = vpop.permute.xlu0 %1757  ;;  %v1693_v25 = vpop.permute.xlu2 %1692 }
 0x74c   :  { %v1694_v43 = vsel %vm284_vm3, %v1691_v51, %v1693_v25  ;;  %v1698_v47 = vadd.f32 %v1693_v25, %v1681_v20 }
 0x74d   :  { %v1697_v44 = vadd.f32 %v1694_v43, %v1680_v7 }
 0x753   :  { %v1775_v11 = vpop.permute.xlu0 %1774  ;;  %v1710_v58 = vpop.permute.xlu2 %1709 }
 0x754   :  { %v1711_v0 = vsel %vm342_vm4, %v1708_v1, %v1710_v58  ;;  %v1715_v24 = vadd.f32 %v1710_v58, %v1698_v47  ;;  %v1759_v1 = vsel %vm168_vm1, %v4964_v35, %v1758_v28  ;;  %v1776_v4 = vsel %vm1623_vm6, %v4974_v38, %v1775_v11 }
 0x755   :  { %v1714_v9 = vadd.f32 %v1711_v0, %v1697_v44  ;;  %v1861_v0 = vsel %vm342_vm4, %v4935_v37, %v1860_v62 }
 0x756   :  { %v1729_v12 = vadd.f32 %v1727_v42, %v1715_v24  ;;  %v1876_v42 = vmul.f32 %v4895_v50, %v4751_v54 }
 0x757   :  { %v1728_v59 = vadd.f32 %v1726_v36, %v1714_v9  ;;  %v1942_v36 = vpop.permute.xlu1 %1941 }
 0x75b   :  { %v1792_v51 = vpop.permute.xlu0 %1791  ;;  %v1741_v18 = vpop.permute.xlu2 %1740 }
 0x75c   :  { %v1742_v3 = vsel %vm110_vm0, %v1739_v40, %v1741_v18  ;;  %v1746_v57 = vadd.f32 %v1741_v18, %v1729_v12  ;;  %v1793_v16 = vsel %vm1641_vm7, %v4986_v46, %v1792_v51 }
 0x75d   :  { %v1745_v63 = vadd.f32 %v1742_v3, %v1728_v59 }
 0x75e   :  { %v1763_v25 = vadd.f32 %v1758_v28, %v1746_v57 }
 0x75f   :  { %v1762_v30 = vadd.f32 %v1759_v1, %v1745_v63 }
 0x760   :  { %v1780_v53 = vadd.f32 %v1775_v11, %v1763_v25 }
 0x761   :  { %v1779_v41 = vadd.f32 %v1776_v4, %v1762_v30 }
 0x762   :  { %v1797_v40 = vadd.f32 %v1792_v51, %v1780_v53 }
 0x763   :  { %v1809_v26 = vpop.permute.xlu0 %1808  ;;  %v5065_v45 = vpop.permute.xlu2 %2140  ;;  %v1796_v6 = vadd.f32 %v1793_v16, %v1779_v41 }
 0x764   :  { %v1810_v20 = vsel %vm1659_vm8, %v4996_v19, %v1809_v26  ;;  %v1814_v35 = vadd.f32 %v1809_v26, %v1797_v40  ;;  %v1877_v19 = vmul.f32 %v4895_v50, %v4836_v15  ;;  %v1993_v41 = vpop.permute.xlu1 %1992 }
 0x765   :  { %v1813_v28 = vadd.f32 %v1810_v20, %v1796_v6  ;;  %v1994_v40 = vsel %vm284_vm3, %v4968_v60, %v1993_v41 }
 0x76b   :  { %v1826_v43 = vpop.permute.xlu0 %1825  ;;  %v1843_v7 = vpop.permute.xlu2 %1842 }
 0x76c   :  { %v1827_v38 = vsel %vm226_vm2, %v5003_v32, %v1826_v43  ;;  %v1831_v47 = vadd.f32 %v1826_v43, %v1814_v35  ;;  %v1844_v44 = vsel %vm284_vm3, %v5018_v49, %v1843_v7  ;;  %v1892_v49 = vsel %vm110_vm0, %v4944_v17, %v1891_v23 }
 0x76d   :  { %v1830_v11 = vadd.f32 %v1827_v38, %v1813_v28 }
 0x76e   :  { %v1848_v58 = vadd.f32 %v1843_v7, %v1831_v47  ;;  %v2075_v47 = vpop.permute.xlu1 %2074 }
 0x76f   :  { %v1847_v46 = vadd.f32 %v1844_v44, %v1830_v11 }
 0x770   :  { %v1865_v24 = vadd.f32 %v1860_v62, %v1848_v58  ;;  %v1943_v62 = vsel %vm1641_vm7, %v4956_v22, %v1942_v36 }
 0x771   :  { %v1864_v9 = vadd.f32 %v1861_v0, %v1847_v46 }
 0x772   :  { %v1879_v32 = vadd.f32 %v1877_v19, %v1865_v24 }
 0x773   :  { %v1908_v12 = vpop.permute.xlu0 %1907  ;;  %v1878_v59 = vadd.f32 %v1876_v42, %v1864_v9  ;;  %v1925_v51 = vpop.permute.xlu2 %1924 }
 0x774   :  { %v1896_v18 = vadd.f32 %v1891_v23, %v1879_v32  ;;  %v1909_v37 = vsel %vm168_vm1, %v5010_v31, %v1908_v12  ;;  %v1926_v15 = vsel %vm1623_vm6, %v5024_v39, %v1925_v51 }
 0x775   :  { %v1895_v3 = vadd.f32 %v1892_v49, %v1878_v59 }
 0x776   :  { %v1913_v57 = vadd.f32 %v1908_v12, %v1896_v18  ;;  %v2126_v19 = vpop.permute.xlu1 %2125 }
 0x777   :  { %v1912_v63 = vadd.f32 %v1909_v37, %v1895_v3  ;;  %v2127_v59 = vsel %vm226_vm2, %v4994_v14, %v2126_v19 }
 0x778   :  { %v1930_v54 = vadd.f32 %v1925_v51, %v1913_v57 }
 0x779   :  { %v1929_v50 = vadd.f32 %v1926_v15, %v1912_v63 }
 0x77a   :  { %v1947_v1 = vadd.f32 %v1942_v36, %v1930_v54 }
 0x77b   :  { %v1959_v25 = vpop.permute.xlu0 %1958  ;;  %v1946_v30 = vadd.f32 %v1943_v62, %v1929_v50  ;;  %v1976_v4 = vpop.permute.xlu2 %1975 }
 0x77c   :  { %v1960_v17 = vsel %vm1659_vm8, %v5016_v55, %v1959_v25  ;;  %v1964_v53 = vadd.f32 %v1959_v25, %v1947_v1  ;;  %v1977_v31 = vsel %vm226_vm2, %v5030_v27, %v1976_v4  ;;  %v2027_v55 = vmul.f32 %v4976_v2, %v4827_v34 }
 0x77d   :  { %v1963_v26 = vadd.f32 %v1960_v17, %v1946_v30  ;;  %v2026_v27 = vmul.f32 %v4976_v2, %v4727_v5  ;;  %v2076_v34 = vsel %vm1623_vm6, %v4983_v8, %v2075_v47  ;;  %v2166_v8 = vld [vmem:[%s5499_s10] sm:$0x3] }
 0x77e   :  { %v1981_v16 = vadd.f32 %v1976_v4, %v1964_v53  ;;  %v2169_v37 = vperm.slane %v2166_v8, 1  ;;  %v2158_v63 = vpop.permute.xlu1 %2157  ;;  %v2168_v15 = vperm.slane %v2166_v8, 0 }
 0x77f   :  { %v1980_v39 = vadd.f32 %v1977_v31, %v1963_v26 }
 0x780   :  { %v1998_v6 = vadd.f32 %v1993_v41, %v1981_v16 }
 0x781   :  { %v1997_v22 = vadd.f32 %v1994_v40, %v1980_v39 }
 0x783   :  { %v2010_v23 = vpop.permute.xlu0 %2009  ;;  %v2058_v7 = vpop.permute.xlu2 %2057 }
 0x784   :  { %v2011_v20 = vsel %vm342_vm4, %v5022_v21, %v2010_v23  ;;  %v2015_v35 = vadd.f32 %v2010_v23, %v1998_v6  ;;  %v2059_v21 = vsel %vm168_vm1, %v5044_v13, %v2058_v7 }
 0x785   :  { %v2014_v28 = vadd.f32 %v2011_v20, %v1997_v22 }
 0x786   :  { %v2029_v43 = vadd.f32 %v2027_v55, %v2015_v35 }
 0x787   :  { %v2028_v38 = vadd.f32 %v2026_v27, %v2014_v28 }
 0x78b   :  { %v2041_v44 = vpop.permute.xlu0 %2040  ;;  %v2109_v5 = vpop.permute.xlu2 %2108 }
 0x78c   :  { %v2042_v60 = vsel %vm110_vm0, %v5028_v10, %v2041_v44  ;;  %v2046_v11 = vadd.f32 %v2041_v44, %v2029_v43  ;;  %v2110_v32 = vsel %vm1659_vm8, %v5053_v29, %v2109_v5  ;;  %v2505_v43 = vld [vmem:[%s5497_s8] sm:$0xff] }
 0x78d   :  { %v2045_v58 = vadd.f32 %v2042_v60, %v2028_v38 }
 0x78e   :  { %v2063_v46 = vadd.f32 %v2058_v7, %v2046_v11 }
 0x78f   :  { %v2062_v0 = vadd.f32 %v2059_v21, %v2045_v58 }
 0x790   :  { %v2080_v24 = vadd.f32 %v2075_v47, %v2063_v46 }
 0x791   :  { %v2079_v2 = vadd.f32 %v2076_v34, %v2062_v0 }
 0x793   :  { %v2092_v42 = vpop.permute.xlu0 %2091  ;;  %v2160_v18 = vpop.permute.xlu2 %2159 }
 0x794   :  { %v2093_v9 = vsel %vm1641_vm7, %v5032_v61, %v2092_v42  ;;  %v2097_v36 = vadd.f32 %v2092_v42, %v2080_v24  ;;  %v2161_v54 = vsel %vm342_vm4, %v2158_v63, %v2160_v18  ;;  %v2513_v63 = vld [vmem:[%s5498_s9] sm:$0xff] }
 0x795   :  { %v2096_v10 = vadd.f32 %v2093_v9, %v2079_v2 }
 0x796   :  { %v2114_v12 = vadd.f32 %v2109_v5, %v2097_v36 }
 0x797   :  { %v2113_v13 = vadd.f32 %v2110_v32, %v2096_v10 }
 0x798   :  { %v2131_v49 = vadd.f32 %v2126_v19, %v2114_v12 }
 0x799   :  { %v2130_v51 = vadd.f32 %v2127_v59, %v2113_v13 }
 0x79b   :  { %v2143_v3 = vpop.permute.xlu0 %2142 }
 0x79c   :  { %v2144_v61 = vsel %vm284_vm3, %v5065_v45, %v2143_v3  ;;  %v2148_v57 = vadd.f32 %v2143_v3, %v2131_v49 }
 0x79d   :  { %v2147_v29 = vadd.f32 %v2144_v61, %v2130_v51 }
 0x79e   :  { %v2165_v50 = vadd.f32 %v2160_v18, %v2148_v57 }
 0x79f   :  { %v2164_v14 = vadd.f32 %v2161_v54, %v2147_v29 }
 0x7a0   :  { %v2173_v62 = vmul.f32 %v2169_v37, %v2165_v50 }
 0x7a1   :  { %v2172_v1 = vmul.f32 %v2168_v15, %v2164_v14 }
 0x7a2   :  { %v2174_v25 = vsel %vm342_vm4, %v2173_v62, 0.0 }
 0x7a3   :  { %v2175_v30 = vadd.f32 %v2174_v25, %v2172_v1 }
 0x7a5   :  { %2176 = vadd.xlane.f32.xlu0 %v2175_v30 }
 0x818   :  { %v2177_v4 = vpop.xlane.xlu0 %2176 }
 0x819   :  { %v2193_v17 = vand.u32 4294901760, %v2177_v4 }
 0x81b   :  { %v2220_v53 = vsub.f32 %v2177_v4, %v2193_v17  ;;  %2194 = vmatpush.msrb.mxu1 %v2193_v17 }
 0x81c   :  { %2200 = vmatmul.f32.vlgmr.msrb.gmra.mxu1 %v3810_v48 }
 0x81d   :  { %v2221_v45 = vand.u32 4294901760, %v2220_v53  ;;  %2247 = vmatpush.msra.mxu1 %v2220_v53 }
 0x81f   :  { %v2222_v31 = vsub.f32 %v2220_v53, %v2221_v45  ;;  %2296 = vmatpush.msrb.mxu1 %v2221_v45  ;;  %v2889_v53 = vld [vmem:[%s5500_s11 + $0x148] sm:$0xff]  ;;  %v2888_v45 = vld [vmem:[%s5500_s11 + $0x140] sm:$0xff] }
 0x821   :  { %v2223_v41 = vand.u32 4294901760, %v2222_v31  ;;  %v2887_v31 = vld [vmem:[%s5500_s11 + $0x138] sm:$0xff] }
 0x823   :  { %2224 = vmatpush.msra.mxu3 %v2223_v41  ;;  %v2560_v41 = vld [vmem:[%s5500_s11 + $0x78] sm:$0xff] }
 0x824   :  { %2226 = vmatmul.f32.vlgmr.msra.gmra.mxu3 %v3800_v56  ;;  %2250 = vmatmul.f32.vlgmr.msra.gmra.mxu1 %v3803_v52 }
 0x825   :  { %2270 = vmatpush.msrb.mxu3 %v2193_v17 }
 0x827   :  { %2318 = vmatpush.msra.mxu3 %v2193_v17 }
 0x82c   :  { %2274 = vmatmul.f32.vlgmr.msrb.gmra.mxu3 %v3806_v33  ;;  %2298 = vmatmul.f32.vlgmr.msrb.gmra.mxu1 %v3800_v56 }
 0x834   :  { %2320 = vmatmul.f32.vlgmr.msra.gmra.mxu3 %v3800_v56 }
 0x899   :  { %v2201_v26 = vpop.f32.mrf.mxu1 }
 0x8a1   :  { %v2251_v39 = vpop.f32.mrf.mxu1 }
 0x8a7   :  { %v2227_v16 = vpop.f32.mrf.mxu3 }
 0x8a8   :  { %v2228_v40 = vadd.f32 %v2227_v16, %v2201_v26  ;;  %v2899_v26 = vld [vmem:[%s5500_s11 + $0x198] sm:$0x1f]  ;;  %v2559_v16 = vld [vmem:[%s5500_s11 + $0x70] sm:$0xff] }
 0x8a9   :  { %v2299_v20 = vpop.f32.mrf.mxu1 }
 0x8aa   :  { %v2252_v22 = vadd.f32 %v2251_v39, %v2228_v40  ;;  %v2898_v39 = vld [vmem:[%s5500_s11 + $0x190] sm:$0xff] }
 0x8ab   :  { %v2886_v40 = vld [vmem:[%s5500_s11 + $0x130] sm:$0xff] }
 0x8af   :  { %v2275_v6 = vpop.f32.mrf.mxu3 }
 0x8b0   :  { %v2276_v23 = vadd.f32 %v2275_v6, %v2252_v22  ;;  %v2558_v6 = vld [vmem:[%s5500_s11 + $0x68] sm:$0xff] }
 0x8b1   :  { %v2897_v22 = vld [vmem:[%s5500_s11 + $0x188] sm:$0xff] }
 0x8b2   :  { %v2300_v35 = vadd.f32 %v2299_v20, %v2276_v23  ;;  %v2885_v23 = vld [vmem:[%s5500_s11 + $0x128] sm:$0xff]  ;;  %v2557_v20 = vld [vmem:[%s5500_s11 + $0x60] sm:$0xff] }
 0x8b7   :  { %v2321_v55 = vpop.f32.mrf.mxu3 }
 0x8b8   :  { %v2322_v27 = vadd.f32 %v2321_v55, %v2300_v35  ;;  %v2896_v35 = vld [vmem:[%s5500_s11 + $0x180] sm:$0xff]  ;;  %v2570_v55 = vld [vmem:[%s5500_s11 + $0xc8] sm:$0x1f] }
 0x8ba   :  { %v2324_v28 = vmul.f32 0.0025510204, %v2322_v27  ;;  %v2884_v27 = vld [vmem:[%s5500_s11 + $0x120] sm:$0xff] }
 0x8bc   :  { %2327 = vperm.xlu1 %3083, %v2324_v28   ;;  %v2556_v28 = vld [vmem:[%s5500_s11 + $0x58] sm:$0xff] }
 0x8c4   :  { %2508 = vperm.xlu1 %3083, %v2505_v43   ;;  %v2895_v43 = vld [vmem:[%s5500_s11 + $0x178] sm:$0xff] }
 0x92e   :  { %v2328_v7 = vpop.permute.xlu1 %2327 }
 0x92f   :  { %v2330_v38 = vsub.f32 %v2164_v14, %v2328_v7  ;;  %v2331_v47 = vsub.f32 %v2165_v50, %v2328_v7  ;;  %v2569_v7 = vld [vmem:[%s5500_s11 + $0xc0] sm:$0xff] }
 0x931   :  { %v2332_v44 = vmul.f32 %v2330_v38, %v2330_v38  ;;  %v2333_v60 = vmul.f32 %v2331_v47, %v2331_v47 }
 0x933   :  { %v2334_v11 = vmul.f32 %v2332_v44, %v2168_v15  ;;  %v2335_v58 = vmul.f32 %v2333_v60, %v2169_v37  ;;  %v2568_v44 = vld [vmem:[%s5500_s11 + $0xb8] sm:$0xff]  ;;  %v2894_v60 = vld [vmem:[%s5500_s11 + $0x170] sm:$0xff] }
 0x935   :  { %v2336_v21 = vsel %vm342_vm4, %v2335_v58, 0.0  ;;  %vm2606_vm4 = vcmask 1044480   ;;  %v2554_v58 = vld [vmem:[%s5500_s11 + $0x48] sm:$0xff] }
 0x936   :  { %v2337_v46 = vadd.f32 %v2336_v21, %v2334_v11  ;;  %v2509_v29 = vpop.permute.xlu1 %2508  ;;  %v2882_v11 = vld [vmem:[%s5500_s11 + $0x110] sm:$0xff]  ;;  %v2893_v21 = vld [vmem:[%s5500_s11 + $0x168] sm:$0xff] }
 0x938   :  { %2338 = vadd.xlane.f32.xlu2 %v2337_v46  ;;  %v2881_v46 = vld [vmem:[%s5500_s11 + $0x108] sm:$0xff] }
 0x9ab   :  { %v2339_v0 = vpop.xlane.xlu2 %2338 }
 0x9ac   :  { %v2355_v34 = vand.u32 4294901760, %v2339_v0 }
 0x9ae   :  { %v2382_v5 = vsub.f32 %v2339_v0, %v2355_v34  ;;  %2356 = vmatpush.msrb.mxu0 %v2355_v34  ;;  %2432 = vmatpush.msrb.mxu3 %v2355_v34  ;;  %v2553_v0 = vld [vmem:[%s5500_s11 + $0x40] sm:$0xff] }
 0x9af   :  { %2362 = vmatmul.f32.vlgmr.msrb.gmra.mxu0 %v3810_v48  ;;  %2436 = vmatmul.f32.vlgmr.msrb.gmra.mxu3 %v3806_v33 }
 0x9b0   :  { %v2383_v2 = vand.u32 4294901760, %v2382_v5  ;;  %2409 = vmatpush.msra.mxu2 %v2382_v5  ;;  %2900 = vmatpush.msk.msra.mxu3 %vm2606_vm4, %v2899_v26  ;;  %v2929_v26 = vld [vmem:[%s5500_s11 + $0x268] sm:$0x1f] }
 0x9b1   :  { %2412 = vmatmul.f32.vlgmr.msra.gmra.mxu2 %v3803_v52 }
 0x9b2   :  { %v2384_v24 = vsub.f32 %v2382_v5, %v2383_v2  ;;  %2458 = vmatpush.msra.mxu0 %v2383_v2  ;;  %2610 = vmatpush.msrb.mxu2 %v2889_v53  ;;  %v2880_v5 = vld [vmem:[%s5500_s11 + $0x100] sm:$0xff]  ;;  %v2879_v2 = vld [vmem:[%s5500_s11 + $0xf8] sm:$0xff] }
 0x9b3   :  { %2637 = vmatpush.msra.mxu3 %v2898_v39  ;;  %v2561_v53 = vld [vmem:[%s5500_s11 + $0x80] sm:$0xff]  ;;  %v2957_v39 = vld [vmem:[%s5500_s11 + $0x338] sm:$0x1f] }
 0x9b4   :  { %v2385_v19 = vand.u32 4294901760, %v2384_v24  ;;  %2611 = vmatpush.msrb.mxu2 %v2888_v45  ;;  %2655 = vmatpush.msrb.mxu0 %v2560_v41  ;;  %v2878_v24 = vld [vmem:[%s5500_s11 + $0xf0] sm:$0xff]  ;;  %v2943_v45 = vld [vmem:[%s5500_s11 + $0x2c8] sm:$0xff] }
 0x9b5   :  { %2638 = vmatpush.msra.mxu3 %v2897_v22  ;;  %v2914_v41 = vld [vmem:[%s5500_s11 + $0x1f0] sm:$0xff]  ;;  %v2941_v22 = vld [vmem:[%s5500_s11 + $0x2b8] sm:$0xff] }
 0x9b6   :  { %2386 = vmatpush.msra.mxu1 %v2385_v19  ;;  %2612 = vmatpush.msrb.mxu2 %v2887_v31  ;;  %v2877_v19 = vld [vmem:[%s5500_s11 + $0xe8] sm:$0xff]  ;;  %v2545_v31 = vld [vmem:[%s5500_s11] sm:$0xff] }
 0x9b7   :  { %2388 = vmatmul.f32.vlgmr.msra.gmra.mxu1 %v3800_v56  ;;  %2460 = vmatmul.f32.vlgmr.msra.gmra.mxu0 %v3800_v56 }
 0x9b8   :  { %2480 = vmatpush.msrb.mxu1 %v2355_v34  ;;  %2656 = vmatpush.msrb.mxu0 %v2559_v16  ;;  %v2892_v34 = vld [vmem:[%s5500_s11 + $0x160] sm:$0xff] }
 0x9b9   :  { %2613 = vmatpush.msrb.mxu2 %v2886_v40  ;;  %2639 = vmatpush.msra.mxu3 %v2896_v35  ;;  %v2942_v16 = vld [vmem:[%s5500_s11 + $0x2c0] sm:$0xff]  ;;  %v2913_v40 = vld [vmem:[%s5500_s11 + $0x1e8] sm:$0xff]  ;;  %v2927_v35 = vld [vmem:[%s5500_s11 + $0x258] sm:$0xff] }
 0x9ba   :  { %2657 = vmatpush.msrb.mxu0 %v2558_v6  ;;  %2902 = vmatpush.msk.msra.mxu1 %vm2606_vm4, %v2570_v55  ;;  %v2928_v6 = vld [vmem:[%s5500_s11 + $0x260] sm:$0xff]  ;;  %v2940_v55 = vld [vmem:[%s5500_s11 + $0x2b0] sm:$0xff] }
 0x9bb   :  { %2614 = vmatpush.msrb.mxu2 %v2885_v23  ;;  %2640 = vmatpush.msra.mxu3 %v2895_v43  ;;  %v2956_v23 = vld [vmem:[%s5500_s11 + $0x330] sm:$0xff] }
 0x9bc   :  { %2658 = vmatpush.msrb.mxu0 %v2557_v20  ;;  %2682 = vmatpush.msra.mxu1 %v2569_v7  ;;  %v2912_v20 = vld [vmem:[%s5500_s11 + $0x1e0] sm:$0xff]  ;;  %v2926_v43 = vld [vmem:[%s5500_s11 + $0x250] sm:$0xff]  ;;  %v2939_v7 = vld [vmem:[%s5500_s11 + $0x2a8] sm:$0xff] }
 0x9bd   :  { %2615 = vmatpush.msrb.mxu2 %v2884_v27  ;;  %2641 = vmatpush.msra.mxu3 %v2894_v60  ;;  %v2955_v27 = vld [vmem:[%s5500_s11 + $0x328] sm:$0xff]  ;;  %v2938_v60 = vld [vmem:[%s5500_s11 + $0x2a0] sm:$0xff] }
 0x9be   :  { %2659 = vmatpush.msrb.mxu0 %v2556_v28  ;;  %2683 = vmatpush.msra.mxu1 %v2568_v44  ;;  %v2911_v28 = vld [vmem:[%s5500_s11 + $0x1d8] sm:$0xff]  ;;  %v2925_v44 = vld [vmem:[%s5500_s11 + $0x248] sm:$0xff] }
 0x9bf   :  { %2482 = vmatmul.f32.vlgmr.msrb.gmra.mxu1 %v3800_v56  ;;  %2642 = vmatpush.msra.mxu3 %v2893_v21  ;;  %v2924_v21 = vld [vmem:[%s5500_s11 + $0x240] sm:$0xff] }
 0x9c1   :  { %2643 = vmatpush.msra.mxu3 %v2892_v34  ;;  %v2908_v34 = vld [vmem:[%s5500_s11 + $0x1c0] sm:$0xff] }
 0xa2c   :  { %v2363_v42 = vpop.f32.mrf.mxu0 }
 0xa32   :  { %v2437_v33 = vpop.f32.mrf.mxu3 }
 0xa34   :  { %v2389_v9 = vpop.f32.mrf.mxu1  ;;  %v2413_v48 = vpop.f32.mrf.mxu2 }
 0xa35   :  { %v2390_v36 = vadd.f32 %v2389_v9, %v2363_v42  ;;  %v2461_v32 = vpop.f32.mrf.mxu0 }
 0xa37   :  { %v2414_v10 = vadd.f32 %v2413_v48, %v2390_v36 }
 0xa39   :  { %v2438_v12 = vadd.f32 %v2437_v33, %v2414_v10  ;;  %v2876_v10 = vld [vmem:[%s5500_s11 + $0xe0] sm:$0xff] }
 0xa3b   :  { %v2462_v52 = vadd.f32 %v2461_v32, %v2438_v12  ;;  %v2552_v32 = vld [vmem:[%s5500_s11 + $0x38] sm:$0xff] }
 0xa3c   :  { %v2483_v13 = vpop.f32.mrf.mxu1  ;;  %v2891_v12 = vld [vmem:[%s5500_s11 + $0x158] sm:$0xff] }
 0xa3d   :  { %v2484_v59 = vadd.f32 %v2483_v13, %v2462_v52  ;;  %v2567_v52 = vld [vmem:[%s5500_s11 + $0xb0] sm:$0xff]  ;;  %v2875_v13 = vld [vmem:[%s5500_s11 + $0xd8] sm:$0xff]  ;;  %2644 = vmatpush.msra.mxu3 %v2891_v12  ;;  %v2934_v12 = vld [vmem:[%s5500_s11 + $0x280] sm:$0xff] }
 0xa3e   :  { %2684 = vmatpush.msra.mxu1 %v2567_v52  ;;  %v2949_v52 = vld [vmem:[%s5500_s11 + $0x2f8] sm:$0xff] }
 0xa3f   :  { %v2486_v8 = vmul.f32 0.0025510204, %v2484_v59  ;;  %v2551_v59 = vld [vmem:[%s5500_s11 + $0x30] sm:$0xff] }
 0xa41   :  { %v2487_v51 = vadd.f32 1e-05, %v2486_v8  ;;  %v2890_v8 = vld [vmem:[%s5500_s11 + $0x150] sm:$0xff] }
 0xa42   :  { %2645 = vmatpush.msra.mxu3 %v2890_v8  ;;  %v2933_v8 = vld [vmem:[%s5500_s11 + $0x278] sm:$0xff] }
 0xa43   :  { %3088 = vrsqrt.f32 %v2487_v51  ;;  %vm2494_vm2 = vweird.f32 %v2487_v51 }
 0xa49   :  { %v3089_v49 = vpop.eup %3088 }
 0xa4a   :  { %v2489_v18 = vmul.f32 %v3089_v49, %v2487_v51  ;;  %vm2495_vm1 = vweird.f32 %v3089_v49  ;;  %v2566_v51 = vld [vmem:[%s5500_s11 + $0xa8] sm:$0xff] }
 0xa4b   :  { %vm2496_vm3 = vmor %vm2494_vm2, %vm2495_vm1  ;;  %2685 = vmatpush.msra.mxu1 %v2566_v51  ;;  %v2948_v51 = vld [vmem:[%s5500_s11 + $0x2f0] sm:$0xff] }
 0xa4c   :  { %v2490_v3 = vmul.f32 %v3089_v49, %v2489_v18  ;;  %v2550_v18 = vld [vmem:[%s5500_s11 + $0x28] sm:$0xff] }
 0xa4e   :  { %v2491_v37 = vmul.f32 0.5, %v2490_v3  ;;  %v2919_v3 = vld [vmem:[%s5500_s11 + $0x218] sm:$0xff] }
 0xa4f   :  { %2730 = vmatpush.msrb.mxu3 %v2919_v3 }
 0xa50   :  { %v2492_v61 = vsub.f32 1.5, %v2491_v37  ;;  %v2565_v37 = vld [vmem:[%s5500_s11 + $0xa0] sm:$0xff] }
 0xa51   :  { %2686 = vmatpush.msra.mxu1 %v2565_v37 }
 0xa52   :  { %v2493_v56 = vmul.f32 %v3089_v49, %v2492_v61  ;;  %v2947_v61 = vld [vmem:[%s5500_s11 + $0x2e8] sm:$0xff] }
 0xa54   :  { %v2497_v57 = vsel %vm2496_vm3, %v3089_v49, %v2493_v56  ;;  %v2874_v49 = vld [vmem:[%s5500_s11 + $0xd0] sm:$0xff]  ;;  %v2549_v56 = vld [vmem:[%s5500_s11 + $0x20] sm:$0xff] }
 0xa55   :  { %2500 = vperm.xlu1 %3083, %v2497_v57   ;;  %v2918_v57 = vld [vmem:[%s5500_s11 + $0x210] sm:$0xff] }
 0xa56   :  { %2731 = vmatpush.msrb.mxu3 %v2918_v57 }
 0xa5d   :  { %2516 = vperm.xlu1 %3083, %v2513_v63   ;;  %v2564_v63 = vld [vmem:[%s5500_s11 + $0x98] sm:$0xff] }
 0xa5e   :  { %2687 = vmatpush.msra.mxu1 %v2564_v63 }
 0xac7   :  { %v2501_v15 = vpop.permute.xlu1 %2500 }
 0xac8   :  { %v2503_v54 = vmul.f32 %v2501_v15, %v2330_v38  ;;  %v2504_v50 = vmul.f32 %v2501_v15, %v2331_v47  ;;  %v2883_v38 = vld [vmem:[%s5500_s11 + $0x118] sm:$0xff]  ;;  %v2555_v47 = vld [vmem:[%s5500_s11 + $0x50] sm:$0xff] }
 0xac9   :  { %2616 = vmatpush.msrb.mxu2 %v2883_v38  ;;  %2660 = vmatpush.msrb.mxu0 %v2555_v47  ;;  %v2548_v15 = vld [vmem:[%s5500_s11 + $0x18] sm:$0xff]  ;;  %v2954_v38 = vld [vmem:[%s5500_s11 + $0x320] sm:$0xff]  ;;  %v2910_v47 = vld [vmem:[%s5500_s11 + $0x1d0] sm:$0xff] }
 0xaca   :  { %v2511_v14 = vmul.f32 %v2509_v29, %v2503_v54  ;;  %v2512_v62 = vmul.f32 %v2509_v29, %v2504_v50  ;;  %v2946_v29 = vld [vmem:[%s5500_s11 + $0x2e0] sm:$0xff]  ;;  %v2917_v54 = vld [vmem:[%s5500_s11 + $0x208] sm:$0xff]  ;;  %v2563_v50 = vld [vmem:[%s5500_s11 + $0x90] sm:$0xff] }
 0xacb   :  { %2617 = vmatpush.msrb.mxu2 %v2882_v11  ;;  %2661 = vmatpush.msrb.mxu0 %v2554_v58  ;;  %v2953_v11 = vld [vmem:[%s5500_s11 + $0x318] sm:$0xff]  ;;  %v2909_v58 = vld [vmem:[%s5500_s11 + $0x1c8] sm:$0xff] }
 0xacc   :  { %2732 = vmatpush.msrb.mxu3 %v2917_v54  ;;  %2688 = vmatpush.msra.mxu1 %v2563_v50 }
 0xacd   :  { %2618 = vmatpush.msrb.mxu2 %v2881_v46  ;;  %2662 = vmatpush.msrb.mxu0 %v2553_v0  ;;  %v2937_v46 = vld [vmem:[%s5500_s11 + $0x298] sm:$0xff]  ;;  %v2952_v0 = vld [vmem:[%s5500_s11 + $0x310] sm:$0xff] }
 0xacf   :  { %v2517_v1 = vpop.permute.xlu1 %2516  ;;  %2619 = vmatpush.msrb.mxu2 %v2880_v5  ;;  %2663 = vmatpush.msrb.mxu0 %v2552_v32  ;;  %v2923_v5 = vld [vmem:[%s5500_s11 + $0x238] sm:$0xff]  ;;  %v2921_v32 = vld [vmem:[%s5500_s11 + $0x228] sm:$0xff] }
 0xad0   :  { %v5139_v25 = vadd.f32 %v2517_v1, %v2511_v14  ;;  %v5141_v30 = vadd.f32 %v2517_v1, %v2512_v62  ;;  %v2945_v14 = vld [vmem:[%s5500_s11 + $0x2d8] sm:$0xff]  ;;  %v2547_v62 = vld [vmem:[%s5500_s11 + $0x10] sm:$0xff]  ;;  %v2916_v1 = vld [vmem:[%s5500_s11 + $0x200] sm:$0xff] }
 0xad1   :  { %2620 = vmatpush.msrb.mxu2 %v2879_v2  ;;  %2664 = vmatpush.msrb.mxu0 %v2551_v59  ;;  %v2936_v2 = vld [vmem:[%s5500_s11 + $0x290] sm:$0xff]  ;;  %v2920_v59 = vld [vmem:[%s5500_s11 + $0x220] sm:$0xff] }
 0xad2   :  { %v2521_v4 = vmax.f32 %v5139_v25, 0.0  ;;  %v2522_v17 = vmax.f32 %v5141_v30, 0.0  ;;  %v2562_v25 = vld [vmem:[%s5500_s11 + $0x88] sm:$0xff]  ;;  %v2944_v30 = vld [vmem:[%s5500_s11 + $0x2d0] sm:$0xff]  ;;  %2733 = vmatpush.msrb.mxu3 %v2916_v1 }
 0xad3   :  { %2621 = vmatpush.msrb.mxu2 %v2878_v24  ;;  %2665 = vmatpush.msrb.mxu0 %v2550_v18  ;;  %v2951_v24 = vld [vmem:[%s5500_s11 + $0x308] sm:$0xff]  ;;  %v2932_v18 = vld [vmem:[%s5500_s11 + $0x270] sm:$0xff] }
 0xad4   :  { %2527 = vrot.lane.b32.xlu0 %v2522_v17, %s3126_s30  ;;  %2525 = vrot.lane.b32.xlu1 %v2521_v4, %s3126_s30 }
 0xad5   :  { %2622 = vmatpush.msrb.mxu2 %v2877_v19  ;;  %2666 = vmatpush.msrb.mxu0 %v2549_v56  ;;  %v2907_v19 = vld [vmem:[%s5500_s11 + $0x1b8] sm:$0xff] }
 0xad6   :  { %2689 = vmatpush.msra.mxu1 %v2562_v25 }
 0xad7   :  { %2623 = vmatpush.msrb.mxu2 %v2876_v10  ;;  %2667 = vmatpush.msrb.mxu0 %v2548_v15  ;;  %v2906_v10 = vld [vmem:[%s5500_s11 + $0x1b0] sm:$0xff] }
 0xad8   :  { %2690 = vmatpush.msra.mxu1 %v2561_v53 }
 0xad9   :  { %2624 = vmatpush.msrb.mxu2 %v2875_v13  ;;  %2668 = vmatpush.msrb.mxu0 %v2547_v62  ;;  %v2905_v13 = vld [vmem:[%s5500_s11 + $0x1a8] sm:$0xff] }
 0xada   :  { %2930 = vmatpush.msk.msrb.mxu1 %vm2606_vm4, %v2929_v26 }
 0xadb   :  { %2625 = vmatpush.msrb.mxu2 %v2874_v49  ;;  %v2904_v49 = vld [vmem:[%s5500_s11 + $0x1a0] sm:$0xff] }
 0xadc   :  { %2757 = vmatpush.msrb.mxu1 %v2928_v6 }
 0xadd   :  { %2806 = vmatpush.msra.mxu2 %v2947_v61 }
 0xade   :  { %2758 = vmatpush.msrb.mxu1 %v2927_v35 }
 0xadf   :  { %2807 = vmatpush.msra.mxu2 %v2946_v29 }
 0xae0   :  { %2759 = vmatpush.msrb.mxu1 %v2926_v43 }
 0xae1   :  { %2808 = vmatpush.msra.mxu2 %v2945_v14 }
 0xae2   :  { %2760 = vmatpush.msrb.mxu1 %v2925_v44 }
 0xae3   :  { %2809 = vmatpush.msra.mxu2 %v2944_v30 }
 0xae4   :  { %2761 = vmatpush.msrb.mxu1 %v2924_v21 }
 0xae5   :  { %2810 = vmatpush.msra.mxu2 %v2943_v45 }
 0xae6   :  { %2762 = vmatpush.msrb.mxu1 %v2923_v5 }
 0xae7   :  { %2811 = vmatpush.msra.mxu2 %v2942_v16 }
 0xae9   :  { %2812 = vmatpush.msra.mxu2 %v2941_v22 }
 0xaeb   :  { %2813 = vmatpush.msra.mxu2 %v2940_v55 }
 0xaed   :  { %2814 = vmatpush.msra.mxu2 %v2939_v7 }
 0xaef   :  { %2815 = vmatpush.msra.mxu2 %v2938_v60 }
 0xaf1   :  { %2816 = vmatpush.msra.mxu2 %v2937_v46 }
 0xaf3   :  { %2817 = vmatpush.msra.mxu2 %v2936_v2 }
 0xb46   :  { %v2528_v42 = vpop.permute.xlu0 %2527  ;;  %v2526_v9 = vpop.permute.xlu1 %2525 }
 0xb47   :  { %v5251_v48 = vmax.f32 %v2522_v17, %v2528_v42  ;;  %v2529_v36 = vsel %vm110_vm0, %v2526_v9, %v2528_v42  ;;  %v2915_v17 = vld [vmem:[%s5500_s11 + $0x1f8] sm:$0xff]  ;;  %v2922_v42 = vld [vmem:[%s5500_s11 + $0x230] sm:$0xff]  ;;  %v2935_v9 = vld [vmem:[%s5500_s11 + $0x288] sm:$0xff]  ;;  %vm2603_vm0 = vcmask 629760  }
 0xb48   :  { %v5256_v33 = vmax.f32 %v2521_v4, %v2529_v36  ;;  %v2546_v4 = vld [vmem:[%s5500_s11 + $0x8] sm:$0xff]  ;;  %2734 = vmatpush.msrb.mxu3 %v2915_v17  ;;  %v2950_v36 = vld [vmem:[%s5500_s11 + $0x300] sm:$0xff]  ;;  %2763 = vmatpush.msrb.mxu1 %v2922_v42 }
 0xb49   :  { %2538 = vrot.lane.b32.xlu1 %v5251_v48, %s3162_s22  ;;  %2669 = vmatpush.msrb.mxu0 %v2546_v4 }
 0xb4a   :  { %2536 = vrot.lane.b32.xlu2 %v5256_v33, %s3162_s22  ;;  %2735 = vmatpush.msrb.mxu3 %v2914_v41  ;;  %s2861_s22 = sshll.u32 %s5502_s13, 4  ;;  %s2862_s22 = int_to_ptr.hbm [resolvable:$true] %s2861_s22 }
 0xb4b   :  { %2670 = vmatpush.msrb.mxu0 %v2545_v31  ;;  %2818 = vmatpush.msra.mxu2 %v2935_v9 }
 0xb4c   :  { %2736 = vmatpush.msrb.mxu3 %v2913_v40  ;;  %2764 = vmatpush.msrb.mxu1 %v2921_v32 }
 0xb4d   :  { %2958 = vmatpush.msk.msra.mxu0 %vm2606_vm4, %v2957_v39  ;;  %2819 = vmatpush.msra.mxu2 %v2934_v12  ;;  %v3085_v39 = vld [vmem:[%s5501_s12] ss:$0 sm:$0xff] }
 0xb4e   :  { %2737 = vmatpush.msrb.mxu3 %v2912_v20  ;;  %2765 = vmatpush.msrb.mxu1 %v2920_v59 }
 0xb4f   :  { %2833 = vmatpush.msra.mxu0 %v2956_v23  ;;  %2820 = vmatpush.msra.mxu2 %v2933_v8 }
 0xb50   :  { %2738 = vmatpush.msrb.mxu3 %v2911_v28 }
 0xb51   :  { %2834 = vmatpush.msra.mxu0 %v2955_v27  ;;  %2821 = vmatpush.msra.mxu2 %v2932_v18 }
 0xb52   :  { %2739 = vmatpush.msrb.mxu3 %v2910_v47 }
 0xb53   :  { %2835 = vmatpush.msra.mxu0 %v2954_v38 }
 0xb54   :  { %2740 = vmatpush.msrb.mxu3 %v2909_v58 }
 0xb55   :  { %2836 = vmatpush.msra.mxu0 %v2953_v11 }
 0xb56   :  { %2741 = vmatpush.msrb.mxu3 %v2908_v34 }
 0xb57   :  { %2837 = vmatpush.msra.mxu0 %v2952_v0 }
 0xb58   :  { %2742 = vmatpush.msrb.mxu3 %v2907_v19 }
 0xb59   :  { %2838 = vmatpush.msra.mxu0 %v2951_v24 }
 0xb5a   :  { %2743 = vmatpush.msrb.mxu3 %v2906_v10 }
 0xb5b   :  { %2839 = vmatpush.msra.mxu0 %v2950_v36 }
 0xb5c   :  { %2744 = vmatpush.msrb.mxu3 %v2905_v13 }
 0xb5d   :  { %2840 = vmatpush.msra.mxu0 %v2949_v52 }
 0xb5e   :  { %2745 = vmatpush.msrb.mxu3 %v2904_v49 }
 0xb5f   :  { %2841 = vmatpush.msra.mxu0 %v2948_v51 }
 0xba4   :  { %v2537_v3 = vpop.permute.xlu2 %2536 }
 0xbbb   :  { %v2539_v37 = vpop.permute.xlu1 %2538 }
 0xbbc   :  { %v2540_v61 = vsel %vm1623_vm6, %v2537_v3, %v2539_v37  ;;  %v2544_v56 = vmax.f32 %v5251_v48, %v2539_v37 }
 0xbbd   :  { %v2543_v57 = vmax.f32 %v5256_v33, %v2540_v61 }
 0xbbe   :  { %v2601_v63 = vrot.slane %v2544_v56, 2  ;;  %2903 = vmatmul.msk.f32.vlgmr.msra.gmra.mxu1 %vm2603_vm0, %v2544_v56  ;;  %v2723_v15 = vrot.slane %v2544_v56, 4  ;;  %v2799_v54 = vrot.slane %v2544_v56, 6 }
 0xbbf   :  { %2671 = vmatmul.f32.vlgmr.msrb.gmra.mxu0 %v2543_v57  ;;  %v2600_v29 = vrot.slane %v2543_v57, 2  ;;  %v2722_v50 = vrot.slane %v2543_v57, 4  ;;  %v2798_v14 = vrot.slane %v2543_v57, 6 }
 0xbc0   :  { %2901 = vmatmul.msk.f32.vlgmr.msra.gmra.mxu3 %vm2603_vm0, %v2601_v63 }
 0xbc1   :  { %2626 = vmatmul.f32.vlgmr.msrb.gmra.mxu2 %v2600_v29 }
 0xbc6   :  { %2931 = vmatmul.msk.f32.vlgmr.msrb.gmra.mxu1 %vm2603_vm0, %v2723_v15 }
 0xbc7   :  { %2959 = vmatmul.msk.f32.vlgmr.msra.gmra.mxu0 %vm2603_vm0, %v2799_v54 }
 0xbc8   :  { %2746 = vmatmul.f32.vlgmr.msrb.gmra.mxu3 %v2722_v50 }
 0xbc9   :  { %2822 = vmatmul.f32.vlgmr.msra.gmra.mxu2 %v2798_v14 }
 0xc3b   :  { %v2692_v62 = vpop.f32.mrf.mxu1 }
 0xc3c   :  { %v2672_v1 = vpop.f32.mrf.mxu0 }
 0xc43   :  { %v2647_v25 = vpop.f32.mrf.mxu3  ;;  %v2767_v4 = vpop.f32.mrf.mxu1 }
 0xc44   :  { %v2627_v48 = vpop.f32.mrf.mxu2  ;;  %v2843_v53 = vpop.f32.mrf.mxu0 }
 0xc45   :  { %v2648_v30 = vadd.f32 %v2647_v25, %v2627_v48 }
 0xc47   :  { %v2673_v33 = vadd.f32 %v2672_v1, %v2648_v30 }
 0xc49   :  { %v2693_v45 = vadd.f32 %v2692_v62, %v2673_v33 }
 0xc4b   :  { %v2747_v17 = vpop.f32.mrf.mxu3 }
 0xc4c   :  { %v2768_v31 = vadd.f32 %v2767_v4, %v2747_v17  ;;  %v2823_v41 = vpop.f32.mrf.mxu2 }
 0xc4d   :  { %v2844_v26 = vadd.f32 %v2843_v53, %v2823_v41 }
 0xc4e   :  { %v2770_v16 = vadd.f32 %v2768_v31, %v2693_v45 }
 0xc50   :  { %v2846_v40 = vadd.f32 %v2844_v26, %v2770_v16 }
 0xc52   :  { %v2851_v6 = vadd.f32 %v3085_v39, %v2846_v40 }
 0xc54   :  { %2853 = vst.msk [vmem:[#allocation2] sm:$0x3] %vm2852_vm9, %v2851_v6 }
 0xc55   :  { %2864 = dma.vmem_to_hbm [thread:$0]  %s2860_s2, 32, %s2862_s22, [#allocation3]  }
 0xc56   :  { %3115 = dma.done.wait [#allocation3], 32  }
 0xc57   :  { %3116 = vsyncadd [#allocation3], 4294967264 }
 0xc58   :  { %2869 = vsyncpa [#allocation3], 1 }

</bundles_post_ra>
